<compile_context>
chip_gen: v7x
topology: tpu7x:2x2x1
jax: 0.10.0
libtpu: 0.0.40
codegen_flags: <defaults>
</compile_context>

<pallas_src>
import functools

import jax
import jax.numpy as jnp
from jax.experimental import pallas as pl
from jax.experimental.pallas import tpu as pltpu  # noqa: F401  (TPU backend)

# ----------------------------- model hyper-params -----------------------------
TARGET_VOCAB = 16
EMBED = 32
NUM_LAYERS = 2
HEADS = 4
HEAD_DIM = EMBED // HEADS
FORWARD_EXPANSION = 2
MAX_LENGTH = 16
LN_EPS = 1e-5
LANE = 128                      # lane-dense padded width for the final projection
NEG_INF = -1e12                 # mask fill value (matches the reference)


# ----------------------------- fused decoder kernel ---------------------------
def decoder_kernel(x_ref, enc_ref, tmask_ref, smask_ref,
                   sa_wq_ref, sa_wk_ref, sa_wv_ref, sa_wo_ref, sa_bo_ref,
                   ca_wq_ref, ca_wk_ref, ca_wv_ref, ca_wo_ref, ca_bo_ref,
                   ln_g_ref, ln_b_ref, ln1_g_ref, ln1_b_ref, ln2_g_ref, ln2_b_ref,
                   w1_ref, b1_ref, w2_ref, b2_ref,
                   fc_w_ref, fc_b_ref,
                   out_ref,
                   *, heads, head_dim, num_layers):
    scale = 1.0 / (EMBED ** 0.5)     # reference scales by sqrt(embed_size), not head_dim

    def layer_norm(x, g, b):
        mu = jnp.mean(x, axis=-1, keepdims=True)
        var = jnp.mean((x - mu) ** 2, axis=-1, keepdims=True)
        return (x - mu) * jax.lax.rsqrt(var + LN_EPS) * g + b

    def mha(xq, xkv, add_mask, wq, wk, wv, wo, bo):
        # xq: (Rq, E), xkv: (Rk, E), add_mask: (Rq, Rk) additive {0, -1e12}
        # wq/wk/wv: block-diagonal (E, E), wo: (E, E), bo: (1, E)
        q = jnp.dot(xq, wq, preferred_element_type=jnp.float32)
        k = jnp.dot(xkv, wk, preferred_element_type=jnp.float32)
        v = jnp.dot(xkv, wv, preferred_element_type=jnp.float32)
        out = jnp.zeros((xq.shape[0], EMBED), jnp.float32)
        for h in range(heads):
            lo = h * head_dim
            hi = lo + head_dim
            # energy[q, k] = q_h . k_h   (einsum 'qd,kd->qk')
            s = jax.lax.dot_general(q[:, lo:hi], k[:, lo:hi],
                                    (((1,), (1,)), ((), ())),
                                    preferred_element_type=jnp.float32)
            s = (s + add_mask) * scale
            m = jnp.max(s, axis=-1, keepdims=True)
            p = jnp.exp(s - m)
            attn = p * pl.reciprocal(jnp.sum(p, axis=-1, keepdims=True), approx=True)
            hv = jnp.dot(attn, v[:, lo:hi], preferred_element_type=jnp.float32)
            # concat(head_outs) @ Wo  ==  sum_h head_out_h @ Wo[h*hd:(h+1)*hd, :]
            out = out + jnp.dot(hv, wo[lo:hi, :], preferred_element_type=jnp.float32)
        return out + bo

    x = x_ref[...]                 # (N*Lq, E)  embedded tokens
    enc = enc_ref[...]             # (N*Lk, E)  encoder output
    tmask = tmask_ref[...]         # (N*Lq, N*Lq) additive target mask (block-diag batched)
    smask = smask_ref[...]         # (N*Lq, N*Lk) additive source mask (block-diag batched)

    for l in range(num_layers):    # static unroll (NUM_LAYERS = 2)
        # ---- DecoderBlock: masked self-attention ----
        sa = mha(x, x, tmask,
                 sa_wq_ref[l], sa_wk_ref[l], sa_wv_ref[l], sa_wo_ref[l], sa_bo_ref[l])
        query = layer_norm(sa + x, ln_g_ref[l], ln_b_ref[l])
        # ---- TransformerBlock: cross-attention on encoder output ----
        ca = mha(query, enc, smask,
                 ca_wq_ref[l], ca_wk_ref[l], ca_wv_ref[l], ca_wo_ref[l], ca_bo_ref[l])
        x1 = layer_norm(ca + query, ln1_g_ref[l], ln1_b_ref[l])
        # ---- feed-forward ----
        h = jnp.dot(x1, w1_ref[l], preferred_element_type=jnp.float32) + b1_ref[l]
        h = jnp.maximum(h, 0.0)
        ff = jnp.dot(h, w2_ref[l], preferred_element_type=jnp.float32) + b2_ref[l]
        x = layer_norm(ff + x1, ln2_g_ref[l], ln2_b_ref[l])

    # final vocab projection, zero-padded to LANE columns -> unmasked lane-dense store
    out_ref[...] = jnp.dot(x, fc_w_ref[...],
                           preferred_element_type=jnp.float32) + fc_b_ref[...]


# ----------------------------- glue helpers ------------------------------------
def _batched_additive_mask(mask_b):
    """(N, Lq, Lk) {0,1} mask -> (N*Lq, N*Lk) additive mask.

    Per-batch blocks carry (1-mask)*-1e12; cross-batch blocks are fully masked,
    so attention over the flattened (N*L) rows is exactly block-diagonal.
    """
    N, Lq, Lk = mask_b.shape
    valid = jnp.zeros((N * Lq, N * Lk), jnp.float32)
    for n in range(N):
        valid = valid.at[n * Lq:(n + 1) * Lq, n * Lk:(n + 1) * Lk].set(mask_b[n])
    return (1.0 - valid) * jnp.float32(NEG_INF)


def prepare_params(params):
    """Stack per-layer weights, expand per-head QKV to block-diag (E,E), pad fc_out."""
    eye_h = jnp.eye(HEADS, dtype=jnp.float32)

    def bd(w):   # shared (hd,hd) per-head weight -> block-diagonal (E,E)
        return jnp.kron(eye_h, w)

    L = params['layers']
    prep = {
        'word_emb': params['word_emb'],
        'pos_emb': params['pos_emb'],
        'sa_wq': jnp.stack([bd(l['self_attn']['wq']) for l in L]),
        'sa_wk': jnp.stack([bd(l['self_attn']['wk']) for l in L]),
        'sa_wv': jnp.stack([bd(l['self_attn']['wv']) for l in L]),
        'sa_wo': jnp.stack([l['self_attn']['wo'] for l in L]),
        'sa_bo': jnp.stack([l['self_attn']['bo'].reshape(1, EMBED) for l in L]),
        'ca_wq': jnp.stack([bd(l['cross_attn']['wq']) for l in L]),
        'ca_wk': jnp.stack([bd(l['cross_attn']['wk']) for l in L]),
        'ca_wv': jnp.stack([bd(l['cross_attn']['wv']) for l in L]),
        'ca_wo': jnp.stack([l['cross_attn']['wo'] for l in L]),
        'ca_bo': jnp.stack([l['cross_attn']['bo'].reshape(1, EMBED) for l in L]),
        'ln_g': jnp.stack([l['norm_g'].reshape(1, EMBED) for l in L]),
        'ln_b': jnp.stack([l['norm_b'].reshape(1, EMBED) for l in L]),
        'ln1_g': jnp.stack([l['norm1_g'].reshape(1, EMBED) for l in L]),
        'ln1_b': jnp.stack([l['norm1_b'].reshape(1, EMBED) for l in L]),
        'ln2_g': jnp.stack([l['norm2_g'].reshape(1, EMBED) for l in L]),
        'ln2_b': jnp.stack([l['norm2_b'].reshape(1, EMBED) for l in L]),
        'w1': jnp.stack([l['ffn']['w1'] for l in L]),
        'b1': jnp.stack([l['ffn']['b1'].reshape(1, -1) for l in L]),
        'w2': jnp.stack([l['ffn']['w2'] for l in L]),
        'b2': jnp.stack([l['ffn']['b2'].reshape(1, EMBED) for l in L]),
        'fc_w_pad': jnp.zeros((EMBED, LANE), jnp.float32)
                       .at[:, :TARGET_VOCAB].set(params['fc_w']),
        'fc_b_pad': jnp.zeros((1, LANE), jnp.float32)
                       .at[:, :TARGET_VOCAB].set(params['fc_b'][None, :]),
    }
    return prep


# ----------------------------- Decoder forward ---------------------------------
def decoder_forward(tokens, enc_out, src_mask, target_mask, prep):
    N, L = tokens.shape
    Lk = enc_out.shape[1]

    # embeddings (glue); dropout = identity (eval mode)
    word = prep['word_emb'][tokens]                     # (N, L, E)
    pos = prep['pos_emb'][jnp.arange(L)]                # (L, E)
    x = (word + pos[None, :, :]).reshape(N * L, EMBED)
    enc = enc_out.astype(jnp.float32).reshape(N * Lk, EMBED)

    # additive masks with batch folded into a block-diagonal layout
    tgt_b = jnp.broadcast_to(target_mask, (N, 1, L, L))[:, 0].astype(jnp.float32)
    src_b = jnp.broadcast_to(src_mask, (N, 1, L, Lk))[:, 0].astype(jnp.float32)
    tgt_add = _batched_additive_mask(tgt_b)             # (N*L, N*L)
    src_add = _batched_additive_mask(src_b)             # (N*L, N*Lk)

    kernel = functools.partial(decoder_kernel, heads=HEADS, head_dim=HEAD_DIM,
                               num_layers=NUM_LAYERS)

    # Single grid-less pallas_call: everything resident in VMEM, one invocation.
    out = pl.pallas_call(
        kernel,
        out_shape=jax.ShapeDtypeStruct((N * L, LANE), jnp.float32),
    )(x, enc, tgt_add, src_add,
      prep['sa_wq'], prep['sa_wk'], prep['sa_wv'], prep['sa_wo'], prep['sa_bo'],
      prep['ca_wq'], prep['ca_wk'], prep['ca_wv'], prep['ca_wo'], prep['ca_bo'],
      prep['ln_g'], prep['ln_b'], prep['ln1_g'], prep['ln1_b'],
      prep['ln2_g'], prep['ln2_b'],
      prep['w1'], prep['b1'], prep['w2'], prep['b2'],
      prep['fc_w_pad'], prep['fc_b_pad'])

    return out[:, :TARGET_VOCAB].reshape(N, L, TARGET_VOCAB)


# ----------------------------- parameter init ----------------------------------
def init_params(key):
    def dense(k, shape, scale=0.1):
        return jax.random.normal(k, shape, jnp.float32) * scale

    keys = jax.random.split(key, 3 + NUM_LAYERS)
    params = {
        'word_emb': dense(keys[0], (TARGET_VOCAB, EMBED), 1.0),
        'pos_emb': dense(keys[1], (MAX_LENGTH, EMBED), 1.0),
        'fc_w': dense(keys[2], (EMBED, TARGET_VOCAB)),
        'fc_b': jnp.zeros((TARGET_VOCAB,), jnp.float32),
        'layers': [],
    }
    hd = HEAD_DIM
    hidden = EMBED * FORWARD_EXPANSION
    for i in range(NUM_LAYERS):
        lk = jax.random.split(keys[3 + i], 10)
        layer = {
            'self_attn': dict(wq=dense(lk[0], (hd, hd)), wk=dense(lk[1], (hd, hd)),
                              wv=dense(lk[2], (hd, hd)), wo=dense(lk[3], (EMBED, EMBED)),
                              bo=jnp.zeros((EMBED,), jnp.float32)),
            'norm_g': jnp.ones((EMBED,), jnp.float32),
            'norm_b': jnp.zeros((EMBED,), jnp.float32),
            'cross_attn': dict(wq=dense(lk[4], (hd, hd)), wk=dense(lk[5], (hd, hd)),
                               wv=dense(lk[6], (hd, hd)), wo=dense(lk[7], (EMBED, EMBED)),
                               bo=jnp.zeros((EMBED,), jnp.float32)),
            'norm1_g': jnp.ones((EMBED,), jnp.float32),
            'norm1_b': jnp.zeros((EMBED,), jnp.float32),
            'norm2_g': jnp.ones((EMBED,), jnp.float32),
            'norm2_b': jnp.zeros((EMBED,), jnp.float32),
            'ffn': dict(w1=dense(lk[8], (EMBED, hidden)),
                        b1=jnp.zeros((hidden,), jnp.float32),
                        w2=dense(lk[9], (hidden, EMBED)),
                        b2=jnp.zeros((EMBED,), jnp.float32)),
        }
        params['layers'].append(layer)
    return params


# ----------------------------- main ---------------------------------------------
if __name__ == "__main__":
    N = 2
    TGT_LEN = 8
    SRC_LEN = 8

    key = jax.random.PRNGKey(0)
    k_tok, k_enc, k_par = jax.random.split(key, 3)

    tokens = jax.random.randint(k_tok, (N, TGT_LEN), 0, TARGET_VOCAB, dtype=jnp.int32)
    enc_out = jax.random.normal(k_enc, (N, SRC_LEN, EMBED), jnp.float32)

    # src_mask: (N, 1, 1, src_len) all valid; target_mask: (N, 1, tgt, tgt) causal
    src_mask = jnp.ones((N, 1, 1, SRC_LEN), jnp.float32)
    target_mask = jnp.tril(jnp.ones((TGT_LEN, TGT_LEN), jnp.float32))[None, None]
    target_mask = jnp.broadcast_to(target_mask, (N, 1, TGT_LEN, TGT_LEN))

    params = init_params(k_par)
    prepared = prepare_params(params)     # block-diag QKV, stacked layers, padded fc_out

    fwd = jax.jit(decoder_forward)
    out = fwd(tokens, enc_out, src_mask, target_mask, prepared)
    out = jax.block_until_ready(out)

    assert out.shape == (N, TGT_LEN, TARGET_VOCAB), out.shape
    assert bool(jnp.all(jnp.isfinite(out)))
    print("KERNEL_OK")
</pallas_src>

<mosaic_0001>
module attributes {stable_mosaic.version = 11 : i64} {
  func.func @decoder_kernel(%arg0: memref<16x32xf32, #tpu.memory_space<vmem>>, %arg1: memref<16x32xf32, #tpu.memory_space<vmem>>, %arg2: memref<16x16xf32, #tpu.memory_space<vmem>>, %arg3: memref<16x16xf32, #tpu.memory_space<vmem>>, %arg4: memref<2x32x32xf32, #tpu.memory_space<vmem>>, %arg5: memref<2x32x32xf32, #tpu.memory_space<vmem>>, %arg6: memref<2x32x32xf32, #tpu.memory_space<vmem>>, %arg7: memref<2x32x32xf32, #tpu.memory_space<vmem>>, %arg8: memref<2x1x32xf32, #tpu.memory_space<vmem>>, %arg9: memref<2x32x32xf32, #tpu.memory_space<vmem>>, %arg10: memref<2x32x32xf32, #tpu.memory_space<vmem>>, %arg11: memref<2x32x32xf32, #tpu.memory_space<vmem>>, %arg12: memref<2x32x32xf32, #tpu.memory_space<vmem>>, %arg13: memref<2x1x32xf32, #tpu.memory_space<vmem>>, %arg14: memref<2x1x32xf32, #tpu.memory_space<vmem>>, %arg15: memref<2x1x32xf32, #tpu.memory_space<vmem>>, %arg16: memref<2x1x32xf32, #tpu.memory_space<vmem>>, %arg17: memref<2x1x32xf32, #tpu.memory_space<vmem>>, %arg18: memref<2x1x32xf32, #tpu.memory_space<vmem>>, %arg19: memref<2x1x32xf32, #tpu.memory_space<vmem>>, %arg20: memref<2x32x64xf32, #tpu.memory_space<vmem>>, %arg21: memref<2x1x64xf32, #tpu.memory_space<vmem>>, %arg22: memref<2x64x32xf32, #tpu.memory_space<vmem>>, %arg23: memref<2x1x32xf32, #tpu.memory_space<vmem>>, %arg24: memref<32x128xf32, #tpu.memory_space<vmem>>, %arg25: memref<1x128xf32, #tpu.memory_space<vmem>>, %arg26: memref<16x128xf32, #tpu.memory_space<vmem>>) attributes {dimension_semantics = [], scalar_prefetch = 0 : i64, scratch_operands = 0 : i64, tpu.core_type = #tpu.core_type<tc>} {
    %c0 = arith.constant 0 : index
    %c0_0 = arith.constant 0 : index
    %0 = vector.load %arg0[%c0, %c0_0] : memref<16x32xf32, #tpu.memory_space<vmem>>, vector<16x32xf32>
    %c0_1 = arith.constant 0 : index
    %c0_2 = arith.constant 0 : index
    %1 = vector.load %arg1[%c0_1, %c0_2] : memref<16x32xf32, #tpu.memory_space<vmem>>, vector<16x32xf32>
    %c0_3 = arith.constant 0 : index
    %c0_4 = arith.constant 0 : index
    %2 = vector.load %arg2[%c0_3, %c0_4] : memref<16x16xf32, #tpu.memory_space<vmem>>, vector<16x16xf32>
    %c0_5 = arith.constant 0 : index
    %c0_6 = arith.constant 0 : index
    %3 = vector.load %arg3[%c0_5, %c0_6] : memref<16x16xf32, #tpu.memory_space<vmem>>, vector<16x16xf32>
    %c0_7 = arith.constant 0 : index
    %c0_8 = arith.constant 0 : index
    %c0_9 = arith.constant 0 : index
    %4 = vector.load %arg4[%c0_7, %c0_8, %c0_9] : memref<2x32x32xf32, #tpu.memory_space<vmem>>, vector<1x32x32xf32>
    %5 = vector.shape_cast %4 : vector<1x32x32xf32> to vector<32x32xf32>
    %c0_10 = arith.constant 0 : index
    %c0_11 = arith.constant 0 : index
    %c0_12 = arith.constant 0 : index
    %6 = vector.load %arg5[%c0_10, %c0_11, %c0_12] : memref<2x32x32xf32, #tpu.memory_space<vmem>>, vector<1x32x32xf32>
    %7 = vector.shape_cast %6 : vector<1x32x32xf32> to vector<32x32xf32>
    %c0_13 = arith.constant 0 : index
    %c0_14 = arith.constant 0 : index
    %c0_15 = arith.constant 0 : index
    %8 = vector.load %arg6[%c0_13, %c0_14, %c0_15] : memref<2x32x32xf32, #tpu.memory_space<vmem>>, vector<1x32x32xf32>
    %9 = vector.shape_cast %8 : vector<1x32x32xf32> to vector<32x32xf32>
    %c0_16 = arith.constant 0 : index
    %c0_17 = arith.constant 0 : index
    %c0_18 = arith.constant 0 : index
    %10 = vector.load %arg7[%c0_16, %c0_17, %c0_18] : memref<2x32x32xf32, #tpu.memory_space<vmem>>, vector<1x32x32xf32>
    %11 = vector.shape_cast %10 : vector<1x32x32xf32> to vector<32x32xf32>
    %c0_19 = arith.constant 0 : index
    %c0_20 = arith.constant 0 : index
    %c0_21 = arith.constant 0 : index
    %12 = vector.load %arg8[%c0_19, %c0_20, %c0_21] : memref<2x1x32xf32, #tpu.memory_space<vmem>>, vector<1x1x32xf32>
    %13 = vector.shape_cast %12 : vector<1x1x32xf32> to vector<1x32xf32>
    %cst = arith.constant dense<0.000000e+00> : vector<16x32xf32>
    %14 = tpu.matmul %0, %5, %cst {dimension_numbers = #tpu.dot_dimension_numbers<[1], [0], [0], [1], [0, 0, 1, 1], [], []>} : vector<16x32xf32>, vector<32x32xf32>, vector<16x32xf32> -> vector<16x32xf32>
    %cst_22 = arith.constant dense<0.000000e+00> : vector<16x32xf32>
    %15 = tpu.matmul %0, %7, %cst_22 {dimension_numbers = #tpu.dot_dimension_numbers<[1], [0], [0], [1], [0, 0, 1, 1], [], []>} : vector<16x32xf32>, vector<32x32xf32>, vector<16x32xf32> -> vector<16x32xf32>
    %cst_23 = arith.constant dense<0.000000e+00> : vector<16x32xf32>
    %16 = tpu.matmul %0, %9, %cst_23 {dimension_numbers = #tpu.dot_dimension_numbers<[1], [0], [0], [1], [0, 0, 1, 1], [], []>} : vector<16x32xf32>, vector<32x32xf32>, vector<16x32xf32> -> vector<16x32xf32>
    %cst_24 = arith.constant 0.000000e+00 : f32
    %17 = vector.broadcast %cst_24 : f32 to vector<16x32xf32>
    %18 = vector.extract_strided_slice %14 {offsets = [0, 0], sizes = [16, 8], strides = [1, 1]} : vector<16x32xf32> to vector<16x8xf32>
    %19 = vector.extract_strided_slice %15 {offsets = [0, 0], sizes = [16, 8], strides = [1, 1]} : vector<16x32xf32> to vector<16x8xf32>
    %cst_25 = arith.constant dense<0.000000e+00> : vector<16x16xf32>
    %20 = tpu.matmul %18, %19, %cst_25 {dimension_numbers = #tpu.dot_dimension_numbers<[1], [1], [0], [0], [0, 0, 1, 0], [], []>} : vector<16x8xf32>, vector<16x8xf32>, vector<16x16xf32> -> vector<16x16xf32>
    %21 = arith.addf %20, %2 : vector<16x16xf32>
    %cst_26 = arith.constant 0.176776692 : f32
    %22 = vector.broadcast %cst_26 : f32 to vector<16x16xf32>
    %23 = arith.mulf %21, %22 : vector<16x16xf32>
    %cst_27 = arith.constant dense<0xFF800000> : vector<16xf32>
    %24 = vector.multi_reduction <maximumf>, %23, %cst_27 [1] : vector<16x16xf32> to vector<16xf32>
    %25 = vector.shape_cast %24 : vector<16xf32> to vector<16x1xf32>
    %26 = vector.broadcast %25 : vector<16x1xf32> to vector<16x16xf32>
    %27 = arith.subf %23, %26 : vector<16x16xf32>
    %28 = math.exp %27 : vector<16x16xf32>
    %cst_28 = arith.constant dense<0.000000e+00> : vector<16xf32>
    %29 = vector.multi_reduction <add>, %28, %cst_28 [1] : vector<16x16xf32> to vector<16xf32>
    %30 = vector.shape_cast %29 : vector<16xf32> to vector<16x1xf32>
    %31 = tpu.reciprocal %30 {approx = true} : vector<16x1xf32> -> vector<16x1xf32>
    %32 = vector.broadcast %31 : vector<16x1xf32> to vector<16x16xf32>
    %33 = arith.mulf %28, %32 : vector<16x16xf32>
    %34 = vector.extract_strided_slice %16 {offsets = [0, 0], sizes = [16, 8], strides = [1, 1]} : vector<16x32xf32> to vector<16x8xf32>
    %cst_29 = arith.constant dense<0.000000e+00> : vector<16x8xf32>
    %35 = tpu.matmul %33, %34, %cst_29 {dimension_numbers = #tpu.dot_dimension_numbers<[1], [0], [0], [1], [0, 0, 1, 1], [], []>} : vector<16x16xf32>, vector<16x8xf32>, vector<16x8xf32> -> vector<16x8xf32>
    %36 = vector.extract_strided_slice %11 {offsets = [0, 0], sizes = [8, 32], strides = [1, 1]} : vector<32x32xf32> to vector<8x32xf32>
    %cst_30 = arith.constant dense<0.000000e+00> : vector<16x32xf32>
    %37 = tpu.matmul %35, %36, %cst_30 {dimension_numbers = #tpu.dot_dimension_numbers<[1], [0], [0], [1], [0, 0, 1, 1], [], []>} : vector<16x8xf32>, vector<8x32xf32>, vector<16x32xf32> -> vector<16x32xf32>
    %38 = arith.addf %17, %37 : vector<16x32xf32>
    %39 = vector.extract_strided_slice %14 {offsets = [0, 8], sizes = [16, 8], strides = [1, 1]} : vector<16x32xf32> to vector<16x8xf32>
    %40 = vector.extract_strided_slice %15 {offsets = [0, 8], sizes = [16, 8], strides = [1, 1]} : vector<16x32xf32> to vector<16x8xf32>
    %cst_31 = arith.constant dense<0.000000e+00> : vector<16x16xf32>
    %41 = tpu.matmul %39, %40, %cst_31 {dimension_numbers = #tpu.dot_dimension_numbers<[1], [1], [0], [0], [0, 0, 1, 0], [], []>} : vector<16x8xf32>, vector<16x8xf32>, vector<16x16xf32> -> vector<16x16xf32>
    %42 = arith.addf %41, %2 : vector<16x16xf32>
    %cst_32 = arith.constant 0.176776692 : f32
    %43 = vector.broadcast %cst_32 : f32 to vector<16x16xf32>
    %44 = arith.mulf %42, %43 : vector<16x16xf32>
    %cst_33 = arith.constant dense<0xFF800000> : vector<16xf32>
    %45 = vector.multi_reduction <maximumf>, %44, %cst_33 [1] : vector<16x16xf32> to vector<16xf32>
    %46 = vector.shape_cast %45 : vector<16xf32> to vector<16x1xf32>
    %47 = vector.broadcast %46 : vector<16x1xf32> to vector<16x16xf32>
    %48 = arith.subf %44, %47 : vector<16x16xf32>
    %49 = math.exp %48 : vector<16x16xf32>
    %cst_34 = arith.constant dense<0.000000e+00> : vector<16xf32>
    %50 = vector.multi_reduction <add>, %49, %cst_34 [1] : vector<16x16xf32> to vector<16xf32>
    %51 = vector.shape_cast %50 : vector<16xf32> to vector<16x1xf32>
    %52 = tpu.reciprocal %51 {approx = true} : vector<16x1xf32> -> vector<16x1xf32>
    %53 = vector.broadcast %52 : vector<16x1xf32> to vector<16x16xf32>
    %54 = arith.mulf %49, %53 : vector<16x16xf32>
    %55 = vector.extract_strided_slice %16 {offsets = [0, 8], sizes = [16, 8], strides = [1, 1]} : vector<16x32xf32> to vector<16x8xf32>
    %cst_35 = arith.constant dense<0.000000e+00> : vector<16x8xf32>
    %56 = tpu.matmul %54, %55, %cst_35 {dimension_numbers = #tpu.dot_dimension_numbers<[1], [0], [0], [1], [0, 0, 1, 1], [], []>} : vector<16x16xf32>, vector<16x8xf32>, vector<16x8xf32> -> vector<16x8xf32>
    %57 = vector.extract_strided_slice %11 {offsets = [8, 0], sizes = [8, 32], strides = [1, 1]} : vector<32x32xf32> to vector<8x32xf32>
    %cst_36 = arith.constant dense<0.000000e+00> : vector<16x32xf32>
    %58 = tpu.matmul %56, %57, %cst_36 {dimension_numbers = #tpu.dot_dimension_numbers<[1], [0], [0], [1], [0, 0, 1, 1], [], []>} : vector<16x8xf32>, vector<8x32xf32>, vector<16x32xf32> -> vector<16x32xf32>
    %59 = arith.addf %38, %58 : vector<16x32xf32>
    %60 = vector.extract_strided_slice %14 {offsets = [0, 16], sizes = [16, 8], strides = [1, 1]} : vector<16x32xf32> to vector<16x8xf32>
    %61 = vector.extract_strided_slice %15 {offsets = [0, 16], sizes = [16, 8], strides = [1, 1]} : vector<16x32xf32> to vector<16x8xf32>
    %cst_37 = arith.constant dense<0.000000e+00> : vector<16x16xf32>
    %62 = tpu.matmul %60, %61, %cst_37 {dimension_numbers = #tpu.dot_dimension_numbers<[1], [1], [0], [0], [0, 0, 1, 0], [], []>} : vector<16x8xf32>, vector<16x8xf32>, vector<16x16xf32> -> vector<16x16xf32>
    %63 = arith.addf %62, %2 : vector<16x16xf32>
    %cst_38 = arith.constant 0.176776692 : f32
    %64 = vector.broadcast %cst_38 : f32 to vector<16x16xf32>
    %65 = arith.mulf %63, %64 : vector<16x16xf32>
    %cst_39 = arith.constant dense<0xFF800000> : vector<16xf32>
    %66 = vector.multi_reduction <maximumf>, %65, %cst_39 [1] : vector<16x16xf32> to vector<16xf32>
    %67 = vector.shape_cast %66 : vector<16xf32> to vector<16x1xf32>
    %68 = vector.broadcast %67 : vector<16x1xf32> to vector<16x16xf32>
    %69 = arith.subf %65, %68 : vector<16x16xf32>
    %70 = math.exp %69 : vector<16x16xf32>
    %cst_40 = arith.constant dense<0.000000e+00> : vector<16xf32>
    %71 = vector.multi_reduction <add>, %70, %cst_40 [1] : vector<16x16xf32> to vector<16xf32>
    %72 = vector.shape_cast %71 : vector<16xf32> to vector<16x1xf32>
    %73 = tpu.reciprocal %72 {approx = true} : vector<16x1xf32> -> vector<16x1xf32>
    %74 = vector.broadcast %73 : vector<16x1xf32> to vector<16x16xf32>
    %75 = arith.mulf %70, %74 : vector<16x16xf32>
    %76 = vector.extract_strided_slice %16 {offsets = [0, 16], sizes = [16, 8], strides = [1, 1]} : vector<16x32xf32> to vector<16x8xf32>
    %cst_41 = arith.constant dense<0.000000e+00> : vector<16x8xf32>
    %77 = tpu.matmul %75, %76, %cst_41 {dimension_numbers = #tpu.dot_dimension_numbers<[1], [0], [0], [1], [0, 0, 1, 1], [], []>} : vector<16x16xf32>, vector<16x8xf32>, vector<16x8xf32> -> vector<16x8xf32>
    %78 = vector.extract_strided_slice %11 {offsets = [16, 0], sizes = [8, 32], strides = [1, 1]} : vector<32x32xf32> to vector<8x32xf32>
    %cst_42 = arith.constant dense<0.000000e+00> : vector<16x32xf32>
    %79 = tpu.matmul %77, %78, %cst_42 {dimension_numbers = #tpu.dot_dimension_numbers<[1], [0], [0], [1], [0, 0, 1, 1], [], []>} : vector<16x8xf32>, vector<8x32xf32>, vector<16x32xf32> -> vector<16x32xf32>
    %80 = arith.addf %59, %79 : vector<16x32xf32>
    %81 = vector.extract_strided_slice %14 {offsets = [0, 24], sizes = [16, 8], strides = [1, 1]} : vector<16x32xf32> to vector<16x8xf32>
    %82 = vector.extract_strided_slice %15 {offsets = [0, 24], sizes = [16, 8], strides = [1, 1]} : vector<16x32xf32> to vector<16x8xf32>
    %cst_43 = arith.constant dense<0.000000e+00> : vector<16x16xf32>
    %83 = tpu.matmul %81, %82, %cst_43 {dimension_numbers = #tpu.dot_dimension_numbers<[1], [1], [0], [0], [0, 0, 1, 0], [], []>} : vector<16x8xf32>, vector<16x8xf32>, vector<16x16xf32> -> vector<16x16xf32>
    %84 = arith.addf %83, %2 : vector<16x16xf32>
    %cst_44 = arith.constant 0.176776692 : f32
    %85 = vector.broadcast %cst_44 : f32 to vector<16x16xf32>
    %86 = arith.mulf %84, %85 : vector<16x16xf32>
    %cst_45 = arith.constant dense<0xFF800000> : vector<16xf32>
    %87 = vector.multi_reduction <maximumf>, %86, %cst_45 [1] : vector<16x16xf32> to vector<16xf32>
    %88 = vector.shape_cast %87 : vector<16xf32> to vector<16x1xf32>
    %89 = vector.broadcast %88 : vector<16x1xf32> to vector<16x16xf32>
    %90 = arith.subf %86, %89 : vector<16x16xf32>
    %91 = math.exp %90 : vector<16x16xf32>
    %cst_46 = arith.constant dense<0.000000e+00> : vector<16xf32>
    %92 = vector.multi_reduction <add>, %91, %cst_46 [1] : vector<16x16xf32> to vector<16xf32>
    %93 = vector.shape_cast %92 : vector<16xf32> to vector<16x1xf32>
    %94 = tpu.reciprocal %93 {approx = true} : vector<16x1xf32> -> vector<16x1xf32>
    %95 = vector.broadcast %94 : vector<16x1xf32> to vector<16x16xf32>
    %96 = arith.mulf %91, %95 : vector<16x16xf32>
    %97 = vector.extract_strided_slice %16 {offsets = [0, 24], sizes = [16, 8], strides = [1, 1]} : vector<16x32xf32> to vector<16x8xf32>
    %cst_47 = arith.constant dense<0.000000e+00> : vector<16x8xf32>
    %98 = tpu.matmul %96, %97, %cst_47 {dimension_numbers = #tpu.dot_dimension_numbers<[1], [0], [0], [1], [0, 0, 1, 1], [], []>} : vector<16x16xf32>, vector<16x8xf32>, vector<16x8xf32> -> vector<16x8xf32>
    %99 = vector.extract_strided_slice %11 {offsets = [24, 0], sizes = [8, 32], strides = [1, 1]} : vector<32x32xf32> to vector<8x32xf32>
    %cst_48 = arith.constant dense<0.000000e+00> : vector<16x32xf32>
    %100 = tpu.matmul %98, %99, %cst_48 {dimension_numbers = #tpu.dot_dimension_numbers<[1], [0], [0], [1], [0, 0, 1, 1], [], []>} : vector<16x8xf32>, vector<8x32xf32>, vector<16x32xf32> -> vector<16x32xf32>
    %101 = arith.addf %80, %100 : vector<16x32xf32>
    %102 = vector.broadcast %13 : vector<1x32xf32> to vector<16x32xf32>
    %103 = arith.addf %101, %102 : vector<16x32xf32>
    %104 = arith.addf %103, %0 : vector<16x32xf32>
    %c0_49 = arith.constant 0 : index
    %c0_50 = arith.constant 0 : index
    %c0_51 = arith.constant 0 : index
    %105 = vector.load %arg14[%c0_49, %c0_50, %c0_51] : memref<2x1x32xf32, #tpu.memory_space<vmem>>, vector<1x1x32xf32>
    %106 = vector.shape_cast %105 : vector<1x1x32xf32> to vector<1x32xf32>
    %c0_52 = arith.constant 0 : index
    %c0_53 = arith.constant 0 : index
    %c0_54 = arith.constant 0 : index
    %107 = vector.load %arg15[%c0_52, %c0_53, %c0_54] : memref<2x1x32xf32, #tpu.memory_space<vmem>>, vector<1x1x32xf32>
    %108 = vector.shape_cast %107 : vector<1x1x32xf32> to vector<1x32xf32>
    %cst_55 = arith.constant dense<0.000000e+00> : vector<16xf32>
    %109 = vector.multi_reduction <add>, %104, %cst_55 [1] : vector<16x32xf32> to vector<16xf32>
    %110 = vector.shape_cast %109 : vector<16xf32> to vector<16x1xf32>
    %cst_56 = arith.constant 3.200000e+01 : f32
    %111 = vector.broadcast %cst_56 : f32 to vector<16x1xf32>
    %112 = arith.divf %110, %111 : vector<16x1xf32>
    %113 = vector.broadcast %112 : vector<16x1xf32> to vector<16x32xf32>
    %114 = arith.subf %104, %113 : vector<16x32xf32>
    %115 = arith.mulf %114, %114 : vector<16x32xf32>
    %cst_57 = arith.constant dense<0.000000e+00> : vector<16xf32>
    %116 = vector.multi_reduction <add>, %115, %cst_57 [1] : vector<16x32xf32> to vector<16xf32>
    %117 = vector.shape_cast %116 : vector<16xf32> to vector<16x1xf32>
    %cst_58 = arith.constant 3.200000e+01 : f32
    %118 = vector.broadcast %cst_58 : f32 to vector<16x1xf32>
    %119 = arith.divf %117, %118 : vector<16x1xf32>
    %120 = vector.broadcast %112 : vector<16x1xf32> to vector<16x32xf32>
    %121 = arith.subf %104, %120 : vector<16x32xf32>
    %cst_59 = arith.constant 9.99999974E-6 : f32
    %122 = vector.broadcast %cst_59 : f32 to vector<16x1xf32>
    %123 = arith.addf %119, %122 : vector<16x1xf32>
    %124 = math.rsqrt %123 : vector<16x1xf32>
    %125 = vector.broadcast %124 : vector<16x1xf32> to vector<16x32xf32>
    %126 = arith.mulf %121, %125 : vector<16x32xf32>
    %127 = vector.broadcast %106 : vector<1x32xf32> to vector<16x32xf32>
    %128 = arith.mulf %126, %127 : vector<16x32xf32>
    %129 = vector.broadcast %108 : vector<1x32xf32> to vector<16x32xf32>
    %130 = arith.addf %128, %129 : vector<16x32xf32>
    %c0_60 = arith.constant 0 : index
    %c0_61 = arith.constant 0 : index
    %c0_62 = arith.constant 0 : index
    %131 = vector.load %arg9[%c0_60, %c0_61, %c0_62] : memref<2x32x32xf32, #tpu.memory_space<vmem>>, vector<1x32x32xf32>
    %132 = vector.shape_cast %131 : vector<1x32x32xf32> to vector<32x32xf32>
    %c0_63 = arith.constant 0 : index
    %c0_64 = arith.constant 0 : index
    %c0_65 = arith.constant 0 : index
    %133 = vector.load %arg10[%c0_63, %c0_64, %c0_65] : memref<2x32x32xf32, #tpu.memory_space<vmem>>, vector<1x32x32xf32>
    %134 = vector.shape_cast %133 : vector<1x32x32xf32> to vector<32x32xf32>
    %c0_66 = arith.constant 0 : index
    %c0_67 = arith.constant 0 : index
    %c0_68 = arith.constant 0 : index
    %135 = vector.load %arg11[%c0_66, %c0_67, %c0_68] : memref<2x32x32xf32, #tpu.memory_space<vmem>>, vector<1x32x32xf32>
    %136 = vector.shape_cast %135 : vector<1x32x32xf32> to vector<32x32xf32>
    %c0_69 = arith.constant 0 : index
    %c0_70 = arith.constant 0 : index
    %c0_71 = arith.constant 0 : index
    %137 = vector.load %arg12[%c0_69, %c0_70, %c0_71] : memref<2x32x32xf32, #tpu.memory_space<vmem>>, vector<1x32x32xf32>
    %138 = vector.shape_cast %137 : vector<1x32x32xf32> to vector<32x32xf32>
    %c0_72 = arith.constant 0 : index
    %c0_73 = arith.constant 0 : index
    %c0_74 = arith.constant 0 : index
    %139 = vector.load %arg13[%c0_72, %c0_73, %c0_74] : memref<2x1x32xf32, #tpu.memory_space<vmem>>, vector<1x1x32xf32>
    %140 = vector.shape_cast %139 : vector<1x1x32xf32> to vector<1x32xf32>
    %cst_75 = arith.constant dense<0.000000e+00> : vector<16x32xf32>
    %141 = tpu.matmul %130, %132, %cst_75 {dimension_numbers = #tpu.dot_dimension_numbers<[1], [0], [0], [1], [0, 0, 1, 1], [], []>} : vector<16x32xf32>, vector<32x32xf32>, vector<16x32xf32> -> vector<16x32xf32>
    %cst_76 = arith.constant dense<0.000000e+00> : vector<16x32xf32>
    %142 = tpu.matmul %1, %134, %cst_76 {dimension_numbers = #tpu.dot_dimension_numbers<[1], [0], [0], [1], [0, 0, 1, 1], [], []>} : vector<16x32xf32>, vector<32x32xf32>, vector<16x32xf32> -> vector<16x32xf32>
    %cst_77 = arith.constant dense<0.000000e+00> : vector<16x32xf32>
    %143 = tpu.matmul %1, %136, %cst_77 {dimension_numbers = #tpu.dot_dimension_numbers<[1], [0], [0], [1], [0, 0, 1, 1], [], []>} : vector<16x32xf32>, vector<32x32xf32>, vector<16x32xf32> -> vector<16x32xf32>
    %cst_78 = arith.constant 0.000000e+00 : f32
    %144 = vector.broadcast %cst_78 : f32 to vector<16x32xf32>
    %145 = vector.extract_strided_slice %141 {offsets = [0, 0], sizes = [16, 8], strides = [1, 1]} : vector<16x32xf32> to vector<16x8xf32>
    %146 = vector.extract_strided_slice %142 {offsets = [0, 0], sizes = [16, 8], strides = [1, 1]} : vector<16x32xf32> to vector<16x8xf32>
    %cst_79 = arith.constant dense<0.000000e+00> : vector<16x16xf32>
    %147 = tpu.matmul %145, %146, %cst_79 {dimension_numbers = #tpu.dot_dimension_numbers<[1], [1], [0], [0], [0, 0, 1, 0], [], []>} : vector<16x8xf32>, vector<16x8xf32>, vector<16x16xf32> -> vector<16x16xf32>
    %148 = arith.addf %147, %3 : vector<16x16xf32>
    %cst_80 = arith.constant 0.176776692 : f32
    %149 = vector.broadcast %cst_80 : f32 to vector<16x16xf32>
    %150 = arith.mulf %148, %149 : vector<16x16xf32>
    %cst_81 = arith.constant dense<0xFF800000> : vector<16xf32>
    %151 = vector.multi_reduction <maximumf>, %150, %cst_81 [1] : vector<16x16xf32> to vector<16xf32>
    %152 = vector.shape_cast %151 : vector<16xf32> to vector<16x1xf32>
    %153 = vector.broadcast %152 : vector<16x1xf32> to vector<16x16xf32>
    %154 = arith.subf %150, %153 : vector<16x16xf32>
    %155 = math.exp %154 : vector<16x16xf32>
    %cst_82 = arith.constant dense<0.000000e+00> : vector<16xf32>
    %156 = vector.multi_reduction <add>, %155, %cst_82 [1] : vector<16x16xf32> to vector<16xf32>
    %157 = vector.shape_cast %156 : vector<16xf32> to vector<16x1xf32>
    %158 = tpu.reciprocal %157 {approx = true} : vector<16x1xf32> -> vector<16x1xf32>
    %159 = vector.broadcast %158 : vector<16x1xf32> to vector<16x16xf32>
    %160 = arith.mulf %155, %159 : vector<16x16xf32>
    %161 = vector.extract_strided_slice %143 {offsets = [0, 0], sizes = [16, 8], strides = [1, 1]} : vector<16x32xf32> to vector<16x8xf32>
    %cst_83 = arith.constant dense<0.000000e+00> : vector<16x8xf32>
    %162 = tpu.matmul %160, %161, %cst_83 {dimension_numbers = #tpu.dot_dimension_numbers<[1], [0], [0], [1], [0, 0, 1, 1], [], []>} : vector<16x16xf32>, vector<16x8xf32>, vector<16x8xf32> -> vector<16x8xf32>
    %163 = vector.extract_strided_slice %138 {offsets = [0, 0], sizes = [8, 32], strides = [1, 1]} : vector<32x32xf32> to vector<8x32xf32>
    %cst_84 = arith.constant dense<0.000000e+00> : vector<16x32xf32>
    %164 = tpu.matmul %162, %163, %cst_84 {dimension_numbers = #tpu.dot_dimension_numbers<[1], [0], [0], [1], [0, 0, 1, 1], [], []>} : vector<16x8xf32>, vector<8x32xf32>, vector<16x32xf32> -> vector<16x32xf32>
    %165 = arith.addf %144, %164 : vector<16x32xf32>
    %166 = vector.extract_strided_slice %141 {offsets = [0, 8], sizes = [16, 8], strides = [1, 1]} : vector<16x32xf32> to vector<16x8xf32>
    %167 = vector.extract_strided_slice %142 {offsets = [0, 8], sizes = [16, 8], strides = [1, 1]} : vector<16x32xf32> to vector<16x8xf32>
    %cst_85 = arith.constant dense<0.000000e+00> : vector<16x16xf32>
    %168 = tpu.matmul %166, %167, %cst_85 {dimension_numbers = #tpu.dot_dimension_numbers<[1], [1], [0], [0], [0, 0, 1, 0], [], []>} : vector<16x8xf32>, vector<16x8xf32>, vector<16x16xf32> -> vector<16x16xf32>
    %169 = arith.addf %168, %3 : vector<16x16xf32>
    %cst_86 = arith.constant 0.176776692 : f32
    %170 = vector.broadcast %cst_86 : f32 to vector<16x16xf32>
    %171 = arith.mulf %169, %170 : vector<16x16xf32>
    %cst_87 = arith.constant dense<0xFF800000> : vector<16xf32>
    %172 = vector.multi_reduction <maximumf>, %171, %cst_87 [1] : vector<16x16xf32> to vector<16xf32>
    %173 = vector.shape_cast %172 : vector<16xf32> to vector<16x1xf32>
    %174 = vector.broadcast %173 : vector<16x1xf32> to vector<16x16xf32>
    %175 = arith.subf %171, %174 : vector<16x16xf32>
    %176 = math.exp %175 : vector<16x16xf32>
    %cst_88 = arith.constant dense<0.000000e+00> : vector<16xf32>
    %177 = vector.multi_reduction <add>, %176, %cst_88 [1] : vector<16x16xf32> to vector<16xf32>
    %178 = vector.shape_cast %177 : vector<16xf32> to vector<16x1xf32>
    %179 = tpu.reciprocal %178 {approx = true} : vector<16x1xf32> -> vector<16x1xf32>
    %180 = vector.broadcast %179 : vector<16x1xf32> to vector<16x16xf32>
    %181 = arith.mulf %176, %180 : vector<16x16xf32>
    %182 = vector.extract_strided_slice %143 {offsets = [0, 8], sizes = [16, 8], strides = [1, 1]} : vector<16x32xf32> to vector<16x8xf32>
    %cst_89 = arith.constant dense<0.000000e+00> : vector<16x8xf32>
    %183 = tpu.matmul %181, %182, %cst_89 {dimension_numbers = #tpu.dot_dimension_numbers<[1], [0], [0], [1], [0, 0, 1, 1], [], []>} : vector<16x16xf32>, vector<16x8xf32>, vector<16x8xf32> -> vector<16x8xf32>
    %184 = vector.extract_strided_slice %138 {offsets = [8, 0], sizes = [8, 32], strides = [1, 1]} : vector<32x32xf32> to vector<8x32xf32>
    %cst_90 = arith.constant dense<0.000000e+00> : vector<16x32xf32>
    %185 = tpu.matmul %183, %184, %cst_90 {dimension_numbers = #tpu.dot_dimension_numbers<[1], [0], [0], [1], [0, 0, 1, 1], [], []>} : vector<16x8xf32>, vector<8x32xf32>, vector<16x32xf32> -> vector<16x32xf32>
    %186 = arith.addf %165, %185 : vector<16x32xf32>
    %187 = vector.extract_strided_slice %141 {offsets = [0, 16], sizes = [16, 8], strides = [1, 1]} : vector<16x32xf32> to vector<16x8xf32>
    %188 = vector.extract_strided_slice %142 {offsets = [0, 16], sizes = [16, 8], strides = [1, 1]} : vector<16x32xf32> to vector<16x8xf32>
    %cst_91 = arith.constant dense<0.000000e+00> : vector<16x16xf32>
    %189 = tpu.matmul %187, %188, %cst_91 {dimension_numbers = #tpu.dot_dimension_numbers<[1], [1], [0], [0], [0, 0, 1, 0], [], []>} : vector<16x8xf32>, vector<16x8xf32>, vector<16x16xf32> -> vector<16x16xf32>
    %190 = arith.addf %189, %3 : vector<16x16xf32>
    %cst_92 = arith.constant 0.176776692 : f32
    %191 = vector.broadcast %cst_92 : f32 to vector<16x16xf32>
    %192 = arith.mulf %190, %191 : vector<16x16xf32>
    %cst_93 = arith.constant dense<0xFF800000> : vector<16xf32>
    %193 = vector.multi_reduction <maximumf>, %192, %cst_93 [1] : vector<16x16xf32> to vector<16xf32>
    %194 = vector.shape_cast %193 : vector<16xf32> to vector<16x1xf32>
    %195 = vector.broadcast %194 : vector<16x1xf32> to vector<16x16xf32>
    %196 = arith.subf %192, %195 : vector<16x16xf32>
    %197 = math.exp %196 : vector<16x16xf32>
    %cst_94 = arith.constant dense<0.000000e+00> : vector<16xf32>
    %198 = vector.multi_reduction <add>, %197, %cst_94 [1] : vector<16x16xf32> to vector<16xf32>
    %199 = vector.shape_cast %198 : vector<16xf32> to vector<16x1xf32>
    %200 = tpu.reciprocal %199 {approx = true} : vector<16x1xf32> -> vector<16x1xf32>
    %201 = vector.broadcast %200 : vector<16x1xf32> to vector<16x16xf32>
    %202 = arith.mulf %197, %201 : vector<16x16xf32>
    %203 = vector.extract_strided_slice %143 {offsets = [0, 16], sizes = [16, 8], strides = [1, 1]} : vector<16x32xf32> to vector<16x8xf32>
    %cst_95 = arith.constant dense<0.000000e+00> : vector<16x8xf32>
    %204 = tpu.matmul %202, %203, %cst_95 {dimension_numbers = #tpu.dot_dimension_numbers<[1], [0], [0], [1], [0, 0, 1, 1], [], []>} : vector<16x16xf32>, vector<16x8xf32>, vector<16x8xf32> -> vector<16x8xf32>
    %205 = vector.extract_strided_slice %138 {offsets = [16, 0], sizes = [8, 32], strides = [1, 1]} : vector<32x32xf32> to vector<8x32xf32>
    %cst_96 = arith.constant dense<0.000000e+00> : vector<16x32xf32>
    %206 = tpu.matmul %204, %205, %cst_96 {dimension_numbers = #tpu.dot_dimension_numbers<[1], [0], [0], [1], [0, 0, 1, 1], [], []>} : vector<16x8xf32>, vector<8x32xf32>, vector<16x32xf32> -> vector<16x32xf32>
    %207 = arith.addf %186, %206 : vector<16x32xf32>
    %208 = vector.extract_strided_slice %141 {offsets = [0, 24], sizes = [16, 8], strides = [1, 1]} : vector<16x32xf32> to vector<16x8xf32>
    %209 = vector.extract_strided_slice %142 {offsets = [0, 24], sizes = [16, 8], strides = [1, 1]} : vector<16x32xf32> to vector<16x8xf32>
    %cst_97 = arith.constant dense<0.000000e+00> : vector<16x16xf32>
    %210 = tpu.matmul %208, %209, %cst_97 {dimension_numbers = #tpu.dot_dimension_numbers<[1], [1], [0], [0], [0, 0, 1, 0], [], []>} : vector<16x8xf32>, vector<16x8xf32>, vector<16x16xf32> -> vector<16x16xf32>
    %211 = arith.addf %210, %3 : vector<16x16xf32>
    %cst_98 = arith.constant 0.176776692 : f32
    %212 = vector.broadcast %cst_98 : f32 to vector<16x16xf32>
    %213 = arith.mulf %211, %212 : vector<16x16xf32>
    %cst_99 = arith.constant dense<0xFF800000> : vector<16xf32>
    %214 = vector.multi_reduction <maximumf>, %213, %cst_99 [1] : vector<16x16xf32> to vector<16xf32>
    %215 = vector.shape_cast %214 : vector<16xf32> to vector<16x1xf32>
    %216 = vector.broadcast %215 : vector<16x1xf32> to vector<16x16xf32>
    %217 = arith.subf %213, %216 : vector<16x16xf32>
    %218 = math.exp %217 : vector<16x16xf32>
    %cst_100 = arith.constant dense<0.000000e+00> : vector<16xf32>
    %219 = vector.multi_reduction <add>, %218, %cst_100 [1] : vector<16x16xf32> to vector<16xf32>
    %220 = vector.shape_cast %219 : vector<16xf32> to vector<16x1xf32>
    %221 = tpu.reciprocal %220 {approx = true} : vector<16x1xf32> -> vector<16x1xf32>
    %222 = vector.broadcast %221 : vector<16x1xf32> to vector<16x16xf32>
    %223 = arith.mulf %218, %222 : vector<16x16xf32>
    %224 = vector.extract_strided_slice %143 {offsets = [0, 24], sizes = [16, 8], strides = [1, 1]} : vector<16x32xf32> to vector<16x8xf32>
    %cst_101 = arith.constant dense<0.000000e+00> : vector<16x8xf32>
    %225 = tpu.matmul %223, %224, %cst_101 {dimension_numbers = #tpu.dot_dimension_numbers<[1], [0], [0], [1], [0, 0, 1, 1], [], []>} : vector<16x16xf32>, vector<16x8xf32>, vector<16x8xf32> -> vector<16x8xf32>
    %226 = vector.extract_strided_slice %138 {offsets = [24, 0], sizes = [8, 32], strides = [1, 1]} : vector<32x32xf32> to vector<8x32xf32>
    %cst_102 = arith.constant dense<0.000000e+00> : vector<16x32xf32>
    %227 = tpu.matmul %225, %226, %cst_102 {dimension_numbers = #tpu.dot_dimension_numbers<[1], [0], [0], [1], [0, 0, 1, 1], [], []>} : vector<16x8xf32>, vector<8x32xf32>, vector<16x32xf32> -> vector<16x32xf32>
    %228 = arith.addf %207, %227 : vector<16x32xf32>
    %229 = vector.broadcast %140 : vector<1x32xf32> to vector<16x32xf32>
    %230 = arith.addf %228, %229 : vector<16x32xf32>
    %231 = arith.addf %230, %130 : vector<16x32xf32>
    %c0_103 = arith.constant 0 : index
    %c0_104 = arith.constant 0 : index
    %c0_105 = arith.constant 0 : index
    %232 = vector.load %arg16[%c0_103, %c0_104, %c0_105] : memref<2x1x32xf32, #tpu.memory_space<vmem>>, vector<1x1x32xf32>
    %233 = vector.shape_cast %232 : vector<1x1x32xf32> to vector<1x32xf32>
    %c0_106 = arith.constant 0 : index
    %c0_107 = arith.constant 0 : index
    %c0_108 = arith.constant 0 : index
    %234 = vector.load %arg17[%c0_106, %c0_107, %c0_108] : memref<2x1x32xf32, #tpu.memory_space<vmem>>, vector<1x1x32xf32>
    %235 = vector.shape_cast %234 : vector<1x1x32xf32> to vector<1x32xf32>
    %cst_109 = arith.constant dense<0.000000e+00> : vector<16xf32>
    %236 = vector.multi_reduction <add>, %231, %cst_109 [1] : vector<16x32xf32> to vector<16xf32>
    %237 = vector.shape_cast %236 : vector<16xf32> to vector<16x1xf32>
    %cst_110 = arith.constant 3.200000e+01 : f32
    %238 = vector.broadcast %cst_110 : f32 to vector<16x1xf32>
    %239 = arith.divf %237, %238 : vector<16x1xf32>
    %240 = vector.broadcast %239 : vector<16x1xf32> to vector<16x32xf32>
    %241 = arith.subf %231, %240 : vector<16x32xf32>
    %242 = arith.mulf %241, %241 : vector<16x32xf32>
    %cst_111 = arith.constant dense<0.000000e+00> : vector<16xf32>
    %243 = vector.multi_reduction <add>, %242, %cst_111 [1] : vector<16x32xf32> to vector<16xf32>
    %244 = vector.shape_cast %243 : vector<16xf32> to vector<16x1xf32>
    %cst_112 = arith.constant 3.200000e+01 : f32
    %245 = vector.broadcast %cst_112 : f32 to vector<16x1xf32>
    %246 = arith.divf %244, %245 : vector<16x1xf32>
    %247 = vector.broadcast %239 : vector<16x1xf32> to vector<16x32xf32>
    %248 = arith.subf %231, %247 : vector<16x32xf32>
    %cst_113 = arith.constant 9.99999974E-6 : f32
    %249 = vector.broadcast %cst_113 : f32 to vector<16x1xf32>
    %250 = arith.addf %246, %249 : vector<16x1xf32>
    %251 = math.rsqrt %250 : vector<16x1xf32>
    %252 = vector.broadcast %251 : vector<16x1xf32> to vector<16x32xf32>
    %253 = arith.mulf %248, %252 : vector<16x32xf32>
    %254 = vector.broadcast %233 : vector<1x32xf32> to vector<16x32xf32>
    %255 = arith.mulf %253, %254 : vector<16x32xf32>
    %256 = vector.broadcast %235 : vector<1x32xf32> to vector<16x32xf32>
    %257 = arith.addf %255, %256 : vector<16x32xf32>
    %c0_114 = arith.constant 0 : index
    %c0_115 = arith.constant 0 : index
    %c0_116 = arith.constant 0 : index
    %258 = vector.load %arg20[%c0_114, %c0_115, %c0_116] : memref<2x32x64xf32, #tpu.memory_space<vmem>>, vector<1x32x64xf32>
    %259 = vector.shape_cast %258 : vector<1x32x64xf32> to vector<32x64xf32>
    %cst_117 = arith.constant dense<0.000000e+00> : vector<16x64xf32>
    %260 = tpu.matmul %257, %259, %cst_117 {dimension_numbers = #tpu.dot_dimension_numbers<[1], [0], [0], [1], [0, 0, 1, 1], [], []>} : vector<16x32xf32>, vector<32x64xf32>, vector<16x64xf32> -> vector<16x64xf32>
    %c0_118 = arith.constant 0 : index
    %c0_119 = arith.constant 0 : index
    %c0_120 = arith.constant 0 : index
    %261 = vector.load %arg21[%c0_118, %c0_119, %c0_120] : memref<2x1x64xf32, #tpu.memory_space<vmem>>, vector<1x1x64xf32>
    %262 = vector.shape_cast %261 : vector<1x1x64xf32> to vector<1x64xf32>
    %263 = vector.broadcast %262 : vector<1x64xf32> to vector<16x64xf32>
    %264 = arith.addf %260, %263 : vector<16x64xf32>
    %cst_121 = arith.constant 0.000000e+00 : f32
    %265 = vector.broadcast %cst_121 : f32 to vector<16x64xf32>
    %266 = arith.maximumf %264, %265 : vector<16x64xf32>
    %c0_122 = arith.constant 0 : index
    %c0_123 = arith.constant 0 : index
    %c0_124 = arith.constant 0 : index
    %267 = vector.load %arg22[%c0_122, %c0_123, %c0_124] : memref<2x64x32xf32, #tpu.memory_space<vmem>>, vector<1x64x32xf32>
    %268 = vector.shape_cast %267 : vector<1x64x32xf32> to vector<64x32xf32>
    %cst_125 = arith.constant dense<0.000000e+00> : vector<16x32xf32>
    %269 = tpu.matmul %266, %268, %cst_125 {dimension_numbers = #tpu.dot_dimension_numbers<[1], [0], [0], [1], [0, 0, 1, 1], [], []>} : vector<16x64xf32>, vector<64x32xf32>, vector<16x32xf32> -> vector<16x32xf32>
    %c0_126 = arith.constant 0 : index
    %c0_127 = arith.constant 0 : index
    %c0_128 = arith.constant 0 : index
    %270 = vector.load %arg23[%c0_126, %c0_127, %c0_128] : memref<2x1x32xf32, #tpu.memory_space<vmem>>, vector<1x1x32xf32>
    %271 = vector.shape_cast %270 : vector<1x1x32xf32> to vector<1x32xf32>
    %272 = vector.broadcast %271 : vector<1x32xf32> to vector<16x32xf32>
    %273 = arith.addf %269, %272 : vector<16x32xf32>
    %274 = arith.addf %273, %257 : vector<16x32xf32>
    %c0_129 = arith.constant 0 : index
    %c0_130 = arith.constant 0 : index
    %c0_131 = arith.constant 0 : index
    %275 = vector.load %arg18[%c0_129, %c0_130, %c0_131] : memref<2x1x32xf32, #tpu.memory_space<vmem>>, vector<1x1x32xf32>
    %276 = vector.shape_cast %275 : vector<1x1x32xf32> to vector<1x32xf32>
    %c0_132 = arith.constant 0 : index
    %c0_133 = arith.constant 0 : index
    %c0_134 = arith.constant 0 : index
    %277 = vector.load %arg19[%c0_132, %c0_133, %c0_134] : memref<2x1x32xf32, #tpu.memory_space<vmem>>, vector<1x1x32xf32>
    %278 = vector.shape_cast %277 : vector<1x1x32xf32> to vector<1x32xf32>
    %cst_135 = arith.constant dense<0.000000e+00> : vector<16xf32>
    %279 = vector.multi_reduction <add>, %274, %cst_135 [1] : vector<16x32xf32> to vector<16xf32>
    %280 = vector.shape_cast %279 : vector<16xf32> to vector<16x1xf32>
    %cst_136 = arith.constant 3.200000e+01 : f32
    %281 = vector.broadcast %cst_136 : f32 to vector<16x1xf32>
    %282 = arith.divf %280, %281 : vector<16x1xf32>
    %283 = vector.broadcast %282 : vector<16x1xf32> to vector<16x32xf32>
    %284 = arith.subf %274, %283 : vector<16x32xf32>
    %285 = arith.mulf %284, %284 : vector<16x32xf32>
    %cst_137 = arith.constant dense<0.000000e+00> : vector<16xf32>
    %286 = vector.multi_reduction <add>, %285, %cst_137 [1] : vector<16x32xf32> to vector<16xf32>
    %287 = vector.shape_cast %286 : vector<16xf32> to vector<16x1xf32>
    %cst_138 = arith.constant 3.200000e+01 : f32
    %288 = vector.broadcast %cst_138 : f32 to vector<16x1xf32>
    %289 = arith.divf %287, %288 : vector<16x1xf32>
    %290 = vector.broadcast %282 : vector<16x1xf32> to vector<16x32xf32>
    %291 = arith.subf %274, %290 : vector<16x32xf32>
    %cst_139 = arith.constant 9.99999974E-6 : f32
    %292 = vector.broadcast %cst_139 : f32 to vector<16x1xf32>
    %293 = arith.addf %289, %292 : vector<16x1xf32>
    %294 = math.rsqrt %293 : vector<16x1xf32>
    %295 = vector.broadcast %294 : vector<16x1xf32> to vector<16x32xf32>
    %296 = arith.mulf %291, %295 : vector<16x32xf32>
    %297 = vector.broadcast %276 : vector<1x32xf32> to vector<16x32xf32>
    %298 = arith.mulf %296, %297 : vector<16x32xf32>
    %299 = vector.broadcast %278 : vector<1x32xf32> to vector<16x32xf32>
    %300 = arith.addf %298, %299 : vector<16x32xf32>
    %c1 = arith.constant 1 : index
    %c0_140 = arith.constant 0 : index
    %c0_141 = arith.constant 0 : index
    %301 = vector.load %arg4[%c1, %c0_140, %c0_141] : memref<2x32x32xf32, #tpu.memory_space<vmem>>, vector<1x32x32xf32>
    %302 = vector.shape_cast %301 : vector<1x32x32xf32> to vector<32x32xf32>
    %c1_142 = arith.constant 1 : index
    %c0_143 = arith.constant 0 : index
    %c0_144 = arith.constant 0 : index
    %303 = vector.load %arg5[%c1_142, %c0_143, %c0_144] : memref<2x32x32xf32, #tpu.memory_space<vmem>>, vector<1x32x32xf32>
    %304 = vector.shape_cast %303 : vector<1x32x32xf32> to vector<32x32xf32>
    %c1_145 = arith.constant 1 : index
    %c0_146 = arith.constant 0 : index
    %c0_147 = arith.constant 0 : index
    %305 = vector.load %arg6[%c1_145, %c0_146, %c0_147] : memref<2x32x32xf32, #tpu.memory_space<vmem>>, vector<1x32x32xf32>
    %306 = vector.shape_cast %305 : vector<1x32x32xf32> to vector<32x32xf32>
    %c1_148 = arith.constant 1 : index
    %c0_149 = arith.constant 0 : index
    %c0_150 = arith.constant 0 : index
    %307 = vector.load %arg7[%c1_148, %c0_149, %c0_150] : memref<2x32x32xf32, #tpu.memory_space<vmem>>, vector<1x32x32xf32>
    %308 = vector.shape_cast %307 : vector<1x32x32xf32> to vector<32x32xf32>
    %c1_151 = arith.constant 1 : index
    %c0_152 = arith.constant 0 : index
    %c0_153 = arith.constant 0 : index
    %309 = vector.load %arg8[%c1_151, %c0_152, %c0_153] : memref<2x1x32xf32, #tpu.memory_space<vmem>>, vector<1x1x32xf32>
    %310 = vector.shape_cast %309 : vector<1x1x32xf32> to vector<1x32xf32>
    %cst_154 = arith.constant dense<0.000000e+00> : vector<16x32xf32>
    %311 = tpu.matmul %300, %302, %cst_154 {dimension_numbers = #tpu.dot_dimension_numbers<[1], [0], [0], [1], [0, 0, 1, 1], [], []>} : vector<16x32xf32>, vector<32x32xf32>, vector<16x32xf32> -> vector<16x32xf32>
    %cst_155 = arith.constant dense<0.000000e+00> : vector<16x32xf32>
    %312 = tpu.matmul %300, %304, %cst_155 {dimension_numbers = #tpu.dot_dimension_numbers<[1], [0], [0], [1], [0, 0, 1, 1], [], []>} : vector<16x32xf32>, vector<32x32xf32>, vector<16x32xf32> -> vector<16x32xf32>
    %cst_156 = arith.constant dense<0.000000e+00> : vector<16x32xf32>
    %313 = tpu.matmul %300, %306, %cst_156 {dimension_numbers = #tpu.dot_dimension_numbers<[1], [0], [0], [1], [0, 0, 1, 1], [], []>} : vector<16x32xf32>, vector<32x32xf32>, vector<16x32xf32> -> vector<16x32xf32>
    %cst_157 = arith.constant 0.000000e+00 : f32
    %314 = vector.broadcast %cst_157 : f32 to vector<16x32xf32>
    %315 = vector.extract_strided_slice %311 {offsets = [0, 0], sizes = [16, 8], strides = [1, 1]} : vector<16x32xf32> to vector<16x8xf32>
    %316 = vector.extract_strided_slice %312 {offsets = [0, 0], sizes = [16, 8], strides = [1, 1]} : vector<16x32xf32> to vector<16x8xf32>
    %cst_158 = arith.constant dense<0.000000e+00> : vector<16x16xf32>
    %317 = tpu.matmul %315, %316, %cst_158 {dimension_numbers = #tpu.dot_dimension_numbers<[1], [1], [0], [0], [0, 0, 1, 0], [], []>} : vector<16x8xf32>, vector<16x8xf32>, vector<16x16xf32> -> vector<16x16xf32>
    %318 = arith.addf %317, %2 : vector<16x16xf32>
    %cst_159 = arith.constant 0.176776692 : f32
    %319 = vector.broadcast %cst_159 : f32 to vector<16x16xf32>
    %320 = arith.mulf %318, %319 : vector<16x16xf32>
    %cst_160 = arith.constant dense<0xFF800000> : vector<16xf32>
    %321 = vector.multi_reduction <maximumf>, %320, %cst_160 [1] : vector<16x16xf32> to vector<16xf32>
    %322 = vector.shape_cast %321 : vector<16xf32> to vector<16x1xf32>
    %323 = vector.broadcast %322 : vector<16x1xf32> to vector<16x16xf32>
    %324 = arith.subf %320, %323 : vector<16x16xf32>
    %325 = math.exp %324 : vector<16x16xf32>
    %cst_161 = arith.constant dense<0.000000e+00> : vector<16xf32>
    %326 = vector.multi_reduction <add>, %325, %cst_161 [1] : vector<16x16xf32> to vector<16xf32>
    %327 = vector.shape_cast %326 : vector<16xf32> to vector<16x1xf32>
    %328 = tpu.reciprocal %327 {approx = true} : vector<16x1xf32> -> vector<16x1xf32>
    %329 = vector.broadcast %328 : vector<16x1xf32> to vector<16x16xf32>
    %330 = arith.mulf %325, %329 : vector<16x16xf32>
    %331 = vector.extract_strided_slice %313 {offsets = [0, 0], sizes = [16, 8], strides = [1, 1]} : vector<16x32xf32> to vector<16x8xf32>
    %cst_162 = arith.constant dense<0.000000e+00> : vector<16x8xf32>
    %332 = tpu.matmul %330, %331, %cst_162 {dimension_numbers = #tpu.dot_dimension_numbers<[1], [0], [0], [1], [0, 0, 1, 1], [], []>} : vector<16x16xf32>, vector<16x8xf32>, vector<16x8xf32> -> vector<16x8xf32>
    %333 = vector.extract_strided_slice %308 {offsets = [0, 0], sizes = [8, 32], strides = [1, 1]} : vector<32x32xf32> to vector<8x32xf32>
    %cst_163 = arith.constant dense<0.000000e+00> : vector<16x32xf32>
    %334 = tpu.matmul %332, %333, %cst_163 {dimension_numbers = #tpu.dot_dimension_numbers<[1], [0], [0], [1], [0, 0, 1, 1], [], []>} : vector<16x8xf32>, vector<8x32xf32>, vector<16x32xf32> -> vector<16x32xf32>
    %335 = arith.addf %314, %334 : vector<16x32xf32>
    %336 = vector.extract_strided_slice %311 {offsets = [0, 8], sizes = [16, 8], strides = [1, 1]} : vector<16x32xf32> to vector<16x8xf32>
    %337 = vector.extract_strided_slice %312 {offsets = [0, 8], sizes = [16, 8], strides = [1, 1]} : vector<16x32xf32> to vector<16x8xf32>
    %cst_164 = arith.constant dense<0.000000e+00> : vector<16x16xf32>
    %338 = tpu.matmul %336, %337, %cst_164 {dimension_numbers = #tpu.dot_dimension_numbers<[1], [1], [0], [0], [0, 0, 1, 0], [], []>} : vector<16x8xf32>, vector<16x8xf32>, vector<16x16xf32> -> vector<16x16xf32>
    %339 = arith.addf %338, %2 : vector<16x16xf32>
    %cst_165 = arith.constant 0.176776692 : f32
    %340 = vector.broadcast %cst_165 : f32 to vector<16x16xf32>
    %341 = arith.mulf %339, %340 : vector<16x16xf32>
    %cst_166 = arith.constant dense<0xFF800000> : vector<16xf32>
    %342 = vector.multi_reduction <maximumf>, %341, %cst_166 [1] : vector<16x16xf32> to vector<16xf32>
    %343 = vector.shape_cast %342 : vector<16xf32> to vector<16x1xf32>
    %344 = vector.broadcast %343 : vector<16x1xf32> to vector<16x16xf32>
    %345 = arith.subf %341, %344 : vector<16x16xf32>
    %346 = math.exp %345 : vector<16x16xf32>
    %cst_167 = arith.constant dense<0.000000e+00> : vector<16xf32>
    %347 = vector.multi_reduction <add>, %346, %cst_167 [1] : vector<16x16xf32> to vector<16xf32>
    %348 = vector.shape_cast %347 : vector<16xf32> to vector<16x1xf32>
    %349 = tpu.reciprocal %348 {approx = true} : vector<16x1xf32> -> vector<16x1xf32>
    %350 = vector.broadcast %349 : vector<16x1xf32> to vector<16x16xf32>
    %351 = arith.mulf %346, %350 : vector<16x16xf32>
    %352 = vector.extract_strided_slice %313 {offsets = [0, 8], sizes = [16, 8], strides = [1, 1]} : vector<16x32xf32> to vector<16x8xf32>
    %cst_168 = arith.constant dense<0.000000e+00> : vector<16x8xf32>
    %353 = tpu.matmul %351, %352, %cst_168 {dimension_numbers = #tpu.dot_dimension_numbers<[1], [0], [0], [1], [0, 0, 1, 1], [], []>} : vector<16x16xf32>, vector<16x8xf32>, vector<16x8xf32> -> vector<16x8xf32>
    %354 = vector.extract_strided_slice %308 {offsets = [8, 0], sizes = [8, 32], strides = [1, 1]} : vector<32x32xf32> to vector<8x32xf32>
    %cst_169 = arith.constant dense<0.000000e+00> : vector<16x32xf32>
    %355 = tpu.matmul %353, %354, %cst_169 {dimension_numbers = #tpu.dot_dimension_numbers<[1], [0], [0], [1], [0, 0, 1, 1], [], []>} : vector<16x8xf32>, vector<8x32xf32>, vector<16x32xf32> -> vector<16x32xf32>
    %356 = arith.addf %335, %355 : vector<16x32xf32>
    %357 = vector.extract_strided_slice %311 {offsets = [0, 16], sizes = [16, 8], strides = [1, 1]} : vector<16x32xf32> to vector<16x8xf32>
    %358 = vector.extract_strided_slice %312 {offsets = [0, 16], sizes = [16, 8], strides = [1, 1]} : vector<16x32xf32> to vector<16x8xf32>
    %cst_170 = arith.constant dense<0.000000e+00> : vector<16x16xf32>
    %359 = tpu.matmul %357, %358, %cst_170 {dimension_numbers = #tpu.dot_dimension_numbers<[1], [1], [0], [0], [0, 0, 1, 0], [], []>} : vector<16x8xf32>, vector<16x8xf32>, vector<16x16xf32> -> vector<16x16xf32>
    %360 = arith.addf %359, %2 : vector<16x16xf32>
    %cst_171 = arith.constant 0.176776692 : f32
    %361 = vector.broadcast %cst_171 : f32 to vector<16x16xf32>
    %362 = arith.mulf %360, %361 : vector<16x16xf32>
    %cst_172 = arith.constant dense<0xFF800000> : vector<16xf32>
    %363 = vector.multi_reduction <maximumf>, %362, %cst_172 [1] : vector<16x16xf32> to vector<16xf32>
    %364 = vector.shape_cast %363 : vector<16xf32> to vector<16x1xf32>
    %365 = vector.broadcast %364 : vector<16x1xf32> to vector<16x16xf32>
    %366 = arith.subf %362, %365 : vector<16x16xf32>
    %367 = math.exp %366 : vector<16x16xf32>
    %cst_173 = arith.constant dense<0.000000e+00> : vector<16xf32>
    %368 = vector.multi_reduction <add>, %367, %cst_173 [1] : vector<16x16xf32> to vector<16xf32>
    %369 = vector.shape_cast %368 : vector<16xf32> to vector<16x1xf32>
    %370 = tpu.reciprocal %369 {approx = true} : vector<16x1xf32> -> vector<16x1xf32>
    %371 = vector.broadcast %370 : vector<16x1xf32> to vector<16x16xf32>
    %372 = arith.mulf %367, %371 : vector<16x16xf32>
    %373 = vector.extract_strided_slice %313 {offsets = [0, 16], sizes = [16, 8], strides = [1, 1]} : vector<16x32xf32> to vector<16x8xf32>
    %cst_174 = arith.constant dense<0.000000e+00> : vector<16x8xf32>
    %374 = tpu.matmul %372, %373, %cst_174 {dimension_numbers = #tpu.dot_dimension_numbers<[1], [0], [0], [1], [0, 0, 1, 1], [], []>} : vector<16x16xf32>, vector<16x8xf32>, vector<16x8xf32> -> vector<16x8xf32>
    %375 = vector.extract_strided_slice %308 {offsets = [16, 0], sizes = [8, 32], strides = [1, 1]} : vector<32x32xf32> to vector<8x32xf32>
    %cst_175 = arith.constant dense<0.000000e+00> : vector<16x32xf32>
    %376 = tpu.matmul %374, %375, %cst_175 {dimension_numbers = #tpu.dot_dimension_numbers<[1], [0], [0], [1], [0, 0, 1, 1], [], []>} : vector<16x8xf32>, vector<8x32xf32>, vector<16x32xf32> -> vector<16x32xf32>
    %377 = arith.addf %356, %376 : vector<16x32xf32>
    %378 = vector.extract_strided_slice %311 {offsets = [0, 24], sizes = [16, 8], strides = [1, 1]} : vector<16x32xf32> to vector<16x8xf32>
    %379 = vector.extract_strided_slice %312 {offsets = [0, 24], sizes = [16, 8], strides = [1, 1]} : vector<16x32xf32> to vector<16x8xf32>
    %cst_176 = arith.constant dense<0.000000e+00> : vector<16x16xf32>
    %380 = tpu.matmul %378, %379, %cst_176 {dimension_numbers = #tpu.dot_dimension_numbers<[1], [1], [0], [0], [0, 0, 1, 0], [], []>} : vector<16x8xf32>, vector<16x8xf32>, vector<16x16xf32> -> vector<16x16xf32>
    %381 = arith.addf %380, %2 : vector<16x16xf32>
    %cst_177 = arith.constant 0.176776692 : f32
    %382 = vector.broadcast %cst_177 : f32 to vector<16x16xf32>
    %383 = arith.mulf %381, %382 : vector<16x16xf32>
    %cst_178 = arith.constant dense<0xFF800000> : vector<16xf32>
    %384 = vector.multi_reduction <maximumf>, %383, %cst_178 [1] : vector<16x16xf32> to vector<16xf32>
    %385 = vector.shape_cast %384 : vector<16xf32> to vector<16x1xf32>
    %386 = vector.broadcast %385 : vector<16x1xf32> to vector<16x16xf32>
    %387 = arith.subf %383, %386 : vector<16x16xf32>
    %388 = math.exp %387 : vector<16x16xf32>
    %cst_179 = arith.constant dense<0.000000e+00> : vector<16xf32>
    %389 = vector.multi_reduction <add>, %388, %cst_179 [1] : vector<16x16xf32> to vector<16xf32>
    %390 = vector.shape_cast %389 : vector<16xf32> to vector<16x1xf32>
    %391 = tpu.reciprocal %390 {approx = true} : vector<16x1xf32> -> vector<16x1xf32>
    %392 = vector.broadcast %391 : vector<16x1xf32> to vector<16x16xf32>
    %393 = arith.mulf %388, %392 : vector<16x16xf32>
    %394 = vector.extract_strided_slice %313 {offsets = [0, 24], sizes = [16, 8], strides = [1, 1]} : vector<16x32xf32> to vector<16x8xf32>
    %cst_180 = arith.constant dense<0.000000e+00> : vector<16x8xf32>
    %395 = tpu.matmul %393, %394, %cst_180 {dimension_numbers = #tpu.dot_dimension_numbers<[1], [0], [0], [1], [0, 0, 1, 1], [], []>} : vector<16x16xf32>, vector<16x8xf32>, vector<16x8xf32> -> vector<16x8xf32>
    %396 = vector.extract_strided_slice %308 {offsets = [24, 0], sizes = [8, 32], strides = [1, 1]} : vector<32x32xf32> to vector<8x32xf32>
    %cst_181 = arith.constant dense<0.000000e+00> : vector<16x32xf32>
    %397 = tpu.matmul %395, %396, %cst_181 {dimension_numbers = #tpu.dot_dimension_numbers<[1], [0], [0], [1], [0, 0, 1, 1], [], []>} : vector<16x8xf32>, vector<8x32xf32>, vector<16x32xf32> -> vector<16x32xf32>
    %398 = arith.addf %377, %397 : vector<16x32xf32>
    %399 = vector.broadcast %310 : vector<1x32xf32> to vector<16x32xf32>
    %400 = arith.addf %398, %399 : vector<16x32xf32>
    %401 = arith.addf %400, %300 : vector<16x32xf32>
    %c1_182 = arith.constant 1 : index
    %c0_183 = arith.constant 0 : index
    %c0_184 = arith.constant 0 : index
    %402 = vector.load %arg14[%c1_182, %c0_183, %c0_184] : memref<2x1x32xf32, #tpu.memory_space<vmem>>, vector<1x1x32xf32>
    %403 = vector.shape_cast %402 : vector<1x1x32xf32> to vector<1x32xf32>
    %c1_185 = arith.constant 1 : index
    %c0_186 = arith.constant 0 : index
    %c0_187 = arith.constant 0 : index
    %404 = vector.load %arg15[%c1_185, %c0_186, %c0_187] : memref<2x1x32xf32, #tpu.memory_space<vmem>>, vector<1x1x32xf32>
    %405 = vector.shape_cast %404 : vector<1x1x32xf32> to vector<1x32xf32>
    %cst_188 = arith.constant dense<0.000000e+00> : vector<16xf32>
    %406 = vector.multi_reduction <add>, %401, %cst_188 [1] : vector<16x32xf32> to vector<16xf32>
    %407 = vector.shape_cast %406 : vector<16xf32> to vector<16x1xf32>
    %cst_189 = arith.constant 3.200000e+01 : f32
    %408 = vector.broadcast %cst_189 : f32 to vector<16x1xf32>
    %409 = arith.divf %407, %408 : vector<16x1xf32>
    %410 = vector.broadcast %409 : vector<16x1xf32> to vector<16x32xf32>
    %411 = arith.subf %401, %410 : vector<16x32xf32>
    %412 = arith.mulf %411, %411 : vector<16x32xf32>
    %cst_190 = arith.constant dense<0.000000e+00> : vector<16xf32>
    %413 = vector.multi_reduction <add>, %412, %cst_190 [1] : vector<16x32xf32> to vector<16xf32>
    %414 = vector.shape_cast %413 : vector<16xf32> to vector<16x1xf32>
    %cst_191 = arith.constant 3.200000e+01 : f32
    %415 = vector.broadcast %cst_191 : f32 to vector<16x1xf32>
    %416 = arith.divf %414, %415 : vector<16x1xf32>
    %417 = vector.broadcast %409 : vector<16x1xf32> to vector<16x32xf32>
    %418 = arith.subf %401, %417 : vector<16x32xf32>
    %cst_192 = arith.constant 9.99999974E-6 : f32
    %419 = vector.broadcast %cst_192 : f32 to vector<16x1xf32>
    %420 = arith.addf %416, %419 : vector<16x1xf32>
    %421 = math.rsqrt %420 : vector<16x1xf32>
    %422 = vector.broadcast %421 : vector<16x1xf32> to vector<16x32xf32>
    %423 = arith.mulf %418, %422 : vector<16x32xf32>
    %424 = vector.broadcast %403 : vector<1x32xf32> to vector<16x32xf32>
    %425 = arith.mulf %423, %424 : vector<16x32xf32>
    %426 = vector.broadcast %405 : vector<1x32xf32> to vector<16x32xf32>
    %427 = arith.addf %425, %426 : vector<16x32xf32>
    %c1_193 = arith.constant 1 : index
    %c0_194 = arith.constant 0 : index
    %c0_195 = arith.constant 0 : index
    %428 = vector.load %arg9[%c1_193, %c0_194, %c0_195] : memref<2x32x32xf32, #tpu.memory_space<vmem>>, vector<1x32x32xf32>
    %429 = vector.shape_cast %428 : vector<1x32x32xf32> to vector<32x32xf32>
    %c1_196 = arith.constant 1 : index
    %c0_197 = arith.constant 0 : index
    %c0_198 = arith.constant 0 : index
    %430 = vector.load %arg10[%c1_196, %c0_197, %c0_198] : memref<2x32x32xf32, #tpu.memory_space<vmem>>, vector<1x32x32xf32>
    %431 = vector.shape_cast %430 : vector<1x32x32xf32> to vector<32x32xf32>
    %c1_199 = arith.constant 1 : index
    %c0_200 = arith.constant 0 : index
    %c0_201 = arith.constant 0 : index
    %432 = vector.load %arg11[%c1_199, %c0_200, %c0_201] : memref<2x32x32xf32, #tpu.memory_space<vmem>>, vector<1x32x32xf32>
    %433 = vector.shape_cast %432 : vector<1x32x32xf32> to vector<32x32xf32>
    %c1_202 = arith.constant 1 : index
    %c0_203 = arith.constant 0 : index
    %c0_204 = arith.constant 0 : index
    %434 = vector.load %arg12[%c1_202, %c0_203, %c0_204] : memref<2x32x32xf32, #tpu.memory_space<vmem>>, vector<1x32x32xf32>
    %435 = vector.shape_cast %434 : vector<1x32x32xf32> to vector<32x32xf32>
    %c1_205 = arith.constant 1 : index
    %c0_206 = arith.constant 0 : index
    %c0_207 = arith.constant 0 : index
    %436 = vector.load %arg13[%c1_205, %c0_206, %c0_207] : memref<2x1x32xf32, #tpu.memory_space<vmem>>, vector<1x1x32xf32>
    %437 = vector.shape_cast %436 : vector<1x1x32xf32> to vector<1x32xf32>
    %cst_208 = arith.constant dense<0.000000e+00> : vector<16x32xf32>
    %438 = tpu.matmul %427, %429, %cst_208 {dimension_numbers = #tpu.dot_dimension_numbers<[1], [0], [0], [1], [0, 0, 1, 1], [], []>} : vector<16x32xf32>, vector<32x32xf32>, vector<16x32xf32> -> vector<16x32xf32>
    %cst_209 = arith.constant dense<0.000000e+00> : vector<16x32xf32>
    %439 = tpu.matmul %1, %431, %cst_209 {dimension_numbers = #tpu.dot_dimension_numbers<[1], [0], [0], [1], [0, 0, 1, 1], [], []>} : vector<16x32xf32>, vector<32x32xf32>, vector<16x32xf32> -> vector<16x32xf32>
    %cst_210 = arith.constant dense<0.000000e+00> : vector<16x32xf32>
    %440 = tpu.matmul %1, %433, %cst_210 {dimension_numbers = #tpu.dot_dimension_numbers<[1], [0], [0], [1], [0, 0, 1, 1], [], []>} : vector<16x32xf32>, vector<32x32xf32>, vector<16x32xf32> -> vector<16x32xf32>
    %cst_211 = arith.constant 0.000000e+00 : f32
    %441 = vector.broadcast %cst_211 : f32 to vector<16x32xf32>
    %442 = vector.extract_strided_slice %438 {offsets = [0, 0], sizes = [16, 8], strides = [1, 1]} : vector<16x32xf32> to vector<16x8xf32>
    %443 = vector.extract_strided_slice %439 {offsets = [0, 0], sizes = [16, 8], strides = [1, 1]} : vector<16x32xf32> to vector<16x8xf32>
    %cst_212 = arith.constant dense<0.000000e+00> : vector<16x16xf32>
    %444 = tpu.matmul %442, %443, %cst_212 {dimension_numbers = #tpu.dot_dimension_numbers<[1], [1], [0], [0], [0, 0, 1, 0], [], []>} : vector<16x8xf32>, vector<16x8xf32>, vector<16x16xf32> -> vector<16x16xf32>
    %445 = arith.addf %444, %3 : vector<16x16xf32>
    %cst_213 = arith.constant 0.176776692 : f32
    %446 = vector.broadcast %cst_213 : f32 to vector<16x16xf32>
    %447 = arith.mulf %445, %446 : vector<16x16xf32>
    %cst_214 = arith.constant dense<0xFF800000> : vector<16xf32>
    %448 = vector.multi_reduction <maximumf>, %447, %cst_214 [1] : vector<16x16xf32> to vector<16xf32>
    %449 = vector.shape_cast %448 : vector<16xf32> to vector<16x1xf32>
    %450 = vector.broadcast %449 : vector<16x1xf32> to vector<16x16xf32>
    %451 = arith.subf %447, %450 : vector<16x16xf32>
    %452 = math.exp %451 : vector<16x16xf32>
    %cst_215 = arith.constant dense<0.000000e+00> : vector<16xf32>
    %453 = vector.multi_reduction <add>, %452, %cst_215 [1] : vector<16x16xf32> to vector<16xf32>
    %454 = vector.shape_cast %453 : vector<16xf32> to vector<16x1xf32>
    %455 = tpu.reciprocal %454 {approx = true} : vector<16x1xf32> -> vector<16x1xf32>
    %456 = vector.broadcast %455 : vector<16x1xf32> to vector<16x16xf32>
    %457 = arith.mulf %452, %456 : vector<16x16xf32>
    %458 = vector.extract_strided_slice %440 {offsets = [0, 0], sizes = [16, 8], strides = [1, 1]} : vector<16x32xf32> to vector<16x8xf32>
    %cst_216 = arith.constant dense<0.000000e+00> : vector<16x8xf32>
    %459 = tpu.matmul %457, %458, %cst_216 {dimension_numbers = #tpu.dot_dimension_numbers<[1], [0], [0], [1], [0, 0, 1, 1], [], []>} : vector<16x16xf32>, vector<16x8xf32>, vector<16x8xf32> -> vector<16x8xf32>
    %460 = vector.extract_strided_slice %435 {offsets = [0, 0], sizes = [8, 32], strides = [1, 1]} : vector<32x32xf32> to vector<8x32xf32>
    %cst_217 = arith.constant dense<0.000000e+00> : vector<16x32xf32>
    %461 = tpu.matmul %459, %460, %cst_217 {dimension_numbers = #tpu.dot_dimension_numbers<[1], [0], [0], [1], [0, 0, 1, 1], [], []>} : vector<16x8xf32>, vector<8x32xf32>, vector<16x32xf32> -> vector<16x32xf32>
    %462 = arith.addf %441, %461 : vector<16x32xf32>
    %463 = vector.extract_strided_slice %438 {offsets = [0, 8], sizes = [16, 8], strides = [1, 1]} : vector<16x32xf32> to vector<16x8xf32>
    %464 = vector.extract_strided_slice %439 {offsets = [0, 8], sizes = [16, 8], strides = [1, 1]} : vector<16x32xf32> to vector<16x8xf32>
    %cst_218 = arith.constant dense<0.000000e+00> : vector<16x16xf32>
    %465 = tpu.matmul %463, %464, %cst_218 {dimension_numbers = #tpu.dot_dimension_numbers<[1], [1], [0], [0], [0, 0, 1, 0], [], []>} : vector<16x8xf32>, vector<16x8xf32>, vector<16x16xf32> -> vector<16x16xf32>
    %466 = arith.addf %465, %3 : vector<16x16xf32>
    %cst_219 = arith.constant 0.176776692 : f32
    %467 = vector.broadcast %cst_219 : f32 to vector<16x16xf32>
    %468 = arith.mulf %466, %467 : vector<16x16xf32>
    %cst_220 = arith.constant dense<0xFF800000> : vector<16xf32>
    %469 = vector.multi_reduction <maximumf>, %468, %cst_220 [1] : vector<16x16xf32> to vector<16xf32>
    %470 = vector.shape_cast %469 : vector<16xf32> to vector<16x1xf32>
    %471 = vector.broadcast %470 : vector<16x1xf32> to vector<16x16xf32>
    %472 = arith.subf %468, %471 : vector<16x16xf32>
    %473 = math.exp %472 : vector<16x16xf32>
    %cst_221 = arith.constant dense<0.000000e+00> : vector<16xf32>
    %474 = vector.multi_reduction <add>, %473, %cst_221 [1] : vector<16x16xf32> to vector<16xf32>
    %475 = vector.shape_cast %474 : vector<16xf32> to vector<16x1xf32>
    %476 = tpu.reciprocal %475 {approx = true} : vector<16x1xf32> -> vector<16x1xf32>
    %477 = vector.broadcast %476 : vector<16x1xf32> to vector<16x16xf32>
    %478 = arith.mulf %473, %477 : vector<16x16xf32>
    %479 = vector.extract_strided_slice %440 {offsets = [0, 8], sizes = [16, 8], strides = [1, 1]} : vector<16x32xf32> to vector<16x8xf32>
    %cst_222 = arith.constant dense<0.000000e+00> : vector<16x8xf32>
    %480 = tpu.matmul %478, %479, %cst_222 {dimension_numbers = #tpu.dot_dimension_numbers<[1], [0], [0], [1], [0, 0, 1, 1], [], []>} : vector<16x16xf32>, vector<16x8xf32>, vector<16x8xf32> -> vector<16x8xf32>
    %481 = vector.extract_strided_slice %435 {offsets = [8, 0], sizes = [8, 32], strides = [1, 1]} : vector<32x32xf32> to vector<8x32xf32>
    %cst_223 = arith.constant dense<0.000000e+00> : vector<16x32xf32>
    %482 = tpu.matmul %480, %481, %cst_223 {dimension_numbers = #tpu.dot_dimension_numbers<[1], [0], [0], [1], [0, 0, 1, 1], [], []>} : vector<16x8xf32>, vector<8x32xf32>, vector<16x32xf32> -> vector<16x32xf32>
    %483 = arith.addf %462, %482 : vector<16x32xf32>
    %484 = vector.extract_strided_slice %438 {offsets = [0, 16], sizes = [16, 8], strides = [1, 1]} : vector<16x32xf32> to vector<16x8xf32>
    %485 = vector.extract_strided_slice %439 {offsets = [0, 16], sizes = [16, 8], strides = [1, 1]} : vector<16x32xf32> to vector<16x8xf32>
    %cst_224 = arith.constant dense<0.000000e+00> : vector<16x16xf32>
    %486 = tpu.matmul %484, %485, %cst_224 {dimension_numbers = #tpu.dot_dimension_numbers<[1], [1], [0], [0], [0, 0, 1, 0], [], []>} : vector<16x8xf32>, vector<16x8xf32>, vector<16x16xf32> -> vector<16x16xf32>
    %487 = arith.addf %486, %3 : vector<16x16xf32>
    %cst_225 = arith.constant 0.176776692 : f32
    %488 = vector.broadcast %cst_225 : f32 to vector<16x16xf32>
    %489 = arith.mulf %487, %488 : vector<16x16xf32>
    %cst_226 = arith.constant dense<0xFF800000> : vector<16xf32>
    %490 = vector.multi_reduction <maximumf>, %489, %cst_226 [1] : vector<16x16xf32> to vector<16xf32>
    %491 = vector.shape_cast %490 : vector<16xf32> to vector<16x1xf32>
    %492 = vector.broadcast %491 : vector<16x1xf32> to vector<16x16xf32>
    %493 = arith.subf %489, %492 : vector<16x16xf32>
    %494 = math.exp %493 : vector<16x16xf32>
    %cst_227 = arith.constant dense<0.000000e+00> : vector<16xf32>
    %495 = vector.multi_reduction <add>, %494, %cst_227 [1] : vector<16x16xf32> to vector<16xf32>
    %496 = vector.shape_cast %495 : vector<16xf32> to vector<16x1xf32>
    %497 = tpu.reciprocal %496 {approx = true} : vector<16x1xf32> -> vector<16x1xf32>
    %498 = vector.broadcast %497 : vector<16x1xf32> to vector<16x16xf32>
    %499 = arith.mulf %494, %498 : vector<16x16xf32>
    %500 = vector.extract_strided_slice %440 {offsets = [0, 16], sizes = [16, 8], strides = [1, 1]} : vector<16x32xf32> to vector<16x8xf32>
    %cst_228 = arith.constant dense<0.000000e+00> : vector<16x8xf32>
    %501 = tpu.matmul %499, %500, %cst_228 {dimension_numbers = #tpu.dot_dimension_numbers<[1], [0], [0], [1], [0, 0, 1, 1], [], []>} : vector<16x16xf32>, vector<16x8xf32>, vector<16x8xf32> -> vector<16x8xf32>
    %502 = vector.extract_strided_slice %435 {offsets = [16, 0], sizes = [8, 32], strides = [1, 1]} : vector<32x32xf32> to vector<8x32xf32>
    %cst_229 = arith.constant dense<0.000000e+00> : vector<16x32xf32>
    %503 = tpu.matmul %501, %502, %cst_229 {dimension_numbers = #tpu.dot_dimension_numbers<[1], [0], [0], [1], [0, 0, 1, 1], [], []>} : vector<16x8xf32>, vector<8x32xf32>, vector<16x32xf32> -> vector<16x32xf32>
    %504 = arith.addf %483, %503 : vector<16x32xf32>
    %505 = vector.extract_strided_slice %438 {offsets = [0, 24], sizes = [16, 8], strides = [1, 1]} : vector<16x32xf32> to vector<16x8xf32>
    %506 = vector.extract_strided_slice %439 {offsets = [0, 24], sizes = [16, 8], strides = [1, 1]} : vector<16x32xf32> to vector<16x8xf32>
    %cst_230 = arith.constant dense<0.000000e+00> : vector<16x16xf32>
    %507 = tpu.matmul %505, %506, %cst_230 {dimension_numbers = #tpu.dot_dimension_numbers<[1], [1], [0], [0], [0, 0, 1, 0], [], []>} : vector<16x8xf32>, vector<16x8xf32>, vector<16x16xf32> -> vector<16x16xf32>
    %508 = arith.addf %507, %3 : vector<16x16xf32>
    %cst_231 = arith.constant 0.176776692 : f32
    %509 = vector.broadcast %cst_231 : f32 to vector<16x16xf32>
    %510 = arith.mulf %508, %509 : vector<16x16xf32>
    %cst_232 = arith.constant dense<0xFF800000> : vector<16xf32>
    %511 = vector.multi_reduction <maximumf>, %510, %cst_232 [1] : vector<16x16xf32> to vector<16xf32>
    %512 = vector.shape_cast %511 : vector<16xf32> to vector<16x1xf32>
    %513 = vector.broadcast %512 : vector<16x1xf32> to vector<16x16xf32>
    %514 = arith.subf %510, %513 : vector<16x16xf32>
    %515 = math.exp %514 : vector<16x16xf32>
    %cst_233 = arith.constant dense<0.000000e+00> : vector<16xf32>
    %516 = vector.multi_reduction <add>, %515, %cst_233 [1] : vector<16x16xf32> to vector<16xf32>
    %517 = vector.shape_cast %516 : vector<16xf32> to vector<16x1xf32>
    %518 = tpu.reciprocal %517 {approx = true} : vector<16x1xf32> -> vector<16x1xf32>
    %519 = vector.broadcast %518 : vector<16x1xf32> to vector<16x16xf32>
    %520 = arith.mulf %515, %519 : vector<16x16xf32>
    %521 = vector.extract_strided_slice %440 {offsets = [0, 24], sizes = [16, 8], strides = [1, 1]} : vector<16x32xf32> to vector<16x8xf32>
    %cst_234 = arith.constant dense<0.000000e+00> : vector<16x8xf32>
    %522 = tpu.matmul %520, %521, %cst_234 {dimension_numbers = #tpu.dot_dimension_numbers<[1], [0], [0], [1], [0, 0, 1, 1], [], []>} : vector<16x16xf32>, vector<16x8xf32>, vector<16x8xf32> -> vector<16x8xf32>
    %523 = vector.extract_strided_slice %435 {offsets = [24, 0], sizes = [8, 32], strides = [1, 1]} : vector<32x32xf32> to vector<8x32xf32>
    %cst_235 = arith.constant dense<0.000000e+00> : vector<16x32xf32>
    %524 = tpu.matmul %522, %523, %cst_235 {dimension_numbers = #tpu.dot_dimension_numbers<[1], [0], [0], [1], [0, 0, 1, 1], [], []>} : vector<16x8xf32>, vector<8x32xf32>, vector<16x32xf32> -> vector<16x32xf32>
    %525 = arith.addf %504, %524 : vector<16x32xf32>
    %526 = vector.broadcast %437 : vector<1x32xf32> to vector<16x32xf32>
    %527 = arith.addf %525, %526 : vector<16x32xf32>
    %528 = arith.addf %527, %427 : vector<16x32xf32>
    %c1_236 = arith.constant 1 : index
    %c0_237 = arith.constant 0 : index
    %c0_238 = arith.constant 0 : index
    %529 = vector.load %arg16[%c1_236, %c0_237, %c0_238] : memref<2x1x32xf32, #tpu.memory_space<vmem>>, vector<1x1x32xf32>
    %530 = vector.shape_cast %529 : vector<1x1x32xf32> to vector<1x32xf32>
    %c1_239 = arith.constant 1 : index
    %c0_240 = arith.constant 0 : index
    %c0_241 = arith.constant 0 : index
    %531 = vector.load %arg17[%c1_239, %c0_240, %c0_241] : memref<2x1x32xf32, #tpu.memory_space<vmem>>, vector<1x1x32xf32>
    %532 = vector.shape_cast %531 : vector<1x1x32xf32> to vector<1x32xf32>
    %cst_242 = arith.constant dense<0.000000e+00> : vector<16xf32>
    %533 = vector.multi_reduction <add>, %528, %cst_242 [1] : vector<16x32xf32> to vector<16xf32>
    %534 = vector.shape_cast %533 : vector<16xf32> to vector<16x1xf32>
    %cst_243 = arith.constant 3.200000e+01 : f32
    %535 = vector.broadcast %cst_243 : f32 to vector<16x1xf32>
    %536 = arith.divf %534, %535 : vector<16x1xf32>
    %537 = vector.broadcast %536 : vector<16x1xf32> to vector<16x32xf32>
    %538 = arith.subf %528, %537 : vector<16x32xf32>
    %539 = arith.mulf %538, %538 : vector<16x32xf32>
    %cst_244 = arith.constant dense<0.000000e+00> : vector<16xf32>
    %540 = vector.multi_reduction <add>, %539, %cst_244 [1] : vector<16x32xf32> to vector<16xf32>
    %541 = vector.shape_cast %540 : vector<16xf32> to vector<16x1xf32>
    %cst_245 = arith.constant 3.200000e+01 : f32
    %542 = vector.broadcast %cst_245 : f32 to vector<16x1xf32>
    %543 = arith.divf %541, %542 : vector<16x1xf32>
    %544 = vector.broadcast %536 : vector<16x1xf32> to vector<16x32xf32>
    %545 = arith.subf %528, %544 : vector<16x32xf32>
    %cst_246 = arith.constant 9.99999974E-6 : f32
    %546 = vector.broadcast %cst_246 : f32 to vector<16x1xf32>
    %547 = arith.addf %543, %546 : vector<16x1xf32>
    %548 = math.rsqrt %547 : vector<16x1xf32>
    %549 = vector.broadcast %548 : vector<16x1xf32> to vector<16x32xf32>
    %550 = arith.mulf %545, %549 : vector<16x32xf32>
    %551 = vector.broadcast %530 : vector<1x32xf32> to vector<16x32xf32>
    %552 = arith.mulf %550, %551 : vector<16x32xf32>
    %553 = vector.broadcast %532 : vector<1x32xf32> to vector<16x32xf32>
    %554 = arith.addf %552, %553 : vector<16x32xf32>
    %c1_247 = arith.constant 1 : index
    %c0_248 = arith.constant 0 : index
    %c0_249 = arith.constant 0 : index
    %555 = vector.load %arg20[%c1_247, %c0_248, %c0_249] : memref<2x32x64xf32, #tpu.memory_space<vmem>>, vector<1x32x64xf32>
    %556 = vector.shape_cast %555 : vector<1x32x64xf32> to vector<32x64xf32>
    %cst_250 = arith.constant dense<0.000000e+00> : vector<16x64xf32>
    %557 = tpu.matmul %554, %556, %cst_250 {dimension_numbers = #tpu.dot_dimension_numbers<[1], [0], [0], [1], [0, 0, 1, 1], [], []>} : vector<16x32xf32>, vector<32x64xf32>, vector<16x64xf32> -> vector<16x64xf32>
    %c1_251 = arith.constant 1 : index
    %c0_252 = arith.constant 0 : index
    %c0_253 = arith.constant 0 : index
    %558 = vector.load %arg21[%c1_251, %c0_252, %c0_253] : memref<2x1x64xf32, #tpu.memory_space<vmem>>, vector<1x1x64xf32>
    %559 = vector.shape_cast %558 : vector<1x1x64xf32> to vector<1x64xf32>
    %560 = vector.broadcast %559 : vector<1x64xf32> to vector<16x64xf32>
    %561 = arith.addf %557, %560 : vector<16x64xf32>
    %cst_254 = arith.constant 0.000000e+00 : f32
    %562 = vector.broadcast %cst_254 : f32 to vector<16x64xf32>
    %563 = arith.maximumf %561, %562 : vector<16x64xf32>
    %c1_255 = arith.constant 1 : index
    %c0_256 = arith.constant 0 : index
    %c0_257 = arith.constant 0 : index
    %564 = vector.load %arg22[%c1_255, %c0_256, %c0_257] : memref<2x64x32xf32, #tpu.memory_space<vmem>>, vector<1x64x32xf32>
    %565 = vector.shape_cast %564 : vector<1x64x32xf32> to vector<64x32xf32>
    %cst_258 = arith.constant dense<0.000000e+00> : vector<16x32xf32>
    %566 = tpu.matmul %563, %565, %cst_258 {dimension_numbers = #tpu.dot_dimension_numbers<[1], [0], [0], [1], [0, 0, 1, 1], [], []>} : vector<16x64xf32>, vector<64x32xf32>, vector<16x32xf32> -> vector<16x32xf32>
    %c1_259 = arith.constant 1 : index
    %c0_260 = arith.constant 0 : index
    %c0_261 = arith.constant 0 : index
    %567 = vector.load %arg23[%c1_259, %c0_260, %c0_261] : memref<2x1x32xf32, #tpu.memory_space<vmem>>, vector<1x1x32xf32>
    %568 = vector.shape_cast %567 : vector<1x1x32xf32> to vector<1x32xf32>
    %569 = vector.broadcast %568 : vector<1x32xf32> to vector<16x32xf32>
    %570 = arith.addf %566, %569 : vector<16x32xf32>
    %571 = arith.addf %570, %554 : vector<16x32xf32>
    %c1_262 = arith.constant 1 : index
    %c0_263 = arith.constant 0 : index
    %c0_264 = arith.constant 0 : index
    %572 = vector.load %arg18[%c1_262, %c0_263, %c0_264] : memref<2x1x32xf32, #tpu.memory_space<vmem>>, vector<1x1x32xf32>
    %573 = vector.shape_cast %572 : vector<1x1x32xf32> to vector<1x32xf32>
    %c1_265 = arith.constant 1 : index
    %c0_266 = arith.constant 0 : index
    %c0_267 = arith.constant 0 : index
    %574 = vector.load %arg19[%c1_265, %c0_266, %c0_267] : memref<2x1x32xf32, #tpu.memory_space<vmem>>, vector<1x1x32xf32>
    %575 = vector.shape_cast %574 : vector<1x1x32xf32> to vector<1x32xf32>
    %cst_268 = arith.constant dense<0.000000e+00> : vector<16xf32>
    %576 = vector.multi_reduction <add>, %571, %cst_268 [1] : vector<16x32xf32> to vector<16xf32>
    %577 = vector.shape_cast %576 : vector<16xf32> to vector<16x1xf32>
    %cst_269 = arith.constant 3.200000e+01 : f32
    %578 = vector.broadcast %cst_269 : f32 to vector<16x1xf32>
    %579 = arith.divf %577, %578 : vector<16x1xf32>
    %580 = vector.broadcast %579 : vector<16x1xf32> to vector<16x32xf32>
    %581 = arith.subf %571, %580 : vector<16x32xf32>
    %582 = arith.mulf %581, %581 : vector<16x32xf32>
    %cst_270 = arith.constant dense<0.000000e+00> : vector<16xf32>
    %583 = vector.multi_reduction <add>, %582, %cst_270 [1] : vector<16x32xf32> to vector<16xf32>
    %584 = vector.shape_cast %583 : vector<16xf32> to vector<16x1xf32>
    %cst_271 = arith.constant 3.200000e+01 : f32
    %585 = vector.broadcast %cst_271 : f32 to vector<16x1xf32>
    %586 = arith.divf %584, %585 : vector<16x1xf32>
    %587 = vector.broadcast %579 : vector<16x1xf32> to vector<16x32xf32>
    %588 = arith.subf %571, %587 : vector<16x32xf32>
    %cst_272 = arith.constant 9.99999974E-6 : f32
    %589 = vector.broadcast %cst_272 : f32 to vector<16x1xf32>
    %590 = arith.addf %586, %589 : vector<16x1xf32>
    %591 = math.rsqrt %590 : vector<16x1xf32>
    %592 = vector.broadcast %591 : vector<16x1xf32> to vector<16x32xf32>
    %593 = arith.mulf %588, %592 : vector<16x32xf32>
    %594 = vector.broadcast %573 : vector<1x32xf32> to vector<16x32xf32>
    %595 = arith.mulf %593, %594 : vector<16x32xf32>
    %596 = vector.broadcast %575 : vector<1x32xf32> to vector<16x32xf32>
    %597 = arith.addf %595, %596 : vector<16x32xf32>
    %c0_273 = arith.constant 0 : index
    %c0_274 = arith.constant 0 : index
    %598 = vector.load %arg24[%c0_273, %c0_274] : memref<32x128xf32, #tpu.memory_space<vmem>>, vector<32x128xf32>
    %cst_275 = arith.constant dense<0.000000e+00> : vector<16x128xf32>
    %599 = tpu.matmul %597, %598, %cst_275 {dimension_numbers = #tpu.dot_dimension_numbers<[1], [0], [0], [1], [0, 0, 1, 1], [], []>} : vector<16x32xf32>, vector<32x128xf32>, vector<16x128xf32> -> vector<16x128xf32>
    %c0_276 = arith.constant 0 : index
    %c0_277 = arith.constant 0 : index
    %600 = vector.load %arg25[%c0_276, %c0_277] : memref<1x128xf32, #tpu.memory_space<vmem>>, vector<1x128xf32>
    %601 = vector.broadcast %600 : vector<1x128xf32> to vector<16x128xf32>
    %602 = arith.addf %599, %601 : vector<16x128xf32>
    %c0_278 = arith.constant 0 : index
    %c0_279 = arith.constant 0 : index
    %603 = vector.load %arg26[%c0_278, %c0_279] : memref<16x128xf32, #tpu.memory_space<vmem>>, vector<16x128xf32>
    tpu.vector_store %arg26[%c0_278, %c0_279], %602 {strides = array<i32>} : memref<16x128xf32, #tpu.memory_space<vmem>>, vector<16x128xf32>,
    return
  }
}

</mosaic_0001>

<bundles_post_ra>
// kernel: decoder_forward.1
= control target key start
LH: loop header
LB: loop body
LE: loop exit
PB: predicated region body
PF: predicated region fallthrough
CT: control target
= control target key end

     0   :  { %s9273_s0 = inlined_call_operand.vmem [shape: f32[16,32], index: 0, kind: input, shape index: {}]   ;;  %s9274_s1 = inlined_call_operand.hbm [shape: f32[16,32], index: 1, kind: input, shape index: {}]   ;;  %s9275_s2 = inlined_call_operand.vmem [shape: f32[16,16], index: 2, kind: input, shape index: {}]   ;;  %s9276_s3 = inlined_call_operand.vmem [shape: f32[16,16], index: 3, kind: input, shape index: {}]   ;;  %s9277_s4 = inlined_call_operand.vmem [shape: f32[2,32,32], index: 4, kind: input, shape index: {}]   ;;  %s9278_s5 = inlined_call_operand.vmem [shape: f32[2,32,32], index: 5, kind: input, shape index: {}]   ;;  %s9279_s6 = inlined_call_operand.vmem [shape: f32[2,32,32], index: 6, kind: input, shape index: {}]   ;;  %s9280_s7 = inlined_call_operand.vmem [shape: f32[2,32,32], index: 7, kind: input, shape index: {}]   ;;  %s9281_s8 = inlined_call_operand.vmem [shape: f32[2,1,32], index: 8, kind: input, shape index: {}]   ;;  %s9282_s9 = inlined_call_operand.vmem [shape: f32[2,32,32], index: 9, kind: input, shape index: {}]   ;;  %s9283_s10 = inlined_call_operand.vmem [shape: f32[2,32,32], index: 10, kind: input, shape index: {}]   ;;  %s9284_s11 = inlined_call_operand.vmem [shape: f32[2,32,32], index: 11, kind: input, shape index: {}]   ;;  %s9285_s12 = inlined_call_operand.vmem [shape: f32[2,32,32], index: 12, kind: input, shape index: {}]   ;;  %s9286_s13 = inlined_call_operand.vmem [shape: f32[2,1,32], index: 13, kind: input, shape index: {}]   ;;  %s9287_s14 = inlined_call_operand.vmem [shape: f32[2,1,32], index: 14, kind: input, shape index: {}]   ;;  %s9288_s15 = inlined_call_operand.vmem [shape: f32[2,1,32], index: 15, kind: input, shape index: {}]   ;;  %s9289_s16 = inlined_call_operand.vmem [shape: f32[2,1,32], index: 16, kind: input, shape index: {}]   ;;  %s9290_s17 = inlined_call_operand.vmem [shape: f32[2,1,32], index: 17, kind: input, shape index: {}]   ;;  %s9291_s18 = inlined_call_operand.vmem [shape: f32[2,1,32], index: 18, kind: input, shape index: {}]   ;;  %s9292_s19 = inlined_call_operand.vmem [shape: f32[2,1,32], index: 19, kind: input, shape index: {}]   ;;  %s9293_s20 = inlined_call_operand.vmem [shape: f32[2,32,64], index: 20, kind: input, shape index: {}]   ;;  %s9294_s21 = inlined_call_operand.hbm [shape: f32[2,1,64], index: 21, kind: input, shape index: {}]   ;;  %s9295_s22 = inlined_call_operand.vmem [shape: f32[2,64,32], index: 22, kind: input, shape index: {}]   ;;  %s9296_s23 = inlined_call_operand.hbm [shape: f32[2,1,32], index: 23, kind: input, shape index: {}]   ;;  %s9297_s24 = inlined_call_operand.vmem [shape: f32[32,128], index: 24, kind: input, shape index: {}]   ;;  %s9298_s25 = inlined_call_operand.vmem [shape: f32[1,128], index: 25, kind: input, shape index: {}]   ;;  %s9299_s26 = inlined_call_operand.vmem [shape: f32[16,128], index: 26, kind: output, shape index: {}]  }
   0x1   :  { %9321 = sst [smem:[#allocation9_spill]] %s9273_s0 }
   0x2   :  { %9322 = sst [smem:[#allocation10_spill]] %s9274_s1 }
   0x3   :  { %9323 = sst [smem:[#allocation11_spill]] %s9275_s2 }
   0x4   :  { %9324 = sst [smem:[#allocation12_spill]] %s9276_s3 }
   0x5   :  { %9325 = sst [smem:[#allocation13_spill]] %s9277_s4 }
   0x6   :  { %9326 = sst [smem:[#allocation14_spill]] %s9278_s5 }
   0x7   :  { %9327 = sst [smem:[#allocation15_spill]] %s9279_s6 }
   0x8   :  { %9328 = sst [smem:[#allocation16_spill]] %s9280_s7 }
   0x9   :  { %9329 = sst [smem:[#allocation17_spill]] %s9281_s8 }
   0xa   :  { %9330 = sst [smem:[#allocation18_spill]] %s9282_s9 }
   0xb   :  { %9331 = sst [smem:[#allocation19_spill]] %s9283_s10 }
   0xc   :  { %9332 = sst [smem:[#allocation20_spill]] %s9286_s13 }
   0xd   :  { %9333 = sst [smem:[#allocation21_spill]] %s9297_s24 }
   0xe   :  { %9334 = sst [smem:[#allocation22_spill]] %s9298_s25 }
   0xf   :  { %9335 = sst [smem:[#allocation23_spill]] %s9299_s26 }
  0x10   :  { %31 = vsyncpa [#allocation3], 0 }
  0x11   :  { %32 = vsyncpa [#allocation5], 0  ;;  %s8177_s27 = smov [#allocation4]   ;;  %s8107_s8 = scalar_lea.hbm %s9294_s21, 32 }
  0x12   :  { %s90_s3 = sshll.u32 %s8177_s27, 4  ;;  %p8108_p0 = scmp.ne.s32.totalorder %s9294_s21, %s8107_s8  ;;  %s91_s3 = int_to_ptr.vmem [resolvable:$true] %s90_s3 }
  0x13   :  { %p8111_p1 = scmp.lt.u32.totalorder %s8107_s8, %s9294_s21 }
  0x15   :  { %p8113_p2 = pnand %p8111_p1, %p8108_p0 }
  0x17   :  { %8116 = shalt.err (!%p8113_p2)
}
  0x18   :  { %s8117_s30 = scalar_lea.vmem %s91_s3, 32  ;;  %p8122_p4 = scmp.lt.s32.totalorder %s91_s3, %s91_s3 }
  0x19   :  { %p8118_p3 = scmp.ne.s32.totalorder %s91_s3, %s8117_s30  ;;  %p8123_p5 = scmp.lt.s32.totalorder %s8117_s30, %s8117_s30 }
  0x1b   :  { %p8124_p6 = por %p8123_p5, %p8122_p4 }
  0x1d   :  { %p8125_p7 = pnand %p8124_p6, %p8118_p3 }
  0x1f   :  { %8128 = shalt.err (!%p8125_p7)
}
  0x20   :  { %s9312_s2 = smov 16   ;;  %s8179_s5 = smov 1  }
  0x21   :  { %96 = dma.hbm_to_vmem [thread:$0]  %s9294_s21, 32, %s91_s3, [#allocation5], %s9312_s2, %s9312_s2, %s8179_s5  }
  0x22   :  { %s8180_s1 = smov [#allocation2]   ;;  %s9336_s8 = sld [smem:[#allocation10_spill]] }
  0x23   :  { %s40_s27 = sshll.u32 %s8180_s1, 4  ;;  %s41_s27 = int_to_ptr.vmem [resolvable:$true] %s40_s27 }
  0x28   :  { %s8129_s4 = scalar_lea.hbm %s9336_s8, 256 }
  0x29   :  { %p8130_p8 = scmp.ne.s32.totalorder %s9336_s8, %s8129_s4  ;;  %p8133_p9 = scmp.lt.u32.totalorder %s8129_s4, %s9336_s8 }
  0x2b   :  { %p8135_p10 = pnand %p8133_p9, %p8130_p8 }
  0x2d   :  { %8138 = shalt.err (!%p8135_p10)
}
  0x2e   :  { %s8139_s26 = scalar_lea.vmem %s41_s27, 256  ;;  %p8144_p12 = scmp.lt.s32.totalorder %s41_s27, %s41_s27 }
  0x2f   :  { %p8140_p11 = scmp.ne.s32.totalorder %s41_s27, %s8139_s26  ;;  %p8145_p13 = scmp.lt.s32.totalorder %s8139_s26, %s8139_s26 }
  0x31   :  { %p8146_p0 = por %p8145_p13, %p8144_p12 }
  0x33   :  { %p8147_p1 = pnand %p8146_p0, %p8140_p11 }
  0x35   :  { %8150 = shalt.err (!%p8147_p1)
}
  0x36   :  { %s8181_s21 = smov 128   ;;  %s8182_s3 = smov 8  }
  0x37   :  { %46 = dma.hbm_to_vmem [thread:$0]  %s9336_s8, 256, %s41_s27, [#allocation3], %s8181_s21, %s8181_s21, %s8182_s3  }
  0x38   :  { %s8183_s1 = smov [#allocation6]   ;;  %s8151_s29 = scalar_lea.hbm %s9296_s23, 32 }
  0x39   :  { %s104_s7 = sshll.u32 %s8183_s1, 4  ;;  %p8152_p2 = scmp.ne.s32.totalorder %s9296_s23, %s8151_s29  ;;  %s105_s7 = int_to_ptr.vmem [resolvable:$true] %s104_s7 }
  0x3a   :  { %p8155_p3 = scmp.lt.u32.totalorder %s8151_s29, %s9296_s23 }
  0x3c   :  { %p8157_p4 = pnand %p8155_p3, %p8152_p2 }
  0x3e   :  { %8160 = shalt.err (!%p8157_p4)
}
  0x3f   :  { %s8161_s2 = scalar_lea.vmem %s105_s7, 32  ;;  %p8166_p6 = scmp.lt.s32.totalorder %s105_s7, %s105_s7 }
  0x40   :  { %p8162_p5 = scmp.ne.s32.totalorder %s105_s7, %s8161_s2  ;;  %p8167_p7 = scmp.lt.s32.totalorder %s8161_s2, %s8161_s2 }
  0x42   :  { %p8168_p8 = por %p8167_p7, %p8166_p6 }
  0x44   :  { %p8169_p9 = pnand %p8168_p8, %p8162_p5 }
  0x46   :  { %8172 = shalt.err (!%p8169_p9)
}
  0x47   :  { %s9337_s27 = smov 16  }
  0x48   :  { %110 = dma.hbm_to_vmem [thread:$0]  %s9296_s23, 32, %s105_s7, [#allocation5], %s9337_s27, %s9337_s27, %s8179_s5  }
  0x49   :  { %8173 = dma.done.wait [#allocation3], 256  }
  0x4a   :  { %8174 = vsyncadd [#allocation3], 4294967040 }
  0x4b   :  { %8175 = dma.done.wait [#allocation5], 64  }
  0x4c   :  { %8176 = vsyncadd [#allocation5], 4294967232  ;;  %vm149_vm0 = vcmask 261120   ;;  %s9338_s6 = sld [smem:[#allocation14_spill]]  ;;  %s9339_s0 = sld [smem:[#allocation9_spill]]  ;;  %vm381_vm1 = vcmask 64512  }
  0x4d   :  { %s9340_s30 = sld [smem:[#allocation13_spill]]  ;;  %s9341_s23 = sld [smem:[#allocation15_spill]]  ;;  %vm8422_vm2 = vmpackc.low %vm381_vm1, %vm381_vm1  ;;  %vm471_vm3 = vcmask 130048   ;;  %vm3111_vm4 = vcmask 523264  }
  0x4e   :  { %s9317_s8 = smov 120   ;;  %s9344_s10 = sld [smem:[#allocation11_spill]] }
  0x4f   :  { %s9315_s28 = smov 112   ;;  %s9313_s4 = smov 104  }
  0x50   :  { %s9345_s7 = sld [smem:[#allocation16_spill]]  ;;  %s9346_s29 = sld [smem:[#allocation17_spill]] }
  0x51   :  { %s9347_s9 = sld [smem:[#allocation19_spill]]  ;;  %s9349_s27 = sld [smem:[#allocation12_spill]] }
  0x52   :  { %v136_v0 = vld [vmem:[%s9338_s6] sm:$0xff]  ;;  %v137_v1 = vld [vmem:[%s9338_s6 + $0x8] sm:$0xff]  ;;  %v138_v2 = vld [vmem:[%s9338_s6 + $0x10] sm:$0xff]  ;;  %s9350_s2 = smov 112   ;;  %s9353_s26 = sld [smem:[#allocation20_spill]] }
  0x53   :  { %v7491_v3 = vpack.c.bf16 %v137_v1, %v136_v0  ;;  %v139_v4 = vld [vmem:[%s9338_s6 + $0x18] sm:$0xff]  ;;  %v8379_v5 = vld [vmem:[%s9339_s0] sm:$0xff]  ;;  %v133_v8 = vld [vmem:[%s9340_s30 + $0x8] sm:$0xff]  ;;  %s9354_s25 = sld [smem:[#allocation21_spill]] }
  0x54   :  { %v132_v6 = vld [vmem:[%s9340_s30] sm:$0xff]  ;;  %v7495_v7 = vpack.c.bf16 %v139_v4, %v138_v2  ;;  %6995 = vmatprep.mubr.msk.f32.mxu1 %vm149_vm0, %v8379_v5  ;;  %v134_v9 = vld [vmem:[%s9340_s30 + $0x10] sm:$0xff]  ;;  %6984 = vmatprep.mubr.msk.f32.mxu0 %vm149_vm0, %v8379_v5  ;;  %v135_v11 = vld [vmem:[%s9340_s30 + $0x18] sm:$0xff] }
  0x55   :  { %7492 = vmatprep.subr.bf16.mxu1 %v7491_v3  ;;  %v7483_v10 = vpack.c.bf16 %v133_v8, %v132_v6  ;;  %v7487_v12 = vpack.c.bf16 %v135_v11, %v134_v9  ;;  %v8400_v13 = vld [vmem:[%s9339_s0 + $0x8] sm:$0xff]  ;;  %v140_v14 = vld [vmem:[%s9341_s23] sm:$0xff]  ;;  %v142_v16 = vld [vmem:[%s9341_s23 + $0x10] sm:$0xff] }
  0x56   :  { %7494 = vmatpush3.bf16.msra.mxu1 %v7491_v3  ;;  %v141_v15 = vld [vmem:[%s9341_s23 + $0x8] sm:$0xff]  ;;  %v143_v18 = vld [vmem:[%s9341_s23 + $0x18] sm:$0xff]  ;;  %v8452_v28 = vld [vmem:[%s9344_s10] sm:$0xff] }
  0x57   :  { %7496 = vmatprep.subr.bf16.mxu1 %v7495_v7  ;;  %7484 = vmatprep.subr.bf16.mxu0 %v7483_v10  ;;  %v7499_v17 = vpack.c.bf16 %v141_v15, %v140_v14  ;;  %v7503_v19 = vpack.c.bf16 %v143_v18, %v142_v16  ;;  %v8447_v27 = vld [vmem:[%s9344_s10 + $0x8] sm:$0xff] }
  0x58   :  { %7486 = vmatpush3.bf16.msra.mxu0 %v7483_v10 }
  0x59   :  { %7488 = vmatprep.subr.bf16.mxu0 %v7487_v12 }
  0x5a   :  { %7498 = vmatpush3.bf16.msra.mxu1 %v7495_v7 }
  0x5c   :  { %7490 = vmatpush3.bf16.msra.mxu0 %v7487_v12 }
  0x5d   :  { %6996 = vmatmul.mubr.msk.f32.vlgmr.msra.gmra.mrb[0].mxu1 %vm149_vm0, %v8400_v13  ;;  %7500 = vmatprep.subr.bf16.mxu0 %v7499_v17 }
  0x5f   :  { %6985 = vmatmul.mubr.msk.f32.vlgmr.msra.gmra.mrb[0].mxu0 %vm149_vm0, %v8400_v13 }
  0x60   :  { %7006 = vmatprep.mubr.msk.f32.mxu0 %vm149_vm0, %v8379_v5  ;;  %7502 = vmatpush3.bf16.msra.mxu0 %v7499_v17 }
  0x61   :  { %7504 = vmatprep.subr.bf16.mxu0 %v7503_v19 }
  0x64   :  { %7506 = vmatpush3.bf16.msra.mxu0 %v7503_v19 }
  0x67   :  { %7007 = vmatmul.mubr.msk.f32.vlgmr.msra.gmra.mrb[2].mxu0 %vm149_vm0, %v8400_v13 }
 0x130   :  { %v6997_v20 = vpop.f32.mrb[0].mxu1 }
 0x131   :  { %v297_v21 = vpop.f32.mrb[1].mxu1 }
 0x132   :  { %v7507_v23 = vpack.c.bf16 %v6997_v20, %v297_v21  ;;  %v8428_v24 = vpop.f32.mrb[0].mxu0  ;;  %v8430_v25 = vpack.i.bf16 %v6997_v20, %v297_v21 }
 0x133   :  { %v8432_v26 = vpop.f32.mrb[1].mxu0 }
 0x134   :  { %7509 = vmatprep.subr.msk.bf16.mxu1 %vm8422_vm2, %v7507_v23  ;;  %575 = vrot.lane.b32.xlu1 %v8432_v26, %s9317_s8 }
 0x135   :  { %7512 = vmatpush3.bf16.xpose.msk.msra.mxu1 %vm8422_vm2, %v7507_v23  ;;  %7013 = vmatprep.mubr.msk.f32.mxu1 %vm381_vm1, %v8432_v26 }
 0x13a   :  { %v7008_v37 = vpop.f32.mrb[2].mxu0 }
 0x13b   :  { %v372_v38 = vpop.f32.mrb[3].mxu0 }
 0x13c   :  { %7014 = vmatmul.mubr.msk.f32.vlgmr.msra.gmra.mrb[2].mxu1 %vm381_vm1, %v8428_v24  ;;  %v7513_v39 = vpack.c.bf16 %v7008_v37, %v372_v38  ;;  %v8466_v54 = vpack.i.bf16 %v7008_v37, %v372_v38 }
 0x13e   :  { %7514 = vmatprep.subr.bf16.mxu1 %v7513_v39 }
 0x13f   :  { %7516 = vmatpush3.bf16.msra.mxu1 %v7513_v39 }
 0x1a6   :  { %v576_v55 = vpop.permute.xlu1 %575 }
 0x20f   :  { %v7015_v29 = vpop.f32.mrb[2].mxu1 }
 0x210   :  { %v460_v30 = vpop.f32.mrb[3].mxu1  ;;  %v466_v31 = vadd.f32 %v7015_v29, %v8447_v27 }
 0x211   :  { %v461_v32 = vadd.f32 %v460_v30, %v8452_v28 }
 0x212   :  { %v470_v34 = vmul.f32 0.17677669, %v466_v31 }
 0x213   :  { %v469_v33 = vmul.f32 0.17677669, %v461_v32 }
 0x214   :  { %v475_v36 = vsel %vm471_vm3, %v470_v34, -inf }
 0x215   :  { %v472_v35 = vsel %vm471_vm3, %v469_v33, -inf }
 0x216   :  { %473 = vmax.xlane.f32.xlu0 %v472_v35 }
 0x21a   :  { %476 = vmax.xlane.f32.xlu0 %v475_v36 }
 0x230   :  { %7830 = vrot.lane.b32.xlu0 %v8430_v25, %s9317_s8 }
 0x234   :  { %941 = vrot.lane.b32.xlu0 %v8432_v26, %s9315_s28 }
 0x2a3   :  { %v474_v40 = vpop.xlane.xlu0 %473 }
 0x2a4   :  { %v478_v41 = vsub.f32 %v469_v33, %v474_v40 }
 0x2a6   :  { %v480_v44 = vmul.f32 1.442695, %v478_v41 }
 0x2a7   :  { %v477_v42 = vpop.xlane.xlu0 %476 }
 0x2a8   :  { %v479_v43 = vsub.f32 %v470_v34, %v477_v42 }
 0x2aa   :  { %v482_v45 = vmul.f32 1.442695, %v479_v43 }
 0x2ab   :  { %v7831_v46 = vpop.permute.xlu0 %7830 }
 0x2ac   :  { %7949 = vpow2.f32 %v482_v45  ;;  %v7833_v47 = vunpack.i.h.bf16 %v7831_v46  ;;  %v7832_v48 = vunpack.i.l.bf16 %v7831_v46 }
 0x2ad   :  { %7951 = vpow2.f32 %v480_v44 }
 0x2ae   :  { %v7517_v49 = vpack.c.bf16 %v7833_v47, %v7832_v48 }
 0x2af   :  { %v942_v3 = vpop.permute.xlu0 %941 }
 0x2b0   :  { %7519 = vmatprep.subr.msk.bf16.mxu1 %vm8422_vm2, %v7517_v49 }
 0x2b6   :  { %v7950_v50 = vpop.eup %7949 }
 0x2b7   :  { %v487_v51 = vsel %vm471_vm3, %v7950_v50, 0.0  ;;  %v7952_v52 = vpop.eup %7951 }
 0x2b8   :  { %488 = vadd.xlane.f32.xlu1 %v487_v51  ;;  %v484_v53 = vsel %vm471_vm3, %v7952_v52, 0.0 }
 0x2bc   :  { %485 = vadd.xlane.f32.xlu1 %v484_v53 }
 0x2cd   :  { %577 = vrot.lane.b32.xlu1 %v8428_v24, %s9317_s8 }
 0x2d1   :  { %7835 = vrot.lane.b32.xlu1 %v8430_v25, %s9315_s28 }
 0x2d5   :  { %943 = vrot.lane.b32.xlu1 %v8428_v24, %s9315_s28 }
 0x345   :  { %v489_v56 = vpop.xlane.xlu1 %488 }
 0x346   :  { %7953 = vrcp.f32 %v489_v56 }
 0x349   :  { %v486_v57 = vpop.xlane.xlu1 %485 }
 0x34a   :  { %7955 = vrcp.f32 %v486_v57 }
 0x34d   :  { %v578_v58 = vpop.permute.xlu1 %577 }
 0x350   :  { %v7954_v60 = vpop.eup %7953 }
 0x351   :  { %v7836_v59 = vpop.permute.xlu1 %7835  ;;  %v493_v1 = vmul.f32 %v7954_v60, %v7950_v50 }
 0x352   :  { %v7838_v62 = vunpack.i.h.bf16 %v7836_v59  ;;  %v7837_v63 = vunpack.i.l.bf16 %v7836_v59 }
 0x354   :  { %v7956_v61 = vpop.eup %7955  ;;  %v7527_v2 = vpack.c.bf16 %v7838_v62, %v7837_v63 }
 0x355   :  { %v492_v0 = vmul.f32 %v7956_v61, %v7952_v52  ;;  %v944_v4 = vpop.permute.xlu1 %943 }
 0x357   :  { %7020 = vmatprep.mubr.msk.f32.mxu1 %vm471_vm3, %v492_v0 }
 0x358   :  { %7021 = vmatmul.mubr.msk.f32.vlgmr.msra.gmra.mrb[4].mxu1 %vm471_vm3, %v493_v1 }
 0x359   :  { %7522 = vmatpush3.bf16.xpose.msk.msra.mxu1 %vm8422_vm2, %v7517_v49  ;;  %7027 = vmatprep.mubr.msk.f32.mxu1 %vm381_vm1, %v576_v55 }
 0x35a   :  { %7529 = vmatprep.subr.msk.bf16.mxu1 %vm8422_vm2, %v7527_v2 }
 0x360   :  { %7028 = vmatmul.mubr.msk.f32.vlgmr.msra.gmra.mrb[6].mxu1 %vm381_vm1, %v578_v58 }
 0x361   :  { %7532 = vmatpush3.bf16.xpose.msk.msra.mxu1 %vm8422_vm2, %v7527_v2  ;;  %7051 = vmatprep.mubr.msk.f32.mxu1 %vm381_vm1, %v942_v3 }
 0x368   :  { %7052 = vmatmul.mubr.msk.f32.vlgmr.msra.gmra.mrb[8].mxu1 %vm381_vm1, %v944_v4 }
 0x42b   :  { %v8486_v6 = vpop.f32.mrb[4].mxu1 }
 0x42c   :  { %v8488_v7 = vpop.f32.mrb[5].mxu1 }
 0x433   :  { %v7029_v8 = vpop.f32.mrb[6].mxu1 }
 0x434   :  { %v663_v9 = vadd.f32 %v7029_v8, %v8447_v27  ;;  %v657_v10 = vpop.f32.mrb[7].mxu1 }
 0x435   :  { %v658_v11 = vadd.f32 %v657_v10, %v8452_v28 }
 0x436   :  { %v667_v12 = vmul.f32 0.17677669, %v663_v9 }
 0x437   :  { %v666_v14 = vmul.f32 0.17677669, %v658_v11 }
 0x438   :  { %v671_v15 = vsel %vm471_vm3, %v667_v12, -inf }
 0x439   :  { %672 = vmax.xlane.f32.xlu1 %v671_v15  ;;  %v668_v16 = vsel %vm471_vm3, %v666_v14, -inf }
 0x43a   :  { %669 = vmax.xlane.f32.xlu0 %v668_v16 }
 0x43b   :  { %v7053_v17 = vpop.f32.mrb[8].mxu1 }
 0x43c   :  { %v1023_v18 = vpop.f32.mrb[9].mxu1  ;;  %v1029_v19 = vadd.f32 %v7053_v17, %v8447_v27 }
 0x43d   :  { %v1024_v44 = vadd.f32 %v1023_v18, %v8452_v28 }
 0x43e   :  { %v1033_v20 = vmul.f32 0.17677669, %v1029_v19 }
 0x43f   :  { %v1032_v45 = vmul.f32 0.17677669, %v1024_v44 }
 0x440   :  { %v1037_v21 = vsel %vm471_vm3, %v1033_v20, -inf }
 0x441   :  { %v1034_v46 = vsel %vm471_vm3, %v1032_v45, -inf }
 0x44a   :  { %7845 = vrot.lane.b32.xlu1 %v8430_v25, %s9313_s4 }
 0x44e   :  { %1226 = vrot.lane.b32.xlu1 %v8432_v26, %s9313_s4 }
 0x452   :  { %1228 = vrot.lane.b32.xlu1 %v8428_v24, %s9313_s4 }
 0x476   :  { %1038 = vmax.xlane.f32.xlu1 %v1037_v21 }
 0x4c6   :  { %v673_v23 = vpop.xlane.xlu1 %672 }
 0x4c7   :  { %v675_v29 = vsub.f32 %v667_v12, %v673_v23  ;;  %v670_v30 = vpop.xlane.xlu0 %669 }
 0x4c8   :  { %v674_v31 = vsub.f32 %v666_v14, %v670_v30 }
 0x4c9   :  { %v678_v32 = vmul.f32 1.442695, %v675_v29 }
 0x4ca   :  { %v676_v33 = vmul.f32 1.442695, %v674_v31  ;;  %v7846_v34 = vpop.permute.xlu1 %7845 }
 0x4cb   :  { %7957 = vpow2.f32 %v678_v32  ;;  %v7848_v25 = vunpack.i.h.bf16 %v7846_v34  ;;  %v7847_v35 = vunpack.i.l.bf16 %v7846_v34 }
 0x4cc   :  { %7959 = vpow2.f32 %v676_v33 }
 0x4cd   :  { %v7537_v26 = vpack.c.bf16 %v7848_v25, %v7847_v35 }
 0x4ce   :  { %v1227_v36 = vpop.permute.xlu1 %1226 }
 0x4cf   :  { %7539 = vmatprep.subr.msk.bf16.mxu1 %vm8422_vm2, %v7537_v26  ;;  %7070 = vmatprep.mubr.msk.f32.mxu1 %vm381_vm1, %v1227_v36 }
 0x4d0   :  { %7542 = vmatpush3.bf16.xpose.msk.msra.mxu1 %vm8422_vm2, %v7537_v26 }
 0x4d2   :  { %v1229_v37 = vpop.permute.xlu1 %1228 }
 0x4d5   :  { %v7958_v24 = vpop.eup %7957 }
 0x4d6   :  { %v683_v38 = vsel %vm471_vm3, %v7958_v24, 0.0  ;;  %v7960_v39 = vpop.eup %7959 }
 0x4d7   :  { %7071 = vmatmul.mubr.msk.f32.vlgmr.msra.gmra.mrb[10].mxu1 %vm381_vm1, %v1229_v37  ;;  %684 = vadd.xlane.f32.xlu0 %v683_v38  ;;  %v680_v40 = vsel %vm471_vm3, %v7960_v39, 0.0  ;;  %v146_v37 = vld [vmem:[%s9345_s7 + $0x10] sm:$0xff] }
 0x4db   :  { %681 = vadd.xlane.f32.xlu0 %v680_v40 }
 0x4f1   :  { %7840 = vrot.lane.b32.xlu0 %v8466_v54, %s9317_s8 }
 0x503   :  { %v1039_v41 = vpop.xlane.xlu1 %1038 }
 0x504   :  { %v1041_v42 = vsub.f32 %v1033_v20, %v1039_v41 }
 0x506   :  { %v1044_v43 = vmul.f32 1.442695, %v1041_v42 }
 0x508   :  { %7961 = vpow2.f32 %v1044_v43 }
 0x510   :  { %1035 = vmax.xlane.f32.xlu0 %v1034_v46 }
 0x512   :  { %v8514_v47 = vpop.eup %7961 }
 0x513   :  { %v1049_v48 = vsel %vm471_vm3, %v8514_v47, 0.0 }
 0x514   :  { %1050 = vadd.xlane.f32.xlu0 %v1049_v48 }
 0x564   :  { %v685_v49 = vpop.xlane.xlu0 %684 }
 0x565   :  { %7963 = vrcp.f32 %v685_v49 }
 0x568   :  { %v682_v50 = vpop.xlane.xlu0 %681 }
 0x569   :  { %7965 = vrcp.f32 %v682_v50 }
 0x56c   :  { %v7841_v51 = vpop.permute.xlu0 %7840 }
 0x56d   :  { %v7843_v52 = vunpack.i.h.bf16 %v7841_v51  ;;  %v7842_v53 = vunpack.i.l.bf16 %v7841_v51  ;;  %v6493_v51 = vld [vmem:[%s9346_s29] ss:$0 sm:$0xff] }
 0x56f   :  { %v7523_v55 = vpack.c.bf16 %v7843_v52, %v7842_v53  ;;  %v7964_v56 = vpop.eup %7963 }
 0x570   :  { %v689_v59 = vmul.f32 %v7964_v56, %v7958_v24 }
 0x571   :  { %7524 = vmatprep.subr.bf16.mxu0 %v7523_v55 }
 0x572   :  { %7526 = vmatpush3.bf16.msra.mxu0 %v7523_v55 }
 0x573   :  { %v7966_v57 = vpop.eup %7965 }
 0x574   :  { %v688_v58 = vmul.f32 %v7966_v57, %v7960_v39 }
 0x576   :  { %7034 = vmatprep.mubr.msk.f32.mxu0 %vm471_vm3, %v688_v58 }
 0x577   :  { %7035 = vmatmul.mubr.msk.f32.vlgmr.msra.gmra.mrb[4].mxu0 %vm471_vm3, %v689_v59 }
 0x59d   :  { %v1036_v60 = vpop.xlane.xlu0 %1035 }
 0x59e   :  { %v1040_v61 = vsub.f32 %v1032_v45, %v1036_v60 }
 0x5a0   :  { %v1042_v62 = vmul.f32 1.442695, %v1040_v61 }
 0x5a1   :  { %v1051_v12 = vpop.xlane.xlu0 %1050 }
 0x5a2   :  { %7967 = vpow2.f32 %v1042_v62 }
 0x5aa   :  { %v7072_v63 = vpop.f32.mrb[10].mxu1 }
 0x5ab   :  { %v1308_v0 = vpop.f32.mrb[11].mxu1  ;;  %v1314_v2 = vadd.f32 %v7072_v63, %v8447_v27  ;;  %v145_v27 = vld [vmem:[%s9345_s7 + $0x8] sm:$0xff] }
 0x5ac   :  { %v7968_v1 = vpop.eup %7967  ;;  %v1309_v3 = vadd.f32 %v1308_v0, %v8452_v28  ;;  %7037 = vmatprep.subr.mxu0 %v145_v27  ;;  %v144_v28 = vld [vmem:[%s9345_s7] sm:$0xff] }
 0x5ad   :  { %v1046_v4 = vsel %vm471_vm3, %v7968_v1, 0.0  ;;  %v1318_v9 = vmul.f32 0.17677669, %v1314_v2  ;;  %7038 = vmatpush3.msra.mxu0 %v145_v27  ;;  %v1573_v27 = vld [vmem:[%s9347_s9 + $0x18] sm:$0xff] }
 0x5ae   :  { %v1317_v8 = vmul.f32 0.17677669, %v1309_v3  ;;  %1047 = vadd.xlane.f32.xlu0 %v1046_v4  ;;  %7042 = vmatprep.subr.mxu0 %v144_v28 }
 0x5af   :  { %v1322_v11 = vsel %vm471_vm3, %v1318_v9, -inf }
 0x5b0   :  { %v1319_v10 = vsel %vm471_vm3, %v1317_v8, -inf }
 0x5b1   :  { %1320 = vmax.xlane.f32.xlu1 %v1319_v10 }
 0x5b5   :  { %1323 = vmax.xlane.f32.xlu1 %v1322_v11  ;;  %v1572_v11 = vld [vmem:[%s9347_s9 + $0x10] sm:$0xff] }
 0x5c4   :  { %7850 = vrot.lane.b32.xlu0 %v8466_v54, %s9315_s28  ;;  %s9351_s28 = smov 104  }
 0x63b   :  { %v1048_v15 = vpop.xlane.xlu0 %1047 }
 0x63c   :  { %7969 = vrcp.f32 %v1048_v15 }
 0x63e   :  { %v1321_v14 = vpop.xlane.xlu1 %1320 }
 0x63f   :  { %v1325_v16 = vsub.f32 %v1317_v8, %v1321_v14  ;;  %v7851_v21 = vpop.permute.xlu0 %7850 }
 0x640   :  { %v7853_v23 = vunpack.i.h.bf16 %v7851_v21  ;;  %v7852_v29 = vunpack.i.l.bf16 %v7851_v21 }
 0x641   :  { %v1327_v19 = vmul.f32 1.442695, %v1325_v16 }
 0x642   :  { %v1324_v17 = vpop.xlane.xlu1 %1323  ;;  %v7533_v32 = vpack.c.bf16 %v7853_v23, %v7852_v29 }
 0x643   :  { %v1326_v18 = vsub.f32 %v1318_v9, %v1324_v17  ;;  %v1571_v9 = vld [vmem:[%s9347_s9 + $0x8] sm:$0xff] }
 0x645   :  { %v1329_v20 = vmul.f32 1.442695, %v1326_v18 }
 0x646   :  { %v7970_v33 = vpop.eup %7969 }
 0x647   :  { %7971 = vpow2.f32 %v1329_v20  ;;  %v1054_v36 = vmul.f32 %v7970_v33, %v7968_v1  ;;  %v127_v20 = vld [vmem:[#allocation2 + $0x8] sm:$0xff] }
 0x648   :  { %7973 = vpow2.f32 %v1327_v19 }
 0x649   :  { %7975 = vrcp.f32 %v1051_v12  ;;  %v7559_v12 = vpack.c.bf16 %v1573_v27, %v1572_v11 }
 0x64a   :  { %v7036_v30 = vpop.f32.mrb[4].mxu0 }
 0x64b   :  { %v770_v31 = vpop.f32.mrb[5].mxu0 }
 0x64c   :  { %7039 = vmatprep.mubr.msk.f32.mxu0 %vm381_vm1, %v770_v31 }
 0x64d   :  { %7040 = vmatmul.mubr.msk.f32.vlgmr.msra.gmra.mrb[6].mxu0 %vm381_vm1, %v7036_v30 }
 0x64e   :  { %7043 = vmatpush3.msra.mxu0 %v144_v28  ;;  %7044 = vmatprep.mubr.msk.f32.mxu0 %vm381_vm1, %v8488_v7  ;;  %v126_v28 = vld [vmem:[#allocation2] sm:$0xff] }
 0x64f   :  { %7534 = vmatprep.subr.bf16.mxu0 %v7533_v32 }
 0x651   :  { %v7972_v34 = vpop.eup %7971 }
 0x652   :  { %v1334_v25 = vsel %vm471_vm3, %v7972_v34, 0.0  ;;  %v7974_v35 = vpop.eup %7973 }
 0x653   :  { %1335 = vadd.xlane.f32.xlu1 %v1334_v25  ;;  %v7976_v26 = vpop.eup %7975  ;;  %v1331_v24 = vsel %vm471_vm3, %v7974_v35, 0.0 }
 0x654   :  { %v1055_v7 = vmul.f32 %v7976_v26, %v8514_v47  ;;  %v147_v47 = vld [vmem:[%s9345_s7 + $0x18] sm:$0xff] }
 0x655   :  { %7045 = vmatmul.mubr.msk.f32.vlgmr.msra.gmra.mrb[6].mxu0 %vm381_vm1, %v8486_v6 }
 0x656   :  { %7536 = vmatpush3.bf16.msra.mxu0 %v7533_v32  ;;  %7058 = vmatprep.mubr.msk.f32.mxu0 %vm471_vm3, %v1054_v36 }
 0x657   :  { %1332 = vadd.xlane.f32.xlu1 %v1331_v24  ;;  %7061 = vmatprep.subr.mxu0 %v146_v37 }
 0x659   :  { %7059 = vmatmul.mubr.msk.f32.vlgmr.msra.gmra.mrb[8].mxu0 %vm471_vm3, %v1055_v7 }
 0x65a   :  { %7062 = vmatpush3.msra.mxu0 %v146_v37 }
 0x668   :  { %7855 = vrot.lane.b32.xlu1 %v8466_v54, %s9313_s4  ;;  %s9348_s4 = sld [smem:[#allocation18_spill]] }
 0x66e   :  { %v1566_v14 = vld [vmem:[%s9348_s4] sm:$0xff]  ;;  %v1567_v15 = vld [vmem:[%s9348_s4 + $0x8] sm:$0xff]  ;;  %v1568_v17 = vld [vmem:[%s9348_s4 + $0x10] sm:$0xff] }
 0x66f   :  { %v7547_v16 = vpack.c.bf16 %v1567_v15, %v1566_v14  ;;  %v1569_v18 = vld [vmem:[%s9348_s4 + $0x18] sm:$0xff] }
 0x670   :  { %v7551_v19 = vpack.c.bf16 %v1569_v18, %v1568_v17 }
 0x671   :  { %7548 = vmatprep.subr.bf16.mxu1 %v7547_v16 }
 0x672   :  { %7550 = vmatpush3.bf16.msra.mxu1 %v7547_v16 }
 0x673   :  { %7552 = vmatprep.subr.bf16.mxu1 %v7551_v19 }
 0x676   :  { %7554 = vmatpush3.bf16.msra.mxu1 %v7551_v19 }
 0x6e0   :  { %v1336_v6 = vpop.xlane.xlu1 %1335 }
 0x6e4   :  { %v1333_v38 = vpop.xlane.xlu1 %1332 }
 0x6e5   :  { %7977 = vrcp.f32 %v1333_v38 }
 0x6e6   :  { %7979 = vrcp.f32 %v1336_v6 }
 0x6e8   :  { %v7856_v39 = vpop.permute.xlu1 %7855 }
 0x6e9   :  { %v7858_v40 = vunpack.i.h.bf16 %v7856_v39  ;;  %v7857_v41 = vunpack.i.l.bf16 %v7856_v39 }
 0x6eb   :  { %v7543_v42 = vpack.c.bf16 %v7858_v40, %v7857_v41 }
 0x6ed   :  { %7544 = vmatprep.subr.bf16.mxu0 %v7543_v42 }
 0x6ef   :  { %v7978_v43 = vpop.eup %7977 }
 0x6f0   :  { %v7980_v46 = vpop.eup %7979  ;;  %v1339_v54 = vmul.f32 %v7978_v43, %v7974_v35  ;;  %v6495_v35 = vld [vmem:[%s9288_s15] ss:$0 sm:$0xff] }
 0x6f1   :  { %v1340_v48 = vmul.f32 %v7980_v46, %v7972_v34  ;;  %v6494_v34 = vld [vmem:[%s9287_s14] ss:$0 sm:$0xff]  ;;  %v1576_v46 = vld [vmem:[%s9284_s11 + $0x10] sm:$0xff] }
 0x72c   :  { %v7060_v44 = vpop.f32.mrb[8].mxu0 }
 0x72d   :  { %v1134_v45 = vpop.f32.mrb[9].mxu0 }
 0x72e   :  { %7063 = vmatprep.mubr.msk.f32.mxu0 %vm381_vm1, %v1134_v45  ;;  %v1575_v45 = vld [vmem:[%s9284_s11 + $0x8] sm:$0xff] }
 0x72f   :  { %7064 = vmatmul.mubr.msk.f32.vlgmr.msra.gmra.mrb[6].mxu0 %vm381_vm1, %v7060_v44  ;;  %v1574_v44 = vld [vmem:[%s9284_s11] sm:$0xff] }
 0x730   :  { %7546 = vmatpush3.bf16.msra.mxu0 %v7543_v42  ;;  %7077 = vmatprep.mubr.msk.f32.mxu0 %vm471_vm3, %v1339_v54  ;;  %v7563_v54 = vpack.c.bf16 %v1575_v45, %v1574_v44 }
 0x731   :  { %7080 = vmatprep.subr.mxu0 %v147_v47 }
 0x732   :  { %7564 = vmatprep.subr.bf16.mxu1 %v7563_v54 }
 0x733   :  { %7078 = vmatmul.mubr.msk.f32.vlgmr.msra.gmra.mrb[10].mxu0 %vm471_vm3, %v1340_v48 }
 0x734   :  { %7081 = vmatpush3.msra.mxu0 %v147_v47  ;;  %v1577_v47 = vld [vmem:[%s9284_s11 + $0x18] sm:$0xff] }
 0x735   :  { %v7567_v48 = vpack.c.bf16 %v1577_v47, %v1576_v46 }
 0x806   :  { %v7079_v49 = vpop.f32.mrb[10].mxu0 }
 0x807   :  { %v1419_v50 = vpop.f32.mrb[11].mxu0 }
 0x808   :  { %7082 = vmatprep.mubr.msk.f32.mxu0 %vm381_vm1, %v1419_v50  ;;  %v8643_v50 = vld [vmem:[%s9349_s27] sm:$0xff] }
 0x809   :  { %7083 = vmatmul.mubr.msk.f32.vlgmr.msra.gmra.mrb[6].mxu0 %vm381_vm1, %v7079_v49  ;;  %v8638_v49 = vld [vmem:[%s9349_s27 + $0x8] sm:$0xff] }
 0x80a   :  { %7104 = vmatprep.mubr.msk.f32.mxu0 %vm149_vm0, %v126_v28 }
 0x8dc   :  { %v7084_v52 = vpop.f32.mrb[6].mxu0 }
 0x8dd   :  { %v1518_v53 = vadd.f32 %v7084_v52, %v6493_v51  ;;  %v1500_v55 = vpop.f32.mrb[7].mxu0 }
 0x8de   :  { %v1517_v56 = vadd.f32 %v6493_v51, %v1500_v55 }
 0x8df   :  { %v1520_v57 = vadd.f32 %v1518_v53, %v8400_v13 }
 0x8e0   :  { %v1519_v58 = vadd.f32 %v1517_v56, %v8379_v5  ;;  %v1570_v5 = vld [vmem:[%s9347_s9] sm:$0xff] }
 0x8e1   :  { %v1526_v59 = vsel %vm149_vm0, %v1520_v57, 0.0  ;;  %v7555_v10 = vpack.c.bf16 %v1571_v9, %v1570_v5 }
 0x8e2   :  { %1527 = vadd.xlane.f32.xlu1 %v1526_v59  ;;  %v1523_v60 = vsel %vm149_vm0, %v1519_v58, 0.0 }
 0x8e3   :  { %1524 = vadd.xlane.f32.xlu0 %v1523_v60  ;;  %7556 = vmatprep.subr.bf16.mxu0 %v7555_v10 }
 0x8e4   :  { %7558 = vmatpush3.bf16.msra.mxu0 %v7555_v10 }
 0x8e5   :  { %7560 = vmatprep.subr.bf16.mxu0 %v7559_v12 }
 0x8e8   :  { %7562 = vmatpush3.bf16.msra.mxu0 %v7559_v12 }
 0x8eb   :  { %7105 = vmatmul.mubr.msk.f32.vlgmr.msra.gmra.mrb[12].mxu0 %vm149_vm0, %v127_v20 }
 0x96f   :  { %v1528_v61 = vpop.xlane.xlu1 %1527 }
 0x970   :  { %v1531_v62 = vmul.f32 0.03125, %v1528_v61  ;;  %v1525_v63 = vpop.xlane.xlu0 %1524 }
 0x971   :  { %v1530_v0 = vmul.f32 0.03125, %v1525_v63 }
 0x972   :  { %v1533_v1 = vsub.f32 %v1520_v57, %v1531_v62 }
 0x973   :  { %v1532_v2 = vsub.f32 %v1519_v58, %v1530_v0 }
 0x974   :  { %v1535_v8 = vmul.f32 %v1533_v1, %v1533_v1 }
 0x975   :  { %v1534_v3 = vmul.f32 %v1532_v2, %v1532_v2 }
 0x976   :  { %v1539_v13 = vsel %vm149_vm0, %v1535_v8, 0.0 }
 0x977   :  { %v1536_v4 = vsel %vm149_vm0, %v1534_v3, 0.0 }
 0x978   :  { %1537 = vadd.xlane.f32.xlu0 %v1536_v4 }
 0x97c   :  { %1540 = vadd.xlane.f32.xlu0 %v1539_v13 }
 0x9be   :  { %v7106_v38 = vpop.f32.mrb[12].mxu0 }
 0x9bf   :  { %v1736_v39 = vpop.f32.mrb[13].mxu0 }
 0x9c0   :  { %v7571_v40 = vpack.c.bf16 %v7106_v38, %v1736_v39  ;;  %v8608_v41 = vpack.i.bf16 %v7106_v38, %v1736_v39 }
 0x9c2   :  { %7573 = vmatprep.subr.msk.bf16.mxu0 %vm8422_vm2, %v7571_v40 }
 0x9c3   :  { %7576 = vmatpush3.bf16.xpose.msk.msra.mxu0 %vm8422_vm2, %v7571_v40 }
 0xa05   :  { %v1538_v21 = vpop.xlane.xlu0 %1537 }
 0xa06   :  { %v1542_v23 = vmul.f32 0.03125, %v1538_v21 }
 0xa08   :  { %v1544_v29 = vadd.f32 1e-05, %v1542_v23 }
 0xa09   :  { %v1541_v30 = vpop.xlane.xlu0 %1540 }
 0xa0a   :  { %7981 = vrsqrt.f32 %v1544_v29  ;;  %v1543_v31 = vmul.f32 0.03125, %v1541_v30 }
 0xa0c   :  { %v1545_v32 = vadd.f32 1e-05, %v1543_v31 }
 0xa0e   :  { %7983 = vrsqrt.f32 %v1545_v32 }
 0xa14   :  { %v7982_v33 = vpop.eup %7981 }
 0xa15   :  { %v1548_v25 = vmul.f32 %v7982_v33, %v1532_v2 }
 0xa17   :  { %v1556_v26 = vmul.f32 %v6494_v34, %v1548_v25 }
 0xa18   :  { %v7984_v36 = vpop.eup %7983 }
 0xa19   :  { %v1549_v24 = vmul.f32 %v7984_v36, %v1533_v1  ;;  %v8599_v7 = vadd.f32 %v6495_v35, %v1556_v26 }
 0xa1b   :  { %v1557_v37 = vmul.f32 %v6494_v34, %v1549_v24  ;;  %7093 = vmatprep.mubr.msk.f32.mxu1 %vm149_vm0, %v8599_v7 }
 0xa1d   :  { %v8603_v6 = vadd.f32 %v6495_v35, %v1557_v37 }
 0xa1f   :  { %7094 = vmatmul.mubr.msk.f32.vlgmr.msra.gmra.mrb[12].mxu1 %vm149_vm0, %v8603_v6 }
 0xa20   :  { %7115 = vmatprep.mubr.msk.f32.mxu1 %vm149_vm0, %v126_v28  ;;  %7566 = vmatpush3.bf16.msra.mxu1 %v7563_v54 }
 0xa21   :  { %7568 = vmatprep.subr.bf16.mxu1 %v7567_v48 }
 0xa24   :  { %7570 = vmatpush3.bf16.msra.mxu1 %v7567_v48 }
 0xa27   :  { %7116 = vmatmul.mubr.msk.f32.vlgmr.msra.gmra.mrb[14].mxu1 %vm149_vm0, %v127_v20 }
 0xaf2   :  { %v8614_v42 = vpop.f32.mrb[12].mxu1 }
 0xaf3   :  { %v8616_v43 = vpop.f32.mrb[13].mxu1 }
 0xaf4   :  { %7122 = vmatprep.mubr.msk.f32.mxu0 %vm381_vm1, %v8616_v43 }
 0xaf5   :  { %7123 = vmatmul.mubr.msk.f32.vlgmr.msra.gmra.mrb[14].mxu0 %vm381_vm1, %v8614_v42 }
 0xafa   :  { %v7117_v13 = vpop.f32.mrb[14].mxu1 }
 0xafb   :  { %v1811_v5 = vpop.f32.mrb[15].mxu1 }
 0xafc   :  { %v7577_v9 = vpack.c.bf16 %v7117_v13, %v1811_v5  ;;  %v8651_v10 = vpack.i.bf16 %v7117_v13, %v1811_v5 }
 0xafe   :  { %7578 = vmatprep.subr.bf16.mxu1 %v7577_v9 }
 0xaff   :  { %7580 = vmatpush3.bf16.msra.mxu1 %v7577_v9 }
 0xbc8   :  { %v7124_v51 = vpop.f32.mrb[14].mxu0 }
 0xbc9   :  { %v1898_v52 = vpop.f32.mrb[15].mxu0  ;;  %v1904_v53 = vadd.f32 %v7124_v51, %v8638_v49 }
 0xbca   :  { %v1899_v55 = vadd.f32 %v1898_v52, %v8643_v50 }
 0xbcb   :  { %v1908_v57 = vmul.f32 0.17677669, %v1904_v53 }
 0xbcc   :  { %v1907_v56 = vmul.f32 0.17677669, %v1899_v55 }
 0xbcd   :  { %v1912_v59 = vsel %vm471_vm3, %v1908_v57, -inf }
 0xbce   :  { %v1909_v58 = vsel %vm471_vm3, %v1907_v56, -inf }
 0xbcf   :  { %1910 = vmax.xlane.f32.xlu0 %v1909_v58 }
 0xbd3   :  { %1913 = vmax.xlane.f32.xlu0 %v1912_v59 }
 0xc5c   :  { %v1911_v60 = vpop.xlane.xlu0 %1910 }
 0xc5d   :  { %v1915_v61 = vsub.f32 %v1907_v56, %v1911_v60 }
 0xc5f   :  { %v1917_v62 = vmul.f32 1.442695, %v1915_v61 }
 0xc60   :  { %v1914_v63 = vpop.xlane.xlu0 %1913 }
 0xc61   :  { %7985 = vpow2.f32 %v1917_v62  ;;  %v1916_v0 = vsub.f32 %v1908_v57, %v1914_v63 }
 0xc63   :  { %v1919_v1 = vmul.f32 1.442695, %v1916_v0 }
 0xc65   :  { %7987 = vpow2.f32 %v1919_v1 }
 0xc6b   :  { %v7986_v2 = vpop.eup %7985 }
 0xc6c   :  { %v1921_v3 = vsel %vm471_vm3, %v7986_v2, 0.0 }
 0xc6d   :  { %1922 = vadd.xlane.f32.xlu0 %v1921_v3 }
 0xc6f   :  { %v7988_v4 = vpop.eup %7987 }
 0xc70   :  { %v1924_v8 = vsel %vm471_vm3, %v7988_v4, 0.0 }
 0xc71   :  { %1925 = vadd.xlane.f32.xlu1 %v1924_v8 }
 0xc82   :  { %2012 = vrot.lane.b32.xlu1 %v8616_v43, %s9317_s8 }
 0xc83   :  { %7860 = vrot.lane.b32.xlu0 %v8608_v41, %s9317_s8 }
 0xc86   :  { %2014 = vrot.lane.b32.xlu1 %v8614_v42, %s9317_s8 }
 0xc87   :  { %2378 = vrot.lane.b32.xlu0 %v8616_v43, %s9350_s2 }
 0xc8a   :  { %7865 = vrot.lane.b32.xlu1 %v8608_v41, %s9350_s2 }
 0xc8e   :  { %2380 = vrot.lane.b32.xlu1 %v8614_v42, %s9350_s2 }
 0xcfa   :  { %v1923_v11 = vpop.xlane.xlu0 %1922 }
 0xcfb   :  { %7989 = vrcp.f32 %v1923_v11 }
 0xcfe   :  { %v1926_v27 = vpop.xlane.xlu1 %1925  ;;  %v7861_v28 = vpop.permute.xlu0 %7860 }
 0xcff   :  { %7991 = vrcp.f32 %v1926_v27  ;;  %v7863_v12 = vunpack.i.h.bf16 %v7861_v28  ;;  %v7862_v14 = vunpack.i.l.bf16 %v7861_v28 }
 0xd01   :  { %v7581_v15 = vpack.c.bf16 %v7863_v12, %v7862_v14 }
 0xd02   :  { %v2013_v16 = vpop.permute.xlu1 %2012  ;;  %v2379_v32 = vpop.permute.xlu0 %2378 }
 0xd03   :  { %7583 = vmatprep.subr.msk.bf16.mxu1 %vm8422_vm2, %v7581_v15 }
 0xd05   :  { %v7990_v17 = vpop.eup %7989 }
 0xd06   :  { %v2015_v18 = vpop.permute.xlu1 %2014  ;;  %v1929_v19 = vmul.f32 %v7990_v17, %v7986_v2 }
 0xd08   :  { %7129 = vmatprep.mubr.msk.f32.mxu1 %vm471_vm3, %v1929_v19 }
 0xd09   :  { %v7992_v20 = vpop.eup %7991 }
 0xd0a   :  { %v7866_v21 = vpop.permute.xlu1 %7865  ;;  %v1930_v23 = vmul.f32 %v7992_v20, %v7988_v4 }
 0xd0b   :  { %v7868_v29 = vunpack.i.h.bf16 %v7866_v21  ;;  %v7867_v30 = vunpack.i.l.bf16 %v7866_v21 }
 0xd0c   :  { %7130 = vmatmul.mubr.msk.f32.vlgmr.msra.gmra.mrb[16].mxu1 %vm471_vm3, %v1930_v23 }
 0xd0d   :  { %v7591_v31 = vpack.c.bf16 %v7868_v29, %v7867_v30  ;;  %7586 = vmatpush3.bf16.xpose.msk.msra.mxu1 %vm8422_vm2, %v7581_v15  ;;  %7136 = vmatprep.mubr.msk.f32.mxu1 %vm381_vm1, %v2013_v16 }
 0xd0e   :  { %v2381_v33 = vpop.permute.xlu1 %2380 }
 0xd0f   :  { %7593 = vmatprep.subr.msk.bf16.mxu1 %vm8422_vm2, %v7591_v31 }
 0xd14   :  { %7137 = vmatmul.mubr.msk.f32.vlgmr.msra.gmra.mrb[18].mxu1 %vm381_vm1, %v2015_v18 }
 0xd15   :  { %7596 = vmatpush3.bf16.xpose.msk.msra.mxu1 %vm8422_vm2, %v7591_v31  ;;  %7160 = vmatprep.mubr.msk.f32.mxu1 %vm381_vm1, %v2379_v32 }
 0xd1c   :  { %7161 = vmatmul.mubr.msk.f32.vlgmr.msra.gmra.mrb[20].mxu1 %vm381_vm1, %v2381_v33 }
 0xddf   :  { %v8679_v34 = vpop.f32.mrb[16].mxu1 }
 0xde0   :  { %v8681_v25 = vpop.f32.mrb[17].mxu1 }
 0xde7   :  { %v7138_v35 = vpop.f32.mrb[18].mxu1 }
 0xde8   :  { %v2100_v26 = vadd.f32 %v7138_v35, %v8638_v49  ;;  %v2094_v36 = vpop.f32.mrb[19].mxu1 }
 0xde9   :  { %v2095_v24 = vadd.f32 %v2094_v36, %v8643_v50 }
 0xdea   :  { %v2104_v37 = vmul.f32 0.17677669, %v2100_v26 }
 0xdeb   :  { %v2103_v38 = vmul.f32 0.17677669, %v2095_v24 }
 0xdec   :  { %v2108_v39 = vsel %vm471_vm3, %v2104_v37, -inf }
 0xded   :  { %2109 = vmax.xlane.f32.xlu1 %v2108_v39  ;;  %v2105_v40 = vsel %vm471_vm3, %v2103_v38, -inf }
 0xdee   :  { %2106 = vmax.xlane.f32.xlu0 %v2105_v40 }
 0xdef   :  { %v7162_v44 = vpop.f32.mrb[20].mxu1 }
 0xdf0   :  { %v2460_v45 = vpop.f32.mrb[21].mxu1  ;;  %v2466_v46 = vadd.f32 %v7162_v44, %v8638_v49 }
 0xdf1   :  { %v2461_v3 = vadd.f32 %v2460_v45, %v8643_v50 }
 0xdf2   :  { %v2470_v54 = vmul.f32 0.17677669, %v2466_v46 }
 0xdf3   :  { %v2469_v4 = vmul.f32 0.17677669, %v2461_v3 }
 0xdf4   :  { %v2474_v47 = vsel %vm471_vm3, %v2470_v54, -inf }
 0xdf5   :  { %v2471_v8 = vsel %vm471_vm3, %v2469_v4, -inf }
 0xdfe   :  { %7875 = vrot.lane.b32.xlu1 %v8608_v41, %s9351_s28 }
 0xe02   :  { %2663 = vrot.lane.b32.xlu1 %v8616_v43, %s9351_s28 }
 0xe06   :  { %2665 = vrot.lane.b32.xlu1 %v8614_v42, %s9351_s28 }
 0xe2a   :  { %2475 = vmax.xlane.f32.xlu1 %v2474_v47 }
 0xe7a   :  { %v2110_v48 = vpop.xlane.xlu1 %2109 }
 0xe7b   :  { %v2112_v51 = vsub.f32 %v2104_v37, %v2110_v48  ;;  %v2107_v52 = vpop.xlane.xlu0 %2106 }
 0xe7c   :  { %v2111_v53 = vsub.f32 %v2103_v38, %v2107_v52 }
 0xe7d   :  { %v2115_v55 = vmul.f32 1.442695, %v2112_v51 }
 0xe7e   :  { %v2113_v56 = vmul.f32 1.442695, %v2111_v53  ;;  %v7876_v57 = vpop.permute.xlu1 %7875 }
 0xe7f   :  { %7993 = vpow2.f32 %v2115_v55  ;;  %v7878_v41 = vunpack.i.h.bf16 %v7876_v57  ;;  %v7877_v58 = vunpack.i.l.bf16 %v7876_v57 }
 0xe80   :  { %7995 = vpow2.f32 %v2113_v56 }
 0xe81   :  { %v7601_v43 = vpack.c.bf16 %v7878_v41, %v7877_v58 }
 0xe82   :  { %v2664_v59 = vpop.permute.xlu1 %2663 }
 0xe83   :  { %7603 = vmatprep.subr.msk.bf16.mxu1 %vm8422_vm2, %v7601_v43  ;;  %7179 = vmatprep.mubr.msk.f32.mxu1 %vm381_vm1, %v2664_v59 }
 0xe84   :  { %7606 = vmatpush3.bf16.xpose.msk.msra.mxu1 %vm8422_vm2, %v7601_v43 }
 0xe86   :  { %v2666_v60 = vpop.permute.xlu1 %2665 }
 0xe89   :  { %v7994_v42 = vpop.eup %7993 }
 0xe8a   :  { %v2120_v61 = vsel %vm471_vm3, %v7994_v42, 0.0  ;;  %v7996_v62 = vpop.eup %7995 }
 0xe8b   :  { %7180 = vmatmul.mubr.msk.f32.vlgmr.msra.gmra.mrb[22].mxu1 %vm381_vm1, %v2666_v60  ;;  %2121 = vadd.xlane.f32.xlu0 %v2120_v61  ;;  %v2117_v63 = vsel %vm471_vm3, %v7996_v62, 0.0 }
 0xe8f   :  { %2118 = vadd.xlane.f32.xlu0 %v2117_v63 }
 0xea5   :  { %7870 = vrot.lane.b32.xlu0 %v8651_v10, %s9317_s8 }
 0xeb7   :  { %v2476_v0 = vpop.xlane.xlu1 %2475 }
 0xeb8   :  { %v2478_v1 = vsub.f32 %v2470_v54, %v2476_v0 }
 0xeba   :  { %v2481_v2 = vmul.f32 1.442695, %v2478_v1 }
 0xebc   :  { %7997 = vpow2.f32 %v2481_v2 }
 0xec4   :  { %2472 = vmax.xlane.f32.xlu0 %v2471_v8 }
 0xec6   :  { %v8707_v13 = vpop.eup %7997 }
 0xec7   :  { %v2486_v5 = vsel %vm471_vm3, %v8707_v13, 0.0 }
 0xec8   :  { %2487 = vadd.xlane.f32.xlu0 %v2486_v5 }
 0xf18   :  { %v2122_v9 = vpop.xlane.xlu0 %2121 }
 0xf19   :  { %7999 = vrcp.f32 %v2122_v9 }
 0xf1c   :  { %v2119_v11 = vpop.xlane.xlu0 %2118 }
 0xf1d   :  { %8001 = vrcp.f32 %v2119_v11 }
 0xf20   :  { %v7871_v27 = vpop.permute.xlu0 %7870 }
 0xf21   :  { %v7873_v28 = vunpack.i.h.bf16 %v7871_v27  ;;  %v7872_v12 = vunpack.i.l.bf16 %v7871_v27  ;;  %v6534_v27 = vld [vmem:[%s9286_s13] ss:$0 sm:$0xff] }
 0xf23   :  { %v7587_v14 = vpack.c.bf16 %v7873_v28, %v7872_v12  ;;  %v8000_v15 = vpop.eup %7999 }
 0xf24   :  { %v2126_v18 = vmul.f32 %v8000_v15, %v7994_v42 }
 0xf25   :  { %7588 = vmatprep.subr.bf16.mxu0 %v7587_v14 }
 0xf26   :  { %7590 = vmatpush3.bf16.msra.mxu0 %v7587_v14 }
 0xf27   :  { %v8002_v16 = vpop.eup %8001 }
 0xf28   :  { %v2125_v17 = vmul.f32 %v8002_v16, %v7996_v62 }
 0xf2a   :  { %7143 = vmatprep.mubr.msk.f32.mxu0 %vm471_vm3, %v2125_v17 }
 0xf2b   :  { %7144 = vmatmul.mubr.msk.f32.vlgmr.msra.gmra.mrb[16].mxu0 %vm471_vm3, %v2126_v18 }
 0xf51   :  { %v2473_v19 = vpop.xlane.xlu0 %2472 }
 0xf52   :  { %v2477_v20 = vsub.f32 %v2469_v4, %v2473_v19 }
 0xf54   :  { %v2479_v21 = vmul.f32 1.442695, %v2477_v20 }
 0xf55   :  { %v2488_v37 = vpop.xlane.xlu0 %2487 }
 0xf56   :  { %8003 = vpow2.f32 %v2479_v21 }
 0xf5e   :  { %v7181_v23 = vpop.f32.mrb[22].mxu1 }
 0xf5f   :  { %v2745_v29 = vpop.f32.mrb[23].mxu1  ;;  %v2751_v31 = vadd.f32 %v7181_v23, %v8638_v49  ;;  %v1579_v49 = vld [vmem:[%s9285_s12 + $0x8] sm:$0xff] }
 0xf60   :  { %v8004_v30 = vpop.eup %8003  ;;  %v2746_v32 = vadd.f32 %v2745_v29, %v8643_v50  ;;  %7146 = vmatprep.subr.mxu0 %v1579_v49  ;;  %v1578_v50 = vld [vmem:[%s9285_s12] sm:$0xff] }
 0xf61   :  { %v2483_v33 = vsel %vm471_vm3, %v8004_v30, 0.0  ;;  %v2755_v26 = vmul.f32 0.17677669, %v2751_v31  ;;  %7147 = vmatpush3.msra.mxu0 %v1579_v49  ;;  %v3005_v49 = vld [vmem:[%s9293_s20 + $0x18] sm:$0xff] }
 0xf62   :  { %v2754_v35 = vmul.f32 0.17677669, %v2746_v32  ;;  %2484 = vadd.xlane.f32.xlu0 %v2483_v33  ;;  %7151 = vmatprep.subr.mxu0 %v1578_v50 }
 0xf63   :  { %v2759_v24 = vsel %vm471_vm3, %v2755_v26, -inf }
 0xf64   :  { %v2756_v36 = vsel %vm471_vm3, %v2754_v35, -inf }
 0xf65   :  { %2757 = vmax.xlane.f32.xlu1 %v2756_v36 }
 0xf69   :  { %2760 = vmax.xlane.f32.xlu1 %v2759_v24  ;;  %v3004_v24 = vld [vmem:[%s9293_s20 + $0x10] sm:$0xff] }
 0xf78   :  { %7880 = vrot.lane.b32.xlu0 %v8651_v10, %s9350_s2 }
 0xfef   :  { %v2485_v39 = vpop.xlane.xlu0 %2484 }
 0xff0   :  { %8005 = vrcp.f32 %v2485_v39  ;;  %v3098_v39 = vld [vmem:[%s9295_s22 + $0x10] sm:$0xff] }
 0xff2   :  { %v2758_v38 = vpop.xlane.xlu1 %2757 }
 0xff3   :  { %v2762_v40 = vsub.f32 %v2754_v35, %v2758_v38  ;;  %v7881_v47 = vpop.permute.xlu0 %7880  ;;  %v3097_v38 = vld [vmem:[%s9295_s22 + $0x8] sm:$0xff] }
 0xff4   :  { %v7883_v48 = vunpack.i.h.bf16 %v7881_v47  ;;  %v7882_v51 = vunpack.i.l.bf16 %v7881_v47 }
 0xff5   :  { %v2764_v46 = vmul.f32 1.442695, %v2762_v40 }
 0xff6   :  { %v2761_v44 = vpop.xlane.xlu1 %2760  ;;  %v7597_v55 = vpack.c.bf16 %v7883_v48, %v7882_v51 }
 0xff7   :  { %v2763_v45 = vsub.f32 %v2755_v26, %v2761_v44  ;;  %v3003_v26 = vld [vmem:[%s9293_s20 + $0x8] sm:$0xff]  ;;  %v3099_v44 = vld [vmem:[%s9295_s22 + $0x18] sm:$0xff] }
 0xff9   :  { %v2766_v54 = vmul.f32 1.442695, %v2763_v45  ;;  %v7623_v45 = vpack.c.bf16 %v3099_v44, %v3098_v39  ;;  %v6550_v44 = vld [vmem:[%s9338_s6 + $0x28] sm:$0xff] }
 0xffa   :  { %v8006_v56 = vpop.eup %8005 }
 0xffb   :  { %8007 = vpow2.f32 %v2766_v54  ;;  %v2491_v59 = vmul.f32 %v8006_v56, %v8004_v30  ;;  %v3101_v54 = vld [vmem:[%s9295_s22 + $0x28] sm:$0xff] }
 0xffc   :  { %8009 = vpow2.f32 %v2764_v46  ;;  %v3100_v46 = vld [vmem:[%s9295_s22 + $0x20] sm:$0xff] }
 0xffd   :  { %8011 = vrcp.f32 %v2488_v37  ;;  %v3096_v37 = vld [vmem:[%s9295_s22] sm:$0xff]  ;;  %v7627_v47 = vpack.c.bf16 %v3101_v54, %v3100_v46 }
 0xffe   :  { %v7145_v52 = vpop.f32.mrb[16].mxu0  ;;  %v7619_v40 = vpack.c.bf16 %v3097_v38, %v3096_v37  ;;  %v6555_v37 = vld [vmem:[%s9341_s23 + $0x30] sm:$0xff]  ;;  %v6556_v38 = vld [vmem:[%s9341_s23 + $0x38] sm:$0xff] }
 0xfff   :  { %v2207_v53 = vpop.f32.mrb[17].mxu0  ;;  %v7655_v39 = vpack.c.bf16 %v6556_v38, %v6555_v37 }
0x1000   :  { %7148 = vmatprep.mubr.msk.f32.mxu0 %vm381_vm1, %v2207_v53 }
0x1001   :  { %7149 = vmatmul.mubr.msk.f32.vlgmr.msra.gmra.mrb[18].mxu0 %vm381_vm1, %v7145_v52 }
0x1002   :  { %7152 = vmatpush3.msra.mxu0 %v1578_v50  ;;  %7153 = vmatprep.mubr.msk.f32.mxu0 %vm381_vm1, %v8681_v25  ;;  %v1580_v25 = vld [vmem:[%s9285_s12 + $0x10] sm:$0xff]  ;;  %v7615_v50 = vpack.c.bf16 %v3005_v49, %v3004_v24  ;;  %v6548_v49 = vld [vmem:[%s9340_s30 + $0x38] sm:$0xff] }
0x1003   :  { %7598 = vmatprep.subr.bf16.mxu0 %v7597_v55  ;;  %v6547_v24 = vld [vmem:[%s9340_s30 + $0x30] sm:$0xff] }
0x1005   :  { %v8008_v57 = vpop.eup %8007 }
0x1006   :  { %v2771_v41 = vsel %vm471_vm3, %v8008_v57, 0.0  ;;  %v8010_v58 = vpop.eup %8009 }
0x1007   :  { %2772 = vadd.xlane.f32.xlu1 %v2771_v41  ;;  %v8012_v43 = vpop.eup %8011  ;;  %v2768_v42 = vsel %vm471_vm3, %v8010_v58, 0.0  ;;  %v6535_v41 = vld [vmem:[%s9289_s16] ss:$0 sm:$0xff] }
0x1008   :  { %v2492_v60 = vmul.f32 %v8012_v43, %v8707_v13  ;;  %v1581_v13 = vld [vmem:[%s9285_s12 + $0x18] sm:$0xff]  ;;  %v6536_v43 = vld [vmem:[%s9290_s17] ss:$0 sm:$0xff] }
0x1009   :  { %7154 = vmatmul.mubr.msk.f32.vlgmr.msra.gmra.mrb[18].mxu0 %vm381_vm1, %v8679_v34 }
0x100a   :  { %7600 = vmatpush3.bf16.msra.mxu0 %v7597_v55  ;;  %7167 = vmatprep.mubr.msk.f32.mxu0 %vm471_vm3, %v2491_v59 }
0x100b   :  { %2769 = vadd.xlane.f32.xlu1 %v2768_v42  ;;  %7170 = vmatprep.subr.mxu0 %v1580_v25 }
0x100d   :  { %7168 = vmatmul.mubr.msk.f32.vlgmr.msra.gmra.mrb[20].mxu0 %vm471_vm3, %v2492_v60 }
0x100e   :  { %7171 = vmatpush3.msra.mxu0 %v1580_v25 }
0x101c   :  { %7885 = vrot.lane.b32.xlu1 %v8651_v10, %s9351_s28 }
0x1094   :  { %v2773_v34 = vpop.xlane.xlu1 %2772 }
0x1098   :  { %v2770_v61 = vpop.xlane.xlu1 %2769 }
0x1099   :  { %8013 = vrcp.f32 %v2770_v61 }
0x109a   :  { %8015 = vrcp.f32 %v2773_v34 }
0x109c   :  { %v7886_v62 = vpop.permute.xlu1 %7885 }
0x109d   :  { %v7888_v63 = vunpack.i.h.bf16 %v7886_v62  ;;  %v7887_v0 = vunpack.i.l.bf16 %v7886_v62  ;;  %v3102_v62 = vld [vmem:[%s9295_s22 + $0x30] sm:$0xff] }
0x109f   :  { %v7607_v1 = vpack.c.bf16 %v7888_v63, %v7887_v0  ;;  %v3103_v63 = vld [vmem:[%s9295_s22 + $0x38] sm:$0xff] }
0x10a0   :  { %v7631_v0 = vpack.c.bf16 %v3103_v63, %v3102_v62 }
0x10a1   :  { %7608 = vmatprep.subr.bf16.mxu0 %v7607_v1 }
0x10a3   :  { %v8014_v2 = vpop.eup %8013 }
0x10a4   :  { %v8016_v8 = vpop.eup %8015  ;;  %v2776_v10 = vmul.f32 %v8014_v2, %v8010_v58 }
0x10a5   :  { %v2777_v5 = vmul.f32 %v8016_v8, %v8008_v57 }
0x10e0   :  { %v7169_v3 = vpop.f32.mrb[20].mxu0 }
0x10e1   :  { %v2571_v4 = vpop.f32.mrb[21].mxu0 }
0x10e2   :  { %7172 = vmatprep.mubr.msk.f32.mxu0 %vm381_vm1, %v2571_v4 }
0x10e3   :  { %7173 = vmatmul.mubr.msk.f32.vlgmr.msra.gmra.mrb[18].mxu0 %vm381_vm1, %v7169_v3 }
0x10e4   :  { %7610 = vmatpush3.bf16.msra.mxu0 %v7607_v1  ;;  %7186 = vmatprep.mubr.msk.f32.mxu0 %vm471_vm3, %v2776_v10  ;;  %v6537_v1 = vld [vmem:[#allocation4] ss:$0 sm:$0xff] }
0x10e5   :  { %7189 = vmatprep.subr.mxu0 %v1581_v13 }
0x10e7   :  { %7187 = vmatmul.mubr.msk.f32.vlgmr.msra.gmra.mrb[22].mxu0 %vm471_vm3, %v2777_v5  ;;  %v6540_v5 = vld [vmem:[#allocation6] ss:$0 sm:$0xff] }
0x10e8   :  { %7190 = vmatpush3.msra.mxu0 %v1581_v13 }
0x10e9   :  { %7620 = vmatprep.subr.bf16.mxu0 %v7619_v40 }
0x11ba   :  { %v7188_v9 = vpop.f32.mrb[22].mxu0 }
0x11bb   :  { %v2856_v11 = vpop.f32.mrb[23].mxu0 }
0x11bc   :  { %7191 = vmatprep.mubr.msk.f32.mxu0 %vm381_vm1, %v2856_v11 }
0x11bd   :  { %7192 = vmatmul.mubr.msk.f32.vlgmr.msra.gmra.mrb[18].mxu0 %vm381_vm1, %v7188_v9 }
0x11be   :  { %7622 = vmatpush3.bf16.msra.mxu0 %v7619_v40  ;;  %v6549_v40 = vld [vmem:[%s9338_s6 + $0x20] sm:$0xff] }
0x11bf   :  { %7624 = vmatprep.subr.bf16.mxu0 %v7623_v45 }
0x11c2   :  { %7626 = vmatpush3.bf16.msra.mxu0 %v7623_v45  ;;  %v7643_v45 = vpack.c.bf16 %v6550_v44, %v6549_v40 }
0x11c3   :  { %7628 = vmatprep.subr.bf16.mxu0 %v7627_v47 }
0x11c6   :  { %7630 = vmatpush3.bf16.msra.mxu0 %v7627_v47 }
0x11c7   :  { %7632 = vmatprep.subr.bf16.mxu0 %v7631_v0 }
0x11ca   :  { %7634 = vmatpush3.bf16.msra.mxu0 %v7631_v0 }
0x1290   :  { %v7193_v28 = vpop.f32.mrb[18].mxu0 }
0x1291   :  { %v2955_v12 = vadd.f32 %v7193_v28, %v6534_v27  ;;  %v2937_v14 = vpop.f32.mrb[19].mxu0 }
0x1292   :  { %v2954_v15 = vadd.f32 %v6534_v27, %v2937_v14 }
0x1293   :  { %v2957_v16 = vadd.f32 %v2955_v12, %v8603_v6 }
0x1294   :  { %v2956_v17 = vadd.f32 %v2954_v15, %v8599_v7  ;;  %v3002_v7 = vld [vmem:[%s9293_s20] sm:$0xff] }
0x1295   :  { %v2963_v18 = vsel %vm149_vm0, %v2957_v16, 0.0  ;;  %v7611_v36 = vpack.c.bf16 %v3003_v26, %v3002_v7  ;;  %v6553_v7 = vld [vmem:[%s9341_s23 + $0x20] sm:$0xff]  ;;  %v6554_v26 = vld [vmem:[%s9341_s23 + $0x28] sm:$0xff] }
0x1296   :  { %2964 = vadd.xlane.f32.xlu1 %v2963_v18  ;;  %v2960_v19 = vsel %vm149_vm0, %v2956_v17, 0.0 }
0x1297   :  { %2961 = vadd.xlane.f32.xlu0 %v2960_v19  ;;  %7612 = vmatprep.subr.bf16.mxu1 %v7611_v36 }
0x1298   :  { %7614 = vmatpush3.bf16.msra.mxu1 %v7611_v36  ;;  %v7651_v36 = vpack.c.bf16 %v6554_v26, %v6553_v7 }
0x1299   :  { %7616 = vmatprep.subr.bf16.mxu1 %v7615_v50 }
0x129a   :  { %7652 = vmatprep.subr.bf16.mxu0 %v7651_v36 }
0x129c   :  { %7618 = vmatpush3.bf16.msra.mxu1 %v7615_v50  ;;  %v7639_v50 = vpack.c.bf16 %v6548_v49, %v6547_v24 }
0x1323   :  { %v2965_v20 = vpop.xlane.xlu1 %2964 }
0x1324   :  { %v2967_v21 = vmul.f32 0.03125, %v2965_v20  ;;  %v2962_v23 = vpop.xlane.xlu0 %2961 }
0x1325   :  { %v2966_v29 = vmul.f32 0.03125, %v2962_v23 }
0x1326   :  { %v2969_v30 = vsub.f32 %v2957_v16, %v2967_v21 }
0x1327   :  { %v2968_v31 = vsub.f32 %v2956_v17, %v2966_v29 }
0x1328   :  { %v2971_v35 = vmul.f32 %v2969_v30, %v2969_v30 }
0x1329   :  { %v2970_v32 = vmul.f32 %v2968_v31, %v2968_v31 }
0x132a   :  { %v2975_v6 = vsel %vm149_vm0, %v2971_v35, 0.0  ;;  %v6546_v35 = vld [vmem:[%s9340_s30 + $0x28] sm:$0xff] }
0x132b   :  { %v2972_v33 = vsel %vm149_vm0, %v2970_v32, 0.0 }
0x132c   :  { %2973 = vadd.xlane.f32.xlu0 %v2972_v33  ;;  %v6545_v33 = vld [vmem:[%s9340_s30 + $0x20] sm:$0xff] }
0x1330   :  { %2976 = vadd.xlane.f32.xlu0 %v2975_v6  ;;  %v7635_v6 = vpack.c.bf16 %v6546_v35, %v6545_v33 }
0x1332   :  { %7636 = vmatprep.subr.bf16.mxu1 %v7635_v6 }
0x13b9   :  { %v2974_v48 = vpop.xlane.xlu0 %2973 }
0x13ba   :  { %v2978_v51 = vmul.f32 0.03125, %v2974_v48 }
0x13bc   :  { %v2980_v52 = vadd.f32 1e-05, %v2978_v51 }
0x13bd   :  { %v2977_v53 = vpop.xlane.xlu0 %2976 }
0x13be   :  { %8017 = vrsqrt.f32 %v2980_v52  ;;  %v2979_v55 = vmul.f32 0.03125, %v2977_v53 }
0x13c0   :  { %v2981_v56 = vadd.f32 1e-05, %v2979_v55  ;;  %v6543_v55 = vld [vmem:[%s9291_s18] ss:$0 sm:$0xff] }
0x13c2   :  { %8019 = vrsqrt.f32 %v2981_v56 }
0x13c8   :  { %v8018_v57 = vpop.eup %8017 }
0x13c9   :  { %v2984_v58 = vmul.f32 %v8018_v57, %v2968_v31  ;;  %v6544_v57 = vld [vmem:[%s9292_s19] ss:$0 sm:$0xff] }
0x13cb   :  { %v2992_v59 = vmul.f32 %v6535_v41, %v2984_v58 }
0x13cc   :  { %v8020_v42 = vpop.eup %8019 }
0x13cd   :  { %v2985_v60 = vmul.f32 %v8020_v42, %v2969_v30  ;;  %v3000_v25 = vadd.f32 %v6536_v43, %v2992_v59  ;;  %v6551_v42 = vld [vmem:[%s9338_s6 + $0x30] sm:$0xff] }
0x13cf   :  { %v2993_v34 = vmul.f32 %v6535_v41, %v2985_v60  ;;  %7202 = vmatprep.mubr.msk.f32.mxu1 %vm149_vm0, %v3000_v25  ;;  %v6552_v60 = vld [vmem:[%s9338_s6 + $0x38] sm:$0xff]  ;;  %s9352_s6 = smov 120  }
0x13d1   :  { %v3001_v61 = vadd.f32 %v6536_v43, %v2993_v34 }
0x13d3   :  { %7203 = vmatmul.mubr.msk.f32.vlgmr.msra.gmra.mrb[24].mxu1 %vm149_vm0, %v3001_v61 }
0x13d4   :  { %7638 = vmatpush3.bf16.msra.mxu1 %v7635_v6 }
0x13d5   :  { %7640 = vmatprep.subr.bf16.mxu1 %v7639_v50 }
0x13d8   :  { %7642 = vmatpush3.bf16.msra.mxu1 %v7639_v50 }
0x13d9   :  { %7644 = vmatprep.subr.bf16.mxu1 %v7643_v45 }
0x14a6   :  { %v7204_v2 = vpop.f32.mrb[24].mxu1 }
0x14a7   :  { %v3091_v3 = vadd.f32 %v7204_v2, %v6537_v1  ;;  %v3085_v4 = vpop.f32.mrb[25].mxu1 }
0x14a8   :  { %v3086_v8 = vadd.f32 %v6537_v1, %v3085_v4 }
0x14a9   :  { %v3095_v13 = vmax.f32 %v3091_v3, 0.0 }
0x14aa   :  { %v3094_v10 = vmax.f32 %v3086_v8, 0.0 }
0x14ac   :  { %7221 = vmatprep.mubr.msk.f32.mxu0 %vm3111_vm4, %v3094_v10 }
0x14ad   :  { %7222 = vmatmul.mubr.msk.f32.vlgmr.msra.gmra.mrb[24].mxu0 %vm3111_vm4, %v3095_v13 }
0x14ae   :  { %7654 = vmatpush3.bf16.msra.mxu0 %v7651_v36 }
0x14af   :  { %7656 = vmatprep.subr.bf16.mxu0 %v7655_v39 }
0x14b2   :  { %7658 = vmatpush3.bf16.msra.mxu0 %v7655_v39 }
0x1580   :  { %v7223_v9 = vpop.f32.mrb[24].mxu0 }
0x1581   :  { %v3184_v11 = vpop.f32.mrb[25].mxu0  ;;  %v3190_v27 = vadd.f32 %v7223_v9, %v6540_v5 }
0x1582   :  { %v3185_v28 = vadd.f32 %v6540_v5, %v3184_v11 }
0x1583   :  { %v3194_v15 = vadd.f32 %v3190_v27, %v3001_v61  ;;  %v7647_v61 = vpack.c.bf16 %v6552_v60, %v6551_v42 }
0x1584   :  { %v3193_v12 = vadd.f32 %v3185_v28, %v3000_v25 }
0x1585   :  { %v3200_v16 = vsel %vm149_vm0, %v3194_v15, 0.0 }
0x1586   :  { %v3197_v14 = vsel %vm149_vm0, %v3193_v12, 0.0 }
0x1587   :  { %3198 = vadd.xlane.f32.xlu0 %v3197_v14 }
0x158b   :  { %3201 = vadd.xlane.f32.xlu0 %v3200_v16 }
0x1614   :  { %v3199_v17 = vpop.xlane.xlu0 %3198 }
0x1615   :  { %v3203_v18 = vmul.f32 0.03125, %v3199_v17 }
0x1617   :  { %v3205_v19 = vsub.f32 %v3193_v12, %v3203_v18 }
0x1618   :  { %v3202_v20 = vpop.xlane.xlu0 %3201 }
0x1619   :  { %v3204_v21 = vmul.f32 0.03125, %v3202_v20  ;;  %v3207_v23 = vmul.f32 %v3205_v19, %v3205_v19 }
0x161b   :  { %v3206_v29 = vsub.f32 %v3194_v15, %v3204_v21  ;;  %v3209_v30 = vsel %vm149_vm0, %v3207_v23, 0.0  ;;  %v8911_v21 = vld [vmem:[%s9344_s10 + $0x8] sm:$0xff] }
0x161c   :  { %3210 = vadd.xlane.f32.xlu0 %v3209_v30  ;;  %v8917_v30 = vld [vmem:[%s9344_s10] sm:$0xff] }
0x161d   :  { %v3208_v31 = vmul.f32 %v3206_v29, %v3206_v29 }
0x161f   :  { %v3212_v32 = vsel %vm149_vm0, %v3208_v31, 0.0 }
0x1620   :  { %3213 = vadd.xlane.f32.xlu1 %v3212_v32 }
0x16a9   :  { %v3211_v46 = vpop.xlane.xlu0 %3210 }
0x16aa   :  { %v3215_v54 = vmul.f32 0.03125, %v3211_v46 }
0x16ac   :  { %v3217_v47 = vadd.f32 1e-05, %v3215_v54 }
0x16ad   :  { %v3214_v48 = vpop.xlane.xlu1 %3213 }
0x16ae   :  { %8021 = vrsqrt.f32 %v3217_v47  ;;  %v3216_v51 = vmul.f32 0.03125, %v3214_v48 }
0x16b0   :  { %v3218_v52 = vadd.f32 1e-05, %v3216_v51 }
0x16b2   :  { %8023 = vrsqrt.f32 %v3218_v52 }
0x16b8   :  { %v8022_v53 = vpop.eup %8021 }
0x16b9   :  { %v3221_v56 = vmul.f32 %v8022_v53, %v3205_v19 }
0x16bb   :  { %v3229_v41 = vmul.f32 %v6543_v55, %v3221_v56 }
0x16bc   :  { %v8024_v58 = vpop.eup %8023 }
0x16bd   :  { %v3222_v43 = vmul.f32 %v8024_v58, %v3206_v29  ;;  %v8846_v59 = vadd.f32 %v6544_v57, %v3229_v41 }
0x16bf   :  { %v3230_v25 = vmul.f32 %v6543_v55, %v3222_v43  ;;  %7232 = vmatprep.mubr.msk.f32.mxu1 %vm149_vm0, %v8846_v59  ;;  %7254 = vmatprep.mubr.msk.f32.mxu0 %vm149_vm0, %v8846_v59 }
0x16c1   :  { %v8858_v34 = vadd.f32 %v6544_v57, %v3230_v25 }
0x16c3   :  { %7233 = vmatmul.mubr.msk.f32.vlgmr.msra.gmra.mrb[26].mxu1 %vm149_vm0, %v8858_v34  ;;  %7255 = vmatmul.mubr.msk.f32.vlgmr.msra.gmra.mrb[26].mxu0 %vm149_vm0, %v8858_v34 }
0x16c4   :  { %7646 = vmatpush3.bf16.msra.mxu1 %v7643_v45  ;;  %7243 = vmatprep.mubr.msk.f32.mxu1 %vm149_vm0, %v8846_v59 }
0x16c5   :  { %7648 = vmatprep.subr.bf16.mxu1 %v7647_v61 }
0x16c8   :  { %7650 = vmatpush3.bf16.msra.mxu1 %v7647_v61 }
0x16cb   :  { %7244 = vmatmul.mubr.msk.f32.vlgmr.msra.gmra.mrb[28].mxu1 %vm149_vm0, %v8858_v34 }
0x1796   :  { %v8868_v62 = vpop.f32.mrb[26].mxu1  ;;  %v7256_v63 = vpop.f32.mrb[26].mxu0 }
0x1797   :  { %v8870_v0 = vpop.f32.mrb[27].mxu1  ;;  %v3483_v1 = vpop.f32.mrb[27].mxu0 }
0x1798   :  { %v8872_v2 = vpack.i.bf16 %v7256_v63, %v3483_v1  ;;  %3684 = vrot.lane.b32.xlu1 %v8870_v0, %s9352_s6  ;;  %7261 = vmatprep.mubr.msk.f32.mxu1 %vm381_vm1, %v8870_v0  ;;  %v7665_v3 = vpack.c.bf16 %v7256_v63, %v3483_v1 }
0x179a   :  { %7666 = vmatprep.subr.bf16.mxu0 %v7665_v3 }
0x179b   :  { %7668 = vmatpush3.bf16.msra.mxu0 %v7665_v3 }
0x179c   :  { %3686 = vrot.lane.b32.xlu1 %v8868_v62, %s9352_s6 }
0x179e   :  { %v7245_v4 = vpop.f32.mrb[28].mxu1 }
0x179f   :  { %v3408_v8 = vpop.f32.mrb[29].mxu1 }
0x17a0   :  { %v7659_v10 = vpack.c.bf16 %v7245_v4, %v3408_v8  ;;  %v8880_v13 = vpack.i.bf16 %v7245_v4, %v3408_v8 }
0x17a2   :  { %7895 = vrot.lane.b32.xlu1 %v8880_v13, %s9350_s2  ;;  %7890 = vrot.lane.b32.xlu0 %v8880_v13, %s9352_s6 }
0x17a3   :  { %7661 = vmatprep.subr.msk.bf16.mxu1 %vm8422_vm2, %v7659_v10 }
0x17a4   :  { %7664 = vmatpush3.bf16.xpose.msk.msra.mxu1 %vm8422_vm2, %v7659_v10 }
0x17a6   :  { %4052 = vrot.lane.b32.xlu1 %v8868_v62, %s9350_s2  ;;  %4050 = vrot.lane.b32.xlu0 %v8870_v0, %s9350_s2 }
0x17ab   :  { %7262 = vmatmul.mubr.msk.f32.vlgmr.msra.gmra.mrb[30].mxu1 %vm381_vm1, %v8868_v62 }
0x180a   :  { %v3685_v5 = vpop.permute.xlu1 %3684 }
0x180b   :  { %7275 = vmatprep.mubr.msk.f32.mxu1 %vm381_vm1, %v3685_v5 }
0x180e   :  { %v3687_v9 = vpop.permute.xlu1 %3686 }
0x1814   :  { %v7896_v11 = vpop.permute.xlu1 %7895  ;;  %v7891_v27 = vpop.permute.xlu0 %7890 }
0x1815   :  { %v7898_v28 = vunpack.i.h.bf16 %v7896_v11  ;;  %v7897_v12 = vunpack.i.l.bf16 %v7896_v11  ;;  %v7893_v14 = vunpack.i.h.bf16 %v7891_v27  ;;  %v7892_v15 = vunpack.i.l.bf16 %v7891_v27 }
0x1817   :  { %v7669_v16 = vpack.c.bf16 %v7893_v14, %v7892_v15  ;;  %v7679_v17 = vpack.c.bf16 %v7898_v28, %v7897_v12 }
0x1818   :  { %v4051_v18 = vpop.permute.xlu0 %4050  ;;  %v4053_v19 = vpop.permute.xlu1 %4052 }
0x1819   :  { %7671 = vmatprep.subr.msk.bf16.mxu1 %vm8422_vm2, %v7669_v16 }
0x181a   :  { %7674 = vmatpush3.bf16.xpose.msk.msra.mxu1 %vm8422_vm2, %v7669_v16 }
0x181b   :  { %7681 = vmatprep.subr.msk.bf16.mxu1 %vm8422_vm2, %v7679_v17 }
0x1821   :  { %7276 = vmatmul.mubr.msk.f32.vlgmr.msra.gmra.mrb[32].mxu1 %vm381_vm1, %v3687_v9 }
0x1822   :  { %7684 = vmatpush3.bf16.xpose.msk.msra.mxu1 %vm8422_vm2, %v7679_v17  ;;  %7299 = vmatprep.mubr.msk.f32.mxu1 %vm381_vm1, %v4051_v18 }
0x1829   :  { %7300 = vmatmul.mubr.msk.f32.vlgmr.msra.gmra.mrb[34].mxu1 %vm381_vm1, %v4053_v19 }
0x187e   :  { %v7263_v20 = vpop.f32.mrb[30].mxu1 }
0x187f   :  { %v3576_v23 = vadd.f32 %v8911_v21, %v7263_v20  ;;  %v3570_v29 = vpop.f32.mrb[31].mxu1 }
0x1880   :  { %v3571_v31 = vadd.f32 %v8917_v30, %v3570_v29 }
0x1881   :  { %v3580_v32 = vmul.f32 0.17677669, %v3576_v23 }
0x1882   :  { %v3579_v33 = vmul.f32 0.17677669, %v3571_v31 }
0x1883   :  { %v3584_v35 = vsel %vm471_vm3, %v3580_v32, -inf }
0x1884   :  { %3585 = vmax.xlane.f32.xlu1 %v3584_v35  ;;  %v3581_v6 = vsel %vm471_vm3, %v3579_v33, -inf }
0x1885   :  { %3582 = vmax.xlane.f32.xlu0 %v3581_v6 }
0x18f4   :  { %v7277_v7 = vpop.f32.mrb[32].mxu1 }
0x18f5   :  { %v3766_v26 = vpop.f32.mrb[33].mxu1  ;;  %v3772_v36 = vadd.f32 %v8911_v21, %v7277_v7 }
0x18f6   :  { %v3767_v24 = vadd.f32 %v8917_v30, %v3766_v26 }
0x18f7   :  { %v3776_v50 = vmul.f32 0.17677669, %v3772_v36 }
0x18f8   :  { %v3775_v49 = vmul.f32 0.17677669, %v3767_v24 }
0x18f9   :  { %v3780_v40 = vsel %vm471_vm3, %v3776_v50, -inf }
0x18fa   :  { %v3777_v37 = vsel %vm471_vm3, %v3775_v49, -inf }
0x18fb   :  { %3778 = vmax.xlane.f32.xlu0 %v3777_v37 }
0x18fc   :  { %v7301_v38 = vpop.f32.mrb[34].mxu1 }
0x18fd   :  { %v4132_v39 = vpop.f32.mrb[35].mxu1  ;;  %v4138_v27 = vadd.f32 %v8911_v21, %v7301_v38 }
0x18ff   :  { %3781 = vmax.xlane.f32.xlu0 %v3780_v40 }
0x1911   :  { %v3586_v44 = vpop.xlane.xlu1 %3585 }
0x1912   :  { %v3588_v45 = vsub.f32 %v3580_v32, %v3586_v44  ;;  %v3583_v46 = vpop.xlane.xlu0 %3582  ;;  %v6558_v44 = vld [vmem:[%s9345_s7 + $0x28] sm:$0xff] }
0x1913   :  { %v3587_v54 = vsub.f32 %v3579_v33, %v3583_v46 }
0x1914   :  { %v3591_v47 = vmul.f32 1.442695, %v3588_v45  ;;  %v6557_v45 = vld [vmem:[%s9345_s7 + $0x20] sm:$0xff] }
0x1915   :  { %v3589_v48 = vmul.f32 1.442695, %v3587_v54 }
0x1916   :  { %8025 = vpow2.f32 %v3591_v47 }
0x1917   :  { %8027 = vpow2.f32 %v3589_v48 }
0x1920   :  { %v8026_v51 = vpop.eup %8025 }
0x1921   :  { %v8028_v52 = vpop.eup %8027  ;;  %v3596_v53 = vsel %vm471_vm3, %v8026_v51, 0.0 }
0x1922   :  { %3597 = vadd.xlane.f32.xlu1 %v3596_v53  ;;  %v3593_v55 = vsel %vm471_vm3, %v8028_v52, 0.0 }
0x1923   :  { %3594 = vadd.xlane.f32.xlu0 %v3593_v55 }
0x1988   :  { %v3779_v56 = vpop.xlane.xlu0 %3778 }
0x1989   :  { %v3783_v57 = vsub.f32 %v3775_v49, %v3779_v56 }
0x198b   :  { %v3785_v41 = vmul.f32 1.442695, %v3783_v57 }
0x198c   :  { %v3782_v58 = vpop.xlane.xlu0 %3781 }
0x198d   :  { %8029 = vpow2.f32 %v3785_v41  ;;  %v3784_v43 = vsub.f32 %v3776_v50, %v3782_v58 }
0x198f   :  { %v3787_v42 = vmul.f32 1.442695, %v3784_v43 }
0x1991   :  { %8031 = vpow2.f32 %v3787_v42 }
0x1997   :  { %v8030_v60 = vpop.eup %8029 }
0x1998   :  { %v3789_v25 = vsel %vm471_vm3, %v8030_v60, 0.0 }
0x1999   :  { %3790 = vadd.xlane.f32.xlu0 %v3789_v25 }
0x199b   :  { %v8032_v61 = vpop.eup %8031 }
0x199c   :  { %v3792_v63 = vsel %vm471_vm3, %v8032_v61, 0.0 }
0x199d   :  { %3793 = vadd.xlane.f32.xlu1 %v3792_v63 }
0x19ae   :  { %7905 = vrot.lane.b32.xlu1 %v8880_v13, %s9351_s28  ;;  %v4133_v13 = vadd.f32 %v8917_v30, %v4132_v39 }
0x19af   :  { %v3598_v1 = vpop.xlane.xlu1 %3597  ;;  %7900 = vrot.lane.b32.xlu0 %v8872_v2, %s9352_s6 }
0x19b0   :  { %8033 = vrcp.f32 %v3598_v1  ;;  %v3595_v3 = vpop.xlane.xlu0 %3594  ;;  %v4141_v9 = vmul.f32 0.17677669, %v4133_v13 }
0x19b1   :  { %8035 = vrcp.f32 %v3595_v3 }
0x19b2   :  { %4335 = vrot.lane.b32.xlu1 %v8870_v0, %s9351_s28  ;;  %v4143_v11 = vsel %vm471_vm3, %v4141_v9, -inf  ;;  %v4142_v0 = vmul.f32 0.17677669, %v4138_v27 }
0x19b4   :  { %v4146_v28 = vsel %vm471_vm3, %v4142_v0, -inf }
0x19b6   :  { %4337 = vrot.lane.b32.xlu1 %v8868_v62, %s9351_s28 }
0x19ba   :  { %v8034_v4 = vpop.eup %8033 }
0x19bb   :  { %v8036_v8 = vpop.eup %8035  ;;  %v3602_v5 = vmul.f32 %v8034_v4, %v8026_v51 }
0x19bc   :  { %v3601_v10 = vmul.f32 %v8036_v8, %v8028_v52 }
0x19be   :  { %7268 = vmatprep.mubr.msk.f32.mxu0 %vm471_vm3, %v3601_v10 }
0x19bf   :  { %7269 = vmatmul.mubr.msk.f32.vlgmr.msra.gmra.mrb[28].mxu0 %vm471_vm3, %v3602_v5 }
0x19ce   :  { %4144 = vmax.xlane.f32.xlu0 %v4143_v11 }
0x19da   :  { %4147 = vmax.xlane.f32.xlu1 %v4146_v28 }
0x1a26   :  { %v3791_v62 = vpop.xlane.xlu0 %3790 }
0x1a27   :  { %8037 = vrcp.f32 %v3791_v62 }
0x1a2a   :  { %v3794_v12 = vpop.xlane.xlu1 %3793  ;;  %v7901_v14 = vpop.permute.xlu0 %7900 }
0x1a2b   :  { %8039 = vrcp.f32 %v3794_v12  ;;  %v7903_v15 = vunpack.i.h.bf16 %v7901_v14  ;;  %v7902_v16 = vunpack.i.l.bf16 %v7901_v14 }
0x1a2d   :  { %v7675_v17 = vpack.c.bf16 %v7903_v15, %v7902_v16 }
0x1a2e   :  { %v7906_v18 = vpop.permute.xlu1 %7905 }
0x1a2f   :  { %v7908_v19 = vunpack.i.h.bf16 %v7906_v18  ;;  %v7907_v20 = vunpack.i.l.bf16 %v7906_v18  ;;  %7676 = vmatprep.subr.bf16.mxu0 %v7675_v17 }
0x1a30   :  { %7678 = vmatpush3.bf16.msra.mxu0 %v7675_v17 }
0x1a31   :  { %v8038_v23 = vpop.eup %8037  ;;  %v7689_v29 = vpack.c.bf16 %v7908_v19, %v7907_v20  ;;  %7285 = vmatprep.subr.mxu0 %v6558_v44 }
0x1a32   :  { %v4336_v31 = vpop.permute.xlu1 %4335  ;;  %v3797_v32 = vmul.f32 %v8038_v23, %v8030_v60  ;;  %v6560_v23 = vld [vmem:[%s9345_s7 + $0x38] sm:$0xff] }
0x1a33   :  { %7691 = vmatprep.subr.msk.bf16.mxu1 %vm8422_vm2, %v7689_v29  ;;  %7318 = vmatprep.mubr.msk.f32.mxu1 %vm381_vm1, %v4336_v31 }
0x1a34   :  { %7282 = vmatprep.mubr.msk.f32.mxu0 %vm471_vm3, %v3797_v32  ;;  %7694 = vmatpush3.bf16.xpose.msk.msra.mxu1 %vm8422_vm2, %v7689_v29 }
0x1a35   :  { %v8040_v33 = vpop.eup %8039 }
0x1a36   :  { %v3798_v35 = vmul.f32 %v8040_v33, %v8032_v61  ;;  %v4338_v6 = vpop.permute.xlu1 %4337 }
0x1a38   :  { %7283 = vmatmul.mubr.msk.f32.vlgmr.msra.gmra.mrb[30].mxu0 %vm471_vm3, %v3798_v35 }
0x1a39   :  { %7286 = vmatpush3.msra.mxu0 %v6558_v44 }
0x1a3a   :  { %7290 = vmatprep.subr.mxu0 %v6557_v45 }
0x1a3b   :  { %7319 = vmatmul.mubr.msk.f32.vlgmr.msra.gmra.mrb[36].mxu1 %vm381_vm1, %v4338_v6  ;;  %v8988_v6 = vld [vmem:[#allocation2] sm:$0xff] }
0x1a5b   :  { %v4145_v7 = vpop.xlane.xlu0 %4144 }
0x1a5c   :  { %v4149_v26 = vsub.f32 %v4141_v9, %v4145_v7  ;;  %v6600_v7 = vld [vmem:[%s9346_s29 + $0x1] ss:$0 sm:$0xff] }
0x1a5e   :  { %v4151_v49 = vmul.f32 1.442695, %v4149_v26 }
0x1a67   :  { %v4148_v36 = vpop.xlane.xlu1 %4147 }
0x1a68   :  { %v4150_v24 = vsub.f32 %v4142_v0, %v4148_v36 }
0x1a6a   :  { %v4153_v50 = vmul.f32 1.442695, %v4150_v24 }
0x1a6c   :  { %8041 = vpow2.f32 %v4153_v50 }
0x1a6d   :  { %8043 = vpow2.f32 %v4151_v49 }
0x1a76   :  { %v8042_v37 = vpop.eup %8041 }
0x1a77   :  { %v4158_v38 = vsel %vm471_vm3, %v8042_v37, 0.0  ;;  %v8044_v39 = vpop.eup %8043 }
0x1a78   :  { %4159 = vadd.xlane.f32.xlu0 %v4158_v38  ;;  %v4155_v40 = vsel %vm471_vm3, %v8044_v39, 0.0 }
0x1a7c   :  { %4156 = vadd.xlane.f32.xlu0 %v4155_v40 }
0x1a92   :  { %v7270_v46 = vpop.f32.mrb[28].mxu0  ;;  %7910 = vrot.lane.b32.xlu0 %v8872_v2, %s9350_s2 }
0x1a93   :  { %v3675_v54 = vpop.f32.mrb[29].mxu0 }
0x1b05   :  { %v4160_v47 = vpop.xlane.xlu0 %4159 }
0x1b09   :  { %v4157_v48 = vpop.xlane.xlu0 %4156 }
0x1b0a   :  { %8045 = vrcp.f32 %v4157_v48 }
0x1b0b   :  { %8047 = vrcp.f32 %v4160_v47  ;;  %v7284_v51 = vpop.f32.mrb[30].mxu0 }
0x1b0c   :  { %v3879_v52 = vpop.f32.mrb[31].mxu0 }
0x1b0d   :  { %v7911_v53 = vpop.permute.xlu0 %7910  ;;  %7287 = vmatprep.mubr.msk.f32.mxu0 %vm381_vm1, %v3879_v52 }
0x1b0e   :  { %v7913_v55 = vunpack.i.h.bf16 %v7911_v53  ;;  %v7912_v56 = vunpack.i.l.bf16 %v7911_v53  ;;  %7288 = vmatmul.mubr.msk.f32.vlgmr.msra.gmra.mrb[32].mxu0 %vm381_vm1, %v7284_v51  ;;  %v7320_v57 = vpop.f32.mrb[36].mxu1  ;;  %v6610_v53 = vld [vmem:[%s9347_s9 + $0x28] sm:$0xff] }
0x1b0f   :  { %7292 = vmatprep.mubr.msk.f32.mxu0 %vm381_vm1, %v3675_v54  ;;  %v4417_v41 = vpop.f32.mrb[37].mxu1  ;;  %7291 = vmatpush3.msra.mxu0 %v6557_v45  ;;  %v4423_v43 = vadd.f32 %v8911_v21, %v7320_v57  ;;  %v6559_v21 = vld [vmem:[%s9345_s7 + $0x30] sm:$0xff]  ;;  %v6612_v57 = vld [vmem:[%s9347_s9 + $0x38] sm:$0xff] }
0x1b10   :  { %v7685_v58 = vpack.c.bf16 %v7913_v55, %v7912_v56  ;;  %v4418_v42 = vadd.f32 %v8917_v30, %v4417_v41  ;;  %v6611_v56 = vld [vmem:[%s9347_s9 + $0x30] sm:$0xff] }
0x1b11   :  { %v4427_v61 = vmul.f32 0.17677669, %v4423_v43  ;;  %v7711_v41 = vpack.c.bf16 %v6612_v57, %v6611_v56  ;;  %v6605_v43 = vld [vmem:[%s9348_s4 + $0x20] sm:$0xff] }
0x1b12   :  { %v4426_v60 = vmul.f32 0.17677669, %v4418_v42  ;;  %7686 = vmatprep.subr.bf16.mxu0 %v7685_v58  ;;  %v6606_v42 = vld [vmem:[%s9348_s4 + $0x28] sm:$0xff] }
0x1b13   :  { %v4431_v8 = vsel %vm471_vm3, %v4427_v61, -inf }
0x1b14   :  { %v8046_v25 = vpop.eup %8045  ;;  %v4428_v63 = vsel %vm471_vm3, %v4426_v60, -inf }
0x1b15   :  { %v8048_v1 = vpop.eup %8047  ;;  %4429 = vmax.xlane.f32.xlu1 %v4428_v63  ;;  %v4163_v3 = vmul.f32 %v8046_v25, %v8044_v39  ;;  %v6607_v25 = vld [vmem:[%s9348_s4 + $0x30] sm:$0xff] }
0x1b16   :  { %7293 = vmatmul.mubr.msk.f32.vlgmr.msra.gmra.mrb[32].mxu0 %vm381_vm1, %v7270_v46  ;;  %v4164_v4 = vmul.f32 %v8048_v1, %v8042_v37 }
0x1b17   :  { %7688 = vmatpush3.bf16.msra.mxu0 %v7685_v58  ;;  %7306 = vmatprep.mubr.msk.f32.mxu0 %vm471_vm3, %v4163_v3  ;;  %v8104_v58 = vld [vmem:[#allocation2 + $0x8] sm:$0xff] }
0x1b18   :  { %7309 = vmatprep.subr.mxu0 %v6559_v21 }
0x1b19   :  { %4432 = vmax.xlane.f32.xlu1 %v4431_v8 }
0x1b1a   :  { %7307 = vmatmul.mubr.msk.f32.vlgmr.msra.gmra.mrb[34].mxu0 %vm471_vm3, %v4164_v4 }
0x1b1b   :  { %7310 = vmatpush3.msra.mxu0 %v6559_v21 }
0x1ba2   :  { %v4430_v30 = vpop.xlane.xlu1 %4429 }
0x1ba3   :  { %v4434_v10 = vsub.f32 %v4426_v60, %v4430_v30  ;;  %v7699_v60 = vpack.c.bf16 %v6606_v42, %v6605_v43 }
0x1ba5   :  { %v4436_v9 = vmul.f32 1.442695, %v4434_v10  ;;  %7700 = vmatprep.subr.bf16.mxu1 %v7699_v60 }
0x1ba6   :  { %v4433_v5 = vpop.xlane.xlu1 %4432  ;;  %7702 = vmatpush3.bf16.msra.mxu1 %v7699_v60 }
0x1ba7   :  { %v4435_v13 = vsub.f32 %v4427_v61, %v4433_v5  ;;  %v6608_v61 = vld [vmem:[%s9348_s4 + $0x38] sm:$0xff]  ;;  %v6603_v5 = vld [vmem:[%s9287_s14 + $0x1] ss:$0 sm:$0xff] }
0x1ba8   :  { %v7703_v63 = vpack.c.bf16 %v6608_v61, %v6607_v25 }
0x1ba9   :  { %v4438_v11 = vmul.f32 1.442695, %v4435_v13 }
0x1baa   :  { %7704 = vmatprep.subr.bf16.mxu1 %v7703_v63 }
0x1bab   :  { %8049 = vpow2.f32 %v4438_v11  ;;  %7706 = vmatpush3.bf16.msra.mxu1 %v7703_v63 }
0x1bac   :  { %8051 = vpow2.f32 %v4436_v9  ;;  %v6604_v9 = vld [vmem:[%s9288_s15 + $0x1] ss:$0 sm:$0xff] }
0x1bb5   :  { %v8050_v27 = vpop.eup %8049 }
0x1bb6   :  { %v4443_v0 = vsel %vm471_vm3, %v8050_v27, 0.0  ;;  %v8052_v28 = vpop.eup %8051 }
0x1bb7   :  { %4444 = vadd.xlane.f32.xlu1 %v4443_v0  ;;  %v4440_v62 = vsel %vm471_vm3, %v8052_v28, 0.0 }
0x1bbb   :  { %4441 = vadd.xlane.f32.xlu1 %v4440_v62 }
0x1bcc   :  { %7915 = vrot.lane.b32.xlu1 %v8872_v2, %s9351_s28 }
0x1bed   :  { %v7308_v12 = vpop.f32.mrb[34].mxu0 }
0x1bee   :  { %v4243_v14 = vpop.f32.mrb[35].mxu0 }
0x1bef   :  { %7311 = vmatprep.mubr.msk.f32.mxu0 %vm381_vm1, %v4243_v14 }
0x1bf0   :  { %7312 = vmatmul.mubr.msk.f32.vlgmr.msra.gmra.mrb[32].mxu0 %vm381_vm1, %v7308_v12 }
0x1c44   :  { %v4445_v15 = vpop.xlane.xlu1 %4444 }
0x1c45   :  { %8053 = vrcp.f32 %v4445_v15 }
0x1c48   :  { %v4442_v16 = vpop.xlane.xlu1 %4441 }
0x1c49   :  { %8055 = vrcp.f32 %v4442_v16 }
0x1c4c   :  { %v7916_v17 = vpop.permute.xlu1 %7915 }
0x1c4d   :  { %v7918_v18 = vunpack.i.h.bf16 %v7916_v17  ;;  %v7917_v19 = vunpack.i.l.bf16 %v7916_v17 }
0x1c4f   :  { %v7695_v20 = vpack.c.bf16 %v7918_v18, %v7917_v19  ;;  %v8054_v2 = vpop.eup %8053 }
0x1c50   :  { %v4449_v32 = vmul.f32 %v8054_v2, %v8050_v27  ;;  %v6615_v2 = vld [vmem:[%s9284_s11 + $0x30] sm:$0xff] }
0x1c51   :  { %7696 = vmatprep.subr.bf16.mxu0 %v7695_v20 }
0x1c52   :  { %7698 = vmatpush3.bf16.msra.mxu0 %v7695_v20  ;;  %v6613_v20 = vld [vmem:[%s9284_s11 + $0x20] sm:$0xff] }
0x1c53   :  { %v8056_v29 = vpop.eup %8055  ;;  %7328 = vmatprep.subr.mxu0 %v6560_v23 }
0x1c54   :  { %v4448_v31 = vmul.f32 %v8056_v29, %v8052_v28 }
0x1c56   :  { %7325 = vmatprep.mubr.msk.f32.mxu0 %vm471_vm3, %v4448_v31  ;;  %v6616_v31 = vld [vmem:[%s9284_s11 + $0x38] sm:$0xff] }
0x1c57   :  { %7326 = vmatmul.mubr.msk.f32.vlgmr.msra.gmra.mrb[36].mxu0 %vm471_vm3, %v4449_v32  ;;  %v7719_v32 = vpack.c.bf16 %v6616_v31, %v6615_v2 }
0x1c58   :  { %7329 = vmatpush3.msra.mxu0 %v6560_v23  ;;  %v6614_v23 = vld [vmem:[%s9284_s11 + $0x28] sm:$0xff]  ;;  %s9355_s11 = sld [smem:[#allocation22_spill]] }
0x1c59   :  { %v7715_v29 = vpack.c.bf16 %v6614_v23, %v6613_v20 }
0x1c5b   :  { %7716 = vmatprep.subr.bf16.mxu1 %v7715_v29 }
0x1d2a   :  { %v7327_v33 = vpop.f32.mrb[36].mxu0 }
0x1d2b   :  { %v4528_v35 = vpop.f32.mrb[37].mxu0 }
0x1d2c   :  { %7330 = vmatprep.mubr.msk.f32.mxu0 %vm381_vm1, %v4528_v35 }
0x1d2d   :  { %7331 = vmatmul.mubr.msk.f32.vlgmr.msra.gmra.mrb[32].mxu0 %vm381_vm1, %v7327_v33 }
0x1d2e   :  { %7352 = vmatprep.mubr.msk.f32.mxu0 %vm149_vm0, %v8988_v6 }
0x1e00   :  { %v7332_v26 = vpop.f32.mrb[32].mxu0 }
0x1e01   :  { %v4627_v36 = vadd.f32 %v7332_v26, %v6600_v7  ;;  %v4609_v24 = vpop.f32.mrb[33].mxu0  ;;  %v9078_v26 = vld [vmem:[%s9349_s27] sm:$0xff] }
0x1e02   :  { %v4626_v49 = vadd.f32 %v6600_v7, %v4609_v24 }
0x1e03   :  { %v4629_v50 = vadd.f32 %v4627_v36, %v8858_v34 }
0x1e04   :  { %v4628_v37 = vadd.f32 %v4626_v49, %v8846_v59  ;;  %v6609_v59 = vld [vmem:[%s9347_s9 + $0x20] sm:$0xff] }
0x1e05   :  { %v4637_v38 = vsel %vm149_vm0, %v4629_v50, 0.0  ;;  %v7707_v55 = vpack.c.bf16 %v6610_v53, %v6609_v59 }
0x1e06   :  { %4638 = vadd.xlane.f32.xlu1 %v4637_v38  ;;  %v4634_v39 = vsel %vm149_vm0, %v4628_v37, 0.0 }
0x1e07   :  { %4635 = vadd.xlane.f32.xlu0 %v4634_v39  ;;  %7708 = vmatprep.subr.bf16.mxu0 %v7707_v55 }
0x1e08   :  { %7710 = vmatpush3.bf16.msra.mxu0 %v7707_v55 }
0x1e09   :  { %7712 = vmatprep.subr.bf16.mxu0 %v7711_v41 }
0x1e0c   :  { %7714 = vmatpush3.bf16.msra.mxu0 %v7711_v41 }
0x1e0f   :  { %7353 = vmatmul.mubr.msk.f32.vlgmr.msra.gmra.mrb[38].mxu0 %vm149_vm0, %v8104_v58 }
0x1e93   :  { %v4639_v40 = vpop.xlane.xlu1 %4638 }
0x1e94   :  { %v4641_v44 = vmul.f32 0.03125, %v4639_v40  ;;  %v4636_v45 = vpop.xlane.xlu0 %4635 }
0x1e95   :  { %v4640_v46 = vmul.f32 0.03125, %v4636_v45 }
0x1e96   :  { %v4643_v54 = vsub.f32 %v4629_v50, %v4641_v44 }
0x1e97   :  { %v4642_v47 = vsub.f32 %v4628_v37, %v4640_v46 }
0x1e98   :  { %v4645_v52 = vmul.f32 %v4643_v54, %v4643_v54 }
0x1e99   :  { %v4644_v48 = vmul.f32 %v4642_v47, %v4642_v47 }
0x1e9a   :  { %v4649_v34 = vsel %vm149_vm0, %v4645_v52, 0.0 }
0x1e9b   :  { %v4646_v51 = vsel %vm149_vm0, %v4644_v48, 0.0 }
0x1e9c   :  { %4647 = vadd.xlane.f32.xlu0 %v4646_v51 }
0x1ea0   :  { %4650 = vadd.xlane.f32.xlu0 %v4649_v34 }
0x1ee2   :  { %v7354_v14 = vpop.f32.mrb[38].mxu0 }
0x1ee3   :  { %v4845_v15 = vpop.f32.mrb[39].mxu0 }
0x1ee4   :  { %v9042_v16 = vpack.i.bf16 %v7354_v14, %v4845_v15  ;;  %v7723_v17 = vpack.c.bf16 %v7354_v14, %v4845_v15 }
0x1ee6   :  { %7725 = vmatprep.subr.msk.bf16.mxu0 %vm8422_vm2, %v7723_v17 }
0x1ee7   :  { %7728 = vmatpush3.bf16.xpose.msk.msra.mxu0 %vm8422_vm2, %v7723_v17 }
0x1f29   :  { %v4648_v1 = vpop.xlane.xlu0 %4647 }
0x1f2a   :  { %v4652_v3 = vmul.f32 0.03125, %v4648_v1 }
0x1f2c   :  { %v4654_v4 = vadd.f32 1e-05, %v4652_v3 }
0x1f2d   :  { %v4651_v8 = vpop.xlane.xlu0 %4650 }
0x1f2e   :  { %8057 = vrsqrt.f32 %v4654_v4  ;;  %v4653_v21 = vmul.f32 0.03125, %v4651_v8 }
0x1f30   :  { %v4655_v30 = vadd.f32 1e-05, %v4653_v21 }
0x1f32   :  { %8059 = vrsqrt.f32 %v4655_v30 }
0x1f38   :  { %v8058_v10 = vpop.eup %8057 }
0x1f39   :  { %v4658_v13 = vmul.f32 %v8058_v10, %v4642_v47 }
0x1f3b   :  { %v4666_v11 = vmul.f32 %v6603_v5, %v4658_v13 }
0x1f3c   :  { %v8060_v27 = vpop.eup %8059 }
0x1f3d   :  { %v4659_v0 = vmul.f32 %v8060_v27, %v4643_v54  ;;  %v9032_v28 = vadd.f32 %v6604_v9, %v4666_v11 }
0x1f3f   :  { %v4667_v62 = vmul.f32 %v6603_v5, %v4659_v0  ;;  %7341 = vmatprep.mubr.msk.f32.mxu1 %vm149_vm0, %v9032_v28 }
0x1f41   :  { %v9036_v12 = vadd.f32 %v6604_v9, %v4667_v62 }
0x1f43   :  { %7342 = vmatmul.mubr.msk.f32.vlgmr.msra.gmra.mrb[38].mxu1 %vm149_vm0, %v9036_v12 }
0x1f44   :  { %7363 = vmatprep.mubr.msk.f32.mxu1 %vm149_vm0, %v8988_v6  ;;  %7718 = vmatpush3.bf16.msra.mxu1 %v7715_v29  ;;  %v9072_v6 = vld [vmem:[%s9349_s27 + $0x8] sm:$0xff]  ;;  %s9356_s27 = sld [smem:[#allocation23_spill]] }
0x1f45   :  { %7720 = vmatprep.subr.bf16.mxu1 %v7719_v32 }
0x1f48   :  { %7722 = vmatpush3.bf16.msra.mxu1 %v7719_v32 }
0x1f4b   :  { %7364 = vmatmul.mubr.msk.f32.vlgmr.msra.gmra.mrb[40].mxu1 %vm149_vm0, %v8104_v58 }
0x2016   :  { %v9048_v18 = vpop.f32.mrb[38].mxu1 }
0x2017   :  { %v9050_v19 = vpop.f32.mrb[39].mxu1 }
0x2018   :  { %7370 = vmatprep.mubr.msk.f32.mxu0 %vm381_vm1, %v9050_v19 }
0x2019   :  { %7371 = vmatmul.mubr.msk.f32.vlgmr.msra.gmra.mrb[40].mxu0 %vm381_vm1, %v9048_v18 }
0x201e   :  { %v7365_v52 = vpop.f32.mrb[40].mxu1 }
0x201f   :  { %v4920_v34 = vpop.f32.mrb[41].mxu1 }
0x2020   :  { %v9085_v59 = vpack.i.bf16 %v7365_v52, %v4920_v34  ;;  %v7729_v53 = vpack.c.bf16 %v7365_v52, %v4920_v34 }
0x2022   :  { %7730 = vmatprep.subr.bf16.mxu1 %v7729_v53 }
0x2023   :  { %7732 = vmatpush3.bf16.msra.mxu1 %v7729_v53 }
0x20ec   :  { %v7372_v33 = vpop.f32.mrb[40].mxu0 }
0x20ed   :  { %v5007_v35 = vpop.f32.mrb[41].mxu0  ;;  %v5013_v7 = vadd.f32 %v9072_v6, %v7372_v33 }
0x20ee   :  { %v5008_v36 = vadd.f32 %v9078_v26, %v5007_v35 }
0x20ef   :  { %v5017_v49 = vmul.f32 0.17677669, %v5013_v7 }
0x20f0   :  { %v5016_v24 = vmul.f32 0.17677669, %v5008_v36 }
0x20f1   :  { %v5021_v37 = vsel %vm471_vm3, %v5017_v49, -inf }
0x20f2   :  { %v5018_v50 = vsel %vm471_vm3, %v5016_v24, -inf }
0x20f3   :  { %5019 = vmax.xlane.f32.xlu0 %v5018_v50 }
0x20f7   :  { %5022 = vmax.xlane.f32.xlu0 %v5021_v37 }
0x2180   :  { %v5020_v38 = vpop.xlane.xlu0 %5019 }
0x2181   :  { %v5024_v39 = vsub.f32 %v5016_v24, %v5020_v38 }
0x2183   :  { %v5026_v40 = vmul.f32 1.442695, %v5024_v39 }
0x2184   :  { %v5023_v44 = vpop.xlane.xlu0 %5022 }
0x2185   :  { %8061 = vpow2.f32 %v5026_v40  ;;  %v5025_v45 = vsub.f32 %v5017_v49, %v5023_v44 }
0x2187   :  { %v5028_v46 = vmul.f32 1.442695, %v5025_v45 }
0x2189   :  { %8063 = vpow2.f32 %v5028_v46 }
0x218f   :  { %v8062_v54 = vpop.eup %8061 }
0x2190   :  { %v5030_v47 = vsel %vm471_vm3, %v8062_v54, 0.0 }
0x2191   :  { %5031 = vadd.xlane.f32.xlu0 %v5030_v47 }
0x2193   :  { %v8064_v48 = vpop.eup %8063 }
0x2194   :  { %v5033_v51 = vsel %vm471_vm3, %v8064_v48, 0.0 }
0x2195   :  { %5034 = vadd.xlane.f32.xlu1 %v5033_v51 }
0x21a6   :  { %5121 = vrot.lane.b32.xlu1 %v9050_v19, %s9352_s6 }
0x21a7   :  { %7920 = vrot.lane.b32.xlu0 %v9042_v16, %s9352_s6 }
0x21aa   :  { %5123 = vrot.lane.b32.xlu1 %v9048_v18, %s9352_s6 }
0x21ab   :  { %5487 = vrot.lane.b32.xlu0 %v9050_v19, %s9350_s2 }
0x21ae   :  { %7925 = vrot.lane.b32.xlu1 %v9042_v16, %s9350_s2 }
0x21b2   :  { %5489 = vrot.lane.b32.xlu1 %v9048_v18, %s9350_s2 }
0x221e   :  { %v5032_v55 = vpop.xlane.xlu0 %5031 }
0x221f   :  { %8065 = vrcp.f32 %v5032_v55 }
0x2222   :  { %v5035_v56 = vpop.xlane.xlu1 %5034  ;;  %v7921_v57 = vpop.permute.xlu0 %7920 }
0x2223   :  { %8067 = vrcp.f32 %v5035_v56  ;;  %v7923_v41 = vunpack.i.h.bf16 %v7921_v57  ;;  %v7922_v58 = vunpack.i.l.bf16 %v7921_v57 }
0x2225   :  { %v7733_v43 = vpack.c.bf16 %v7923_v41, %v7922_v58 }
0x2226   :  { %v5122_v42 = vpop.permute.xlu1 %5121  ;;  %v5488_v30 = vpop.permute.xlu0 %5487 }
0x2227   :  { %7735 = vmatprep.subr.msk.bf16.mxu1 %vm8422_vm2, %v7733_v43 }
0x2229   :  { %v8066_v60 = vpop.eup %8065 }
0x222a   :  { %v5124_v25 = vpop.permute.xlu1 %5123  ;;  %v5038_v61 = vmul.f32 %v8066_v60, %v8062_v54 }
0x222c   :  { %7377 = vmatprep.mubr.msk.f32.mxu1 %vm471_vm3, %v5038_v61 }
0x222d   :  { %v8068_v63 = vpop.eup %8067 }
0x222e   :  { %v5039_v1 = vmul.f32 %v8068_v63, %v8064_v48  ;;  %v7926_v3 = vpop.permute.xlu1 %7925 }
0x222f   :  { %v7928_v4 = vunpack.i.h.bf16 %v7926_v3  ;;  %v7927_v8 = vunpack.i.l.bf16 %v7926_v3 }
0x2230   :  { %7378 = vmatmul.mubr.msk.f32.vlgmr.msra.gmra.mrb[42].mxu1 %vm471_vm3, %v5039_v1 }
0x2231   :  { %v7743_v21 = vpack.c.bf16 %v7928_v4, %v7927_v8  ;;  %7738 = vmatpush3.bf16.xpose.msk.msra.mxu1 %vm8422_vm2, %v7733_v43  ;;  %7384 = vmatprep.mubr.msk.f32.mxu1 %vm381_vm1, %v5122_v42 }
0x2232   :  { %v5490_v10 = vpop.permute.xlu1 %5489 }
0x2233   :  { %7745 = vmatprep.subr.msk.bf16.mxu1 %vm8422_vm2, %v7743_v21 }
0x2238   :  { %7385 = vmatmul.mubr.msk.f32.vlgmr.msra.gmra.mrb[44].mxu1 %vm381_vm1, %v5124_v25 }
0x2239   :  { %7748 = vmatpush3.bf16.xpose.msk.msra.mxu1 %vm8422_vm2, %v7743_v21  ;;  %7408 = vmatprep.mubr.msk.f32.mxu1 %vm381_vm1, %v5488_v30 }
0x2240   :  { %7409 = vmatmul.mubr.msk.f32.vlgmr.msra.gmra.mrb[46].mxu1 %vm381_vm1, %v5490_v10 }
0x2303   :  { %v9113_v5 = vpop.f32.mrb[42].mxu1 }
0x2304   :  { %v9115_v13 = vpop.f32.mrb[43].mxu1 }
0x230b   :  { %v7386_v9 = vpop.f32.mrb[44].mxu1 }
0x230c   :  { %v5209_v11 = vadd.f32 %v9072_v6, %v7386_v9  ;;  %v5203_v27 = vpop.f32.mrb[45].mxu1 }
0x230d   :  { %v5204_v0 = vadd.f32 %v9078_v26, %v5203_v27 }
0x230e   :  { %v5213_v62 = vmul.f32 0.17677669, %v5209_v11 }
0x230f   :  { %v5212_v14 = vmul.f32 0.17677669, %v5204_v0 }
0x2310   :  { %v5217_v15 = vsel %vm471_vm3, %v5213_v62, -inf }
0x2311   :  { %5218 = vmax.xlane.f32.xlu1 %v5217_v15  ;;  %v5214_v17 = vsel %vm471_vm3, %v5212_v14, -inf }
0x2312   :  { %5215 = vmax.xlane.f32.xlu0 %v5214_v17 }
0x2313   :  { %v7410_v20 = vpop.f32.mrb[46].mxu1 }
0x2314   :  { %v5569_v23 = vpop.f32.mrb[47].mxu1  ;;  %v5575_v2 = vadd.f32 %v9072_v6, %v7410_v20 }
0x2315   :  { %v5570_v22 = vadd.f32 %v9078_v26, %v5569_v23 }
0x2316   :  { %v5579_v29 = vmul.f32 0.17677669, %v5575_v2 }
0x2317   :  { %v5578_v47 = vmul.f32 0.17677669, %v5570_v22 }
0x2318   :  { %v5583_v31 = vsel %vm471_vm3, %v5579_v29, -inf }
0x2319   :  { %v5580_v48 = vsel %vm471_vm3, %v5578_v47, -inf }
0x2322   :  { %7935 = vrot.lane.b32.xlu1 %v9042_v16, %s9351_s28 }
0x2326   :  { %5772 = vrot.lane.b32.xlu1 %v9050_v19, %s9351_s28 }
0x232a   :  { %5774 = vrot.lane.b32.xlu1 %v9048_v18, %s9351_s28 }
0x234e   :  { %5584 = vmax.xlane.f32.xlu1 %v5583_v31 }
0x239e   :  { %v5219_v32 = vpop.xlane.xlu1 %5218 }
0x239f   :  { %v5221_v33 = vsub.f32 %v5213_v62, %v5219_v32  ;;  %v5216_v35 = vpop.xlane.xlu0 %5215 }
0x23a0   :  { %v5220_v7 = vsub.f32 %v5212_v14, %v5216_v35 }
0x23a1   :  { %v5224_v36 = vmul.f32 1.442695, %v5221_v33 }
0x23a2   :  { %v5222_v24 = vmul.f32 1.442695, %v5220_v7  ;;  %v7936_v49 = vpop.permute.xlu1 %7935 }
0x23a3   :  { %8069 = vpow2.f32 %v5224_v36  ;;  %v7938_v16 = vunpack.i.h.bf16 %v7936_v49  ;;  %v7937_v50 = vunpack.i.l.bf16 %v7936_v49 }
0x23a4   :  { %8071 = vpow2.f32 %v5222_v24 }
0x23a5   :  { %v7753_v19 = vpack.c.bf16 %v7938_v16, %v7937_v50 }
0x23a6   :  { %v5773_v37 = vpop.permute.xlu1 %5772 }
0x23a7   :  { %7755 = vmatprep.subr.msk.bf16.mxu1 %vm8422_vm2, %v7753_v19  ;;  %7427 = vmatprep.mubr.msk.f32.mxu1 %vm381_vm1, %v5773_v37 }
0x23a8   :  { %7758 = vmatpush3.bf16.xpose.msk.msra.mxu1 %vm8422_vm2, %v7753_v19 }
0x23aa   :  { %v5775_v38 = vpop.permute.xlu1 %5774 }
0x23ad   :  { %v8070_v18 = vpop.eup %8069 }
0x23ae   :  { %v5229_v39 = vsel %vm471_vm3, %v8070_v18, 0.0  ;;  %v8072_v40 = vpop.eup %8071 }
0x23af   :  { %7428 = vmatmul.mubr.msk.f32.vlgmr.msra.gmra.mrb[48].mxu1 %vm381_vm1, %v5775_v38  ;;  %5230 = vadd.xlane.f32.xlu0 %v5229_v39  ;;  %v5226_v44 = vsel %vm471_vm3, %v8072_v40, 0.0 }
0x23b3   :  { %5227 = vadd.xlane.f32.xlu0 %v5226_v44 }
0x23c9   :  { %7930 = vrot.lane.b32.xlu0 %v9085_v59, %s9352_s6 }
0x23db   :  { %v5585_v45 = vpop.xlane.xlu1 %5584 }
0x23dc   :  { %v5587_v46 = vsub.f32 %v5579_v29, %v5585_v45 }
0x23de   :  { %v5590_v54 = vmul.f32 1.442695, %v5587_v46 }
0x23e0   :  { %8073 = vpow2.f32 %v5590_v54 }
0x23e8   :  { %5581 = vmax.xlane.f32.xlu0 %v5580_v48  ;;  %v6620_v48 = vld [vmem:[%s9285_s12 + $0x38] sm:$0xff] }
0x23ea   :  { %v9141_v51 = vpop.eup %8073 }
0x23eb   :  { %v5595_v52 = vsel %vm471_vm3, %v9141_v51, 0.0 }
0x23ec   :  { %5596 = vadd.xlane.f32.xlu0 %v5595_v52 }
0x243c   :  { %v5231_v34 = vpop.xlane.xlu0 %5230 }
0x243d   :  { %8075 = vrcp.f32 %v5231_v34 }
0x2440   :  { %v5228_v53 = vpop.xlane.xlu0 %5227 }
0x2441   :  { %8077 = vrcp.f32 %v5228_v53  ;;  %v6660_v53 = vld [vmem:[%s9353_s26 + $0x1] ss:$0 sm:$0xff] }
0x2444   :  { %v7931_v55 = vpop.permute.xlu0 %7930 }
0x2445   :  { %v7933_v56 = vunpack.i.h.bf16 %v7931_v55  ;;  %v7932_v57 = vunpack.i.l.bf16 %v7931_v55 }
0x2447   :  { %v7739_v41 = vpack.c.bf16 %v7933_v56, %v7932_v57  ;;  %v8076_v58 = vpop.eup %8075 }
0x2448   :  { %v5235_v60 = vmul.f32 %v8076_v58, %v8070_v18 }
0x2449   :  { %7740 = vmatprep.subr.bf16.mxu0 %v7739_v41 }
0x244a   :  { %7742 = vmatpush3.bf16.msra.mxu0 %v7739_v41 }
0x244b   :  { %v8078_v43 = vpop.eup %8077 }
0x244c   :  { %v5234_v42 = vmul.f32 %v8078_v43, %v8072_v40 }
0x244e   :  { %7391 = vmatprep.mubr.msk.f32.mxu0 %vm471_vm3, %v5234_v42 }
0x244f   :  { %7392 = vmatmul.mubr.msk.f32.vlgmr.msra.gmra.mrb[42].mxu0 %vm471_vm3, %v5235_v60 }
0x2475   :  { %v5582_v25 = vpop.xlane.xlu0 %5581 }
0x2476   :  { %v5586_v61 = vsub.f32 %v5578_v47, %v5582_v25 }
0x2478   :  { %v5588_v63 = vmul.f32 1.442695, %v5586_v61 }
0x2479   :  { %v5597_v0 = vpop.xlane.xlu0 %5596 }
0x247a   :  { %8079 = vpow2.f32 %v5588_v63 }
0x2482   :  { %v7429_v1 = vpop.f32.mrb[48].mxu1 }
0x2483   :  { %v5854_v3 = vpop.f32.mrb[49].mxu1  ;;  %v5860_v8 = vadd.f32 %v9072_v6, %v7429_v1  ;;  %v6618_v6 = vld [vmem:[%s9285_s12 + $0x28] sm:$0xff] }
0x2484   :  { %v8080_v4 = vpop.eup %8079  ;;  %v5855_v21 = vadd.f32 %v9078_v26, %v5854_v3  ;;  %7394 = vmatprep.subr.mxu0 %v6618_v6  ;;  %v6617_v26 = vld [vmem:[%s9285_s12 + $0x20] sm:$0xff] }
0x2485   :  { %v5592_v30 = vsel %vm471_vm3, %v8080_v4, 0.0  ;;  %v5864_v9 = vmul.f32 0.17677669, %v5860_v8  ;;  %7395 = vmatpush3.msra.mxu0 %v6618_v6 }
0x2486   :  { %v5863_v10 = vmul.f32 0.17677669, %v5855_v21  ;;  %5593 = vadd.xlane.f32.xlu0 %v5592_v30  ;;  %7399 = vmatprep.subr.mxu0 %v6617_v26 }
0x2487   :  { %v5868_v27 = vsel %vm471_vm3, %v5864_v9, -inf }
0x2488   :  { %v5865_v11 = vsel %vm471_vm3, %v5863_v10, -inf }
0x2489   :  { %5866 = vmax.xlane.f32.xlu1 %v5865_v11  ;;  %v6667_v11 = vld [vmem:[%s9293_s20 + $0x30] sm:$0xff] }
0x248d   :  { %5869 = vmax.xlane.f32.xlu1 %v5868_v27  ;;  %v6668_v27 = vld [vmem:[%s9293_s20 + $0x38] sm:$0xff] }
0x248e   :  { %v7767_v6 = vpack.c.bf16 %v6668_v27, %v6667_v11 }
0x249c   :  { %7940 = vrot.lane.b32.xlu0 %v9085_v59, %s9350_s2 }
0x2513   :  { %v5594_v14 = vpop.xlane.xlu0 %5593 }
0x2514   :  { %8081 = vrcp.f32 %v5594_v14 }
0x2516   :  { %v5867_v62 = vpop.xlane.xlu1 %5866 }
0x2517   :  { %v5871_v15 = vsub.f32 %v5863_v10, %v5867_v62  ;;  %v7941_v29 = vpop.permute.xlu0 %7940  ;;  %v6666_v10 = vld [vmem:[%s9293_s20 + $0x28] sm:$0xff]  ;;  %v6674_v62 = vld [vmem:[%s9295_s22 + $0x50] sm:$0xff] }
0x2518   :  { %v7943_v31 = vunpack.i.h.bf16 %v7941_v29  ;;  %v7942_v32 = vunpack.i.l.bf16 %v7941_v29 }
0x2519   :  { %v5873_v23 = vmul.f32 1.442695, %v5871_v15  ;;  %v6675_v15 = vld [vmem:[%s9295_s22 + $0x58] sm:$0xff] }
0x251a   :  { %v5870_v17 = vpop.xlane.xlu1 %5869  ;;  %v7749_v7 = vpack.c.bf16 %v7943_v31, %v7942_v32 }
0x251b   :  { %v5872_v20 = vsub.f32 %v5864_v9, %v5870_v17  ;;  %v7775_v17 = vpack.c.bf16 %v6675_v15, %v6674_v62 }
0x251d   :  { %v5875_v2 = vmul.f32 1.442695, %v5872_v20  ;;  %v6676_v20 = vld [vmem:[%s9295_s22 + $0x60] sm:$0xff] }
0x251e   :  { %v8082_v36 = vpop.eup %8081 }
0x251f   :  { %8083 = vpow2.f32 %v5875_v2  ;;  %v5600_v19 = vmul.f32 %v8082_v36, %v8080_v4 }
0x2520   :  { %8085 = vpow2.f32 %v5873_v23  ;;  %v6677_v23 = vld [vmem:[%s9295_s22 + $0x68] sm:$0xff] }
0x2521   :  { %8087 = vrcp.f32 %v5597_v0  ;;  %v6673_v0 = vld [vmem:[%s9295_s22 + $0x48] sm:$0xff]  ;;  %v7779_v2 = vpack.c.bf16 %v6677_v23, %v6676_v20 }
0x2522   :  { %v7393_v33 = vpop.f32.mrb[42].mxu0 }
0x2523   :  { %v5316_v35 = vpop.f32.mrb[43].mxu0 }
0x2524   :  { %7396 = vmatprep.mubr.msk.f32.mxu0 %vm381_vm1, %v5316_v35 }
0x2525   :  { %7397 = vmatmul.mubr.msk.f32.vlgmr.msra.gmra.mrb[44].mxu0 %vm381_vm1, %v7393_v33 }
0x2526   :  { %7400 = vmatpush3.msra.mxu0 %v6617_v26  ;;  %7401 = vmatprep.mubr.msk.f32.mxu0 %vm381_vm1, %v9115_v13  ;;  %v6619_v13 = vld [vmem:[%s9285_s12 + $0x30] sm:$0xff]  ;;  %v6672_v26 = vld [vmem:[%s9295_s22 + $0x40] sm:$0xff] }
0x2527   :  { %7750 = vmatprep.subr.bf16.mxu0 %v7749_v7  ;;  %v7771_v14 = vpack.c.bf16 %v6673_v0, %v6672_v26 }
0x2529   :  { %v8084_v24 = vpop.eup %8083 }
0x252a   :  { %v5880_v49 = vsel %vm471_vm3, %v8084_v24, 0.0  ;;  %v8086_v16 = vpop.eup %8085 }
0x252b   :  { %5881 = vadd.xlane.f32.xlu1 %v5880_v49  ;;  %v8088_v50 = vpop.eup %8087  ;;  %v5877_v37 = vsel %vm471_vm3, %v8086_v16, 0.0 }
0x252c   :  { %v5601_v18 = vmul.f32 %v8088_v50, %v9141_v51 }
0x252d   :  { %7402 = vmatmul.mubr.msk.f32.vlgmr.msra.gmra.mrb[44].mxu0 %vm381_vm1, %v9113_v5 }
0x252e   :  { %7752 = vmatpush3.bf16.msra.mxu0 %v7749_v7  ;;  %7415 = vmatprep.mubr.msk.f32.mxu0 %vm471_vm3, %v5600_v19 }
0x252f   :  { %5878 = vadd.xlane.f32.xlu1 %v5877_v37  ;;  %7418 = vmatprep.subr.mxu0 %v6619_v13 }
0x2531   :  { %7416 = vmatmul.mubr.msk.f32.vlgmr.msra.gmra.mrb[46].mxu0 %vm471_vm3, %v5601_v18 }
0x2532   :  { %7419 = vmatpush3.msra.mxu0 %v6619_v13 }
0x2540   :  { %7945 = vrot.lane.b32.xlu1 %v9085_v59, %s9351_s28 }
0x25b8   :  { %v5882_v5 = vpop.xlane.xlu1 %5881 }
0x25bc   :  { %v5879_v38 = vpop.xlane.xlu1 %5878 }
0x25bd   :  { %8089 = vrcp.f32 %v5879_v38  ;;  %v6678_v38 = vld [vmem:[%s9295_s22 + $0x70] sm:$0xff] }
0x25be   :  { %8091 = vrcp.f32 %v5882_v5 }
0x25c0   :  { %v7946_v39 = vpop.permute.xlu1 %7945 }
0x25c1   :  { %v7948_v40 = vunpack.i.h.bf16 %v7946_v39  ;;  %v7947_v44 = vunpack.i.l.bf16 %v7946_v39  ;;  %v6679_v39 = vld [vmem:[%s9295_s22 + $0x78] sm:$0xff] }
0x25c3   :  { %v7759_v45 = vpack.c.bf16 %v7948_v40, %v7947_v44  ;;  %v7783_v40 = vpack.c.bf16 %v6679_v39, %v6678_v38  ;;  %v6669_v44 = vld [vmem:[#allocation4 + $0x1] ss:$0 sm:$0xff] }
0x25c5   :  { %7760 = vmatprep.subr.bf16.mxu0 %v7759_v45 }
0x25c7   :  { %v8090_v46 = vpop.eup %8089 }
0x25c8   :  { %v8092_v47 = vpop.eup %8091  ;;  %v5885_v59 = vmul.f32 %v8090_v46, %v8086_v16  ;;  %v6664_v16 = vld [vmem:[%s9290_s17 + $0x1] ss:$0 sm:$0xff] }
0x25c9   :  { %v5886_v51 = vmul.f32 %v8092_v47, %v8084_v24  ;;  %v6663_v24 = vld [vmem:[%s9289_s16 + $0x1] ss:$0 sm:$0xff] }
0x2604   :  { %v7417_v54 = vpop.f32.mrb[46].mxu0 }
0x2605   :  { %v5680_v22 = vpop.f32.mrb[47].mxu0 }
0x2606   :  { %7420 = vmatprep.mubr.msk.f32.mxu0 %vm381_vm1, %v5680_v22 }
0x2607   :  { %7421 = vmatmul.mubr.msk.f32.vlgmr.msra.gmra.mrb[44].mxu0 %vm381_vm1, %v7417_v54 }
0x2608   :  { %7762 = vmatpush3.bf16.msra.mxu0 %v7759_v45  ;;  %7434 = vmatprep.mubr.msk.f32.mxu0 %vm471_vm3, %v5885_v59 }
0x2609   :  { %7437 = vmatprep.subr.mxu0 %v6620_v48 }
0x260b   :  { %7435 = vmatmul.mubr.msk.f32.vlgmr.msra.gmra.mrb[48].mxu0 %vm471_vm3, %v5886_v51 }
0x260c   :  { %7438 = vmatpush3.msra.mxu0 %v6620_v48  ;;  %v6680_v48 = vld [vmem:[#allocation6 + $0x1] ss:$0 sm:$0xff] }
0x260d   :  { %7772 = vmatprep.subr.bf16.mxu0 %v7771_v14 }
0x26de   :  { %v7436_v52 = vpop.f32.mrb[48].mxu0 }
0x26df   :  { %v5965_v34 = vpop.f32.mrb[49].mxu0 }
0x26e0   :  { %7439 = vmatprep.mubr.msk.f32.mxu0 %vm381_vm1, %v5965_v34 }
0x26e1   :  { %7440 = vmatmul.mubr.msk.f32.vlgmr.msra.gmra.mrb[44].mxu0 %vm381_vm1, %v7436_v52 }
0x26e2   :  { %7774 = vmatpush3.bf16.msra.mxu0 %v7771_v14  ;;  %v6685_v14 = vld [vmem:[%s9291_s18 + $0x1] ss:$0 sm:$0xff] }
0x26e3   :  { %7776 = vmatprep.subr.bf16.mxu0 %v7775_v17 }
0x26e6   :  { %7778 = vmatpush3.bf16.msra.mxu0 %v7775_v17  ;;  %v6686_v17 = vld [vmem:[%s9292_s19 + $0x1] ss:$0 sm:$0xff] }
0x26e7   :  { %7780 = vmatprep.subr.bf16.mxu0 %v7779_v2 }
0x26ea   :  { %7782 = vmatpush3.bf16.msra.mxu0 %v7779_v2 }
0x26eb   :  { %7784 = vmatprep.subr.bf16.mxu0 %v7783_v40 }
0x26ee   :  { %7786 = vmatpush3.bf16.msra.mxu0 %v7783_v40 }
0x27b4   :  { %v7441_v55 = vpop.f32.mrb[44].mxu0 }
0x27b5   :  { %v6064_v56 = vadd.f32 %v7441_v55, %v6660_v53  ;;  %v6046_v57 = vpop.f32.mrb[45].mxu0 }
0x27b6   :  { %v6063_v41 = vadd.f32 %v6660_v53, %v6046_v57 }
0x27b7   :  { %v6066_v58 = vadd.f32 %v6064_v56, %v9036_v12 }
0x27b8   :  { %v6065_v43 = vadd.f32 %v6063_v41, %v9032_v28  ;;  %v6665_v28 = vld [vmem:[%s9293_s20 + $0x20] sm:$0xff] }
0x27b9   :  { %v6074_v42 = vsel %vm149_vm0, %v6066_v58, 0.0  ;;  %v7763_v9 = vpack.c.bf16 %v6666_v10, %v6665_v28  ;;  %v6358_v28 = vld [vmem:[%s9354_s25 + $0x18] sm:$0xff] }
0x27ba   :  { %6075 = vadd.xlane.f32.xlu1 %v6074_v42  ;;  %v6071_v60 = vsel %vm149_vm0, %v6065_v43, 0.0 }
0x27bb   :  { %6072 = vadd.xlane.f32.xlu0 %v6071_v60  ;;  %7764 = vmatprep.subr.bf16.mxu1 %v7763_v9 }
0x27bc   :  { %7766 = vmatpush3.bf16.msra.mxu1 %v7763_v9 }
0x27bd   :  { %7768 = vmatprep.subr.bf16.mxu1 %v7767_v6 }
0x27c0   :  { %7770 = vmatpush3.bf16.msra.mxu1 %v7767_v6 }
0x2847   :  { %v6076_v25 = vpop.xlane.xlu1 %6075 }
0x2848   :  { %v6078_v61 = vmul.f32 0.03125, %v6076_v25  ;;  %v6073_v63 = vpop.xlane.xlu0 %6072 }
0x2849   :  { %v6077_v1 = vmul.f32 0.03125, %v6073_v63 }
0x284a   :  { %v6080_v3 = vsub.f32 %v6066_v58, %v6078_v61 }
0x284b   :  { %v6079_v4 = vsub.f32 %v6065_v43, %v6077_v1 }
0x284c   :  { %v6082_v30 = vmul.f32 %v6080_v3, %v6080_v3 }
0x284d   :  { %v6081_v8 = vmul.f32 %v6079_v4, %v6079_v4 }
0x284e   :  { %v6086_v12 = vsel %vm149_vm0, %v6082_v30, 0.0 }
0x284f   :  { %v6083_v21 = vsel %vm149_vm0, %v6081_v8, 0.0  ;;  %v6355_v8 = vld [vmem:[%s9354_s25] sm:$0xff] }
0x2850   :  { %6084 = vadd.xlane.f32.xlu0 %v6083_v21  ;;  %v6356_v21 = vld [vmem:[%s9354_s25 + $0x8] sm:$0xff] }
0x2851   :  { %v7787_v30 = vpack.c.bf16 %v6356_v21, %v6355_v8 }
0x2853   :  { %7788 = vmatprep.subr.bf16.mxu1 %v7787_v30 }
0x2854   :  { %6087 = vadd.xlane.f32.xlu0 %v6086_v12  ;;  %v6357_v12 = vld [vmem:[%s9354_s25 + $0x10] sm:$0xff] }
0x2855   :  { %v7791_v10 = vpack.c.bf16 %v6358_v28, %v6357_v12 }
0x28dd   :  { %v6085_v29 = vpop.xlane.xlu0 %6084 }
0x28de   :  { %v6089_v31 = vmul.f32 0.03125, %v6085_v29 }
0x28e0   :  { %v6091_v32 = vadd.f32 1e-05, %v6089_v31 }
0x28e1   :  { %v6088_v33 = vpop.xlane.xlu0 %6087 }
0x28e2   :  { %8093 = vrsqrt.f32 %v6091_v32  ;;  %v6090_v35 = vmul.f32 0.03125, %v6088_v33  ;;  %v6687_v33 = vld [vmem:[%s9355_s11] ss:$0 sm:$0xff] }
0x28e4   :  { %v6092_v7 = vadd.f32 1e-05, %v6090_v35 }
0x28e6   :  { %8095 = vrsqrt.f32 %v6092_v7 }
0x28ec   :  { %v8094_v36 = vpop.eup %8093 }
0x28ed   :  { %v6095_v49 = vmul.f32 %v8094_v36, %v6079_v4 }
0x28ef   :  { %v6103_v50 = vmul.f32 %v6663_v24, %v6095_v49 }
0x28f0   :  { %v8096_v19 = vpop.eup %8095 }
0x28f1   :  { %v6096_v37 = vmul.f32 %v8096_v19, %v6080_v3  ;;  %v6111_v18 = vadd.f32 %v6664_v16, %v6103_v50 }
0x28f3   :  { %v6104_v13 = vmul.f32 %v6663_v24, %v6096_v37  ;;  %7450 = vmatprep.mubr.msk.f32.mxu1 %vm149_vm0, %v6111_v18 }
0x28f5   :  { %v6112_v5 = vadd.f32 %v6664_v16, %v6104_v13 }
0x28f7   :  { %7451 = vmatmul.mubr.msk.f32.vlgmr.msra.gmra.mrb[50].mxu1 %vm149_vm0, %v6112_v5 }
0x28f8   :  { %7790 = vmatpush3.bf16.msra.mxu1 %v7787_v30 }
0x28f9   :  { %7792 = vmatprep.subr.bf16.mxu1 %v7791_v10 }
0x28fc   :  { %7794 = vmatpush3.bf16.msra.mxu1 %v7791_v10 }
0x29ca   :  { %v7452_v45 = vpop.f32.mrb[50].mxu1 }
0x29cb   :  { %v6204_v46 = vadd.f32 %v7452_v45, %v6669_v44  ;;  %v6198_v54 = vpop.f32.mrb[51].mxu1 }
0x29cc   :  { %v6199_v22 = vadd.f32 %v6669_v44, %v6198_v54 }
0x29cd   :  { %v6208_v59 = vmax.f32 %v6204_v46, 0.0 }
0x29ce   :  { %v6207_v47 = vmax.f32 %v6199_v22, 0.0 }
0x29d0   :  { %7469 = vmatprep.mubr.msk.f32.mxu0 %vm3111_vm4, %v6207_v47 }
0x29d1   :  { %7470 = vmatmul.mubr.msk.f32.vlgmr.msra.gmra.mrb[50].mxu0 %vm3111_vm4, %v6208_v59 }
0x2aa4   :  { %v7471_v51 = vpop.f32.mrb[50].mxu0 }
0x2aa5   :  { %v6298_v52 = vpop.f32.mrb[51].mxu0  ;;  %v6304_v34 = vadd.f32 %v7471_v51, %v6680_v48 }
0x2aa6   :  { %v6299_v53 = vadd.f32 %v6680_v48, %v6298_v52 }
0x2aa7   :  { %v6308_v56 = vadd.f32 %v6304_v34, %v6112_v5 }
0x2aa8   :  { %v6307_v55 = vadd.f32 %v6299_v53, %v6111_v18 }
0x2aa9   :  { %v6316_v41 = vsel %vm149_vm0, %v6308_v56, 0.0 }
0x2aaa   :  { %v6313_v57 = vsel %vm149_vm0, %v6307_v55, 0.0 }
0x2aab   :  { %6314 = vadd.xlane.f32.xlu0 %v6313_v57 }
0x2aaf   :  { %6317 = vadd.xlane.f32.xlu0 %v6316_v41 }
0x2b38   :  { %v6315_v58 = vpop.xlane.xlu0 %6314 }
0x2b39   :  { %v6319_v43 = vmul.f32 0.03125, %v6315_v58 }
0x2b3b   :  { %v6321_v42 = vsub.f32 %v6307_v55, %v6319_v43 }
0x2b3c   :  { %v6318_v60 = vpop.xlane.xlu0 %6317 }
0x2b3d   :  { %v6320_v25 = vmul.f32 0.03125, %v6318_v60  ;;  %v6323_v61 = vmul.f32 %v6321_v42, %v6321_v42 }
0x2b3f   :  { %v6322_v63 = vsub.f32 %v6308_v56, %v6320_v25  ;;  %v6325_v1 = vsel %vm149_vm0, %v6323_v61, 0.0 }
0x2b40   :  { %6326 = vadd.xlane.f32.xlu0 %v6325_v1 }
0x2b41   :  { %v6324_v3 = vmul.f32 %v6322_v63, %v6322_v63 }
0x2b43   :  { %v6328_v4 = vsel %vm149_vm0, %v6324_v3, 0.0 }
0x2b44   :  { %6329 = vadd.xlane.f32.xlu1 %v6328_v4 }
0x2bcd   :  { %v6327_v9 = vpop.xlane.xlu0 %6326 }
0x2bce   :  { %v6331_v11 = vmul.f32 0.03125, %v6327_v9 }
0x2bd0   :  { %v6333_v27 = vadd.f32 1e-05, %v6331_v11 }
0x2bd1   :  { %v6330_v6 = vpop.xlane.xlu1 %6329 }
0x2bd2   :  { %8097 = vrsqrt.f32 %v6333_v27  ;;  %v6332_v26 = vmul.f32 0.03125, %v6330_v6 }
0x2bd4   :  { %v6334_v0 = vadd.f32 1e-05, %v6332_v26 }
0x2bd6   :  { %8099 = vrsqrt.f32 %v6334_v0 }
0x2bdc   :  { %v8098_v62 = vpop.eup %8097 }
0x2bdd   :  { %v6337_v15 = vmul.f32 %v8098_v62, %v6321_v42 }
0x2bdf   :  { %v6345_v20 = vmul.f32 %v6685_v14, %v6337_v15 }
0x2be0   :  { %v8100_v23 = vpop.eup %8099 }
0x2be1   :  { %v6338_v2 = vmul.f32 %v8100_v23, %v6322_v63  ;;  %v6353_v29 = vadd.f32 %v6686_v17, %v6345_v20 }
0x2be3   :  { %v6346_v31 = vmul.f32 %v6685_v14, %v6338_v2  ;;  %7480 = vmatprep.mubr.msk.f32.mxu1 %vm149_vm0, %v6353_v29 }
0x2be5   :  { %v6354_v32 = vadd.f32 %v6686_v17, %v6346_v31 }
0x2be7   :  { %7481 = vmatmul.mubr.msk.f32.vlgmr.msra.gmra.mrb[52].mxu1 %vm149_vm0, %v6354_v32 }
0x2cba   :  { %v7482_v35 = vpop.f32.mrb[52].mxu1 }
0x2cbb   :  { %v6444_v7 = vadd.f32 %v7482_v35, %v6687_v33  ;;  %v6438_v36 = vpop.f32.mrb[53].mxu1 }
0x2cbc   :  { %v6439_v24 = vadd.f32 %v6687_v33, %v6438_v36 }
0x2cbd   :  { %6448 = vst [vmem:[%s9356_s27 + $0x8] sm:$0xff] %v6444_v7 }
0x2cbe   :  { %6447 = vst [vmem:[%s9356_s27] sm:$0xff] %v6439_v24 }
0x2cbf   :  { %6453 = vsyncpa [#allocation3], 1 }
0x2cc0   :  { %6454 = vsyncpa [#allocation5], 1 }

</bundles_post_ra>
